<compile_context>
chip_gen: v7x
topology: tpu7x:2x2x1
jax: 0.10.0
libtpu: 0.0.40
codegen_flags: <defaults>
</compile_context>

<pallas_src>
import jax
import jax.numpy as jnp
import numpy as np
from jax.experimental import pallas as pl
from jax.experimental.pallas import tpu as pltpu

LEAKY_SLOPE = 0.2


def _leaky(x):
    return jnp.where(x >= 0, x, LEAKY_SLOPE * x)


def _pick_depth_tile(d, max_td=8):
    """Largest depth tile <= max_td that divides D."""
    for td in range(min(d, max_td), 0, -1):
        if d % td == 0:
            return td
    return 1


# ---------------------------------------------------------------------------
# Fused kernel.  Grid = (N, DB); step (n, t) produces output depths
# [t*TD, (t+1)*TD) of batch n.  The d1 slab holds the TD+4 conv_1 slices
# (d1 depth indices t*TD-1 .. t*TD+TD+2) needed by those TD conv_2 outputs.
# Slab slots mapping to virtual d1 indices -1 / D+2 (conv_2's zero depth pad)
# are zeroed on the boundary blocks only.
# ---------------------------------------------------------------------------
def _make_kernel(*, td, db, width, hw, lw, guard, cout):
    def kernel(x_ref, m_ref, w1_ref, b1_ref, w2_ref, b2_ref, o_ref, d1_ref):
        t = pl.program_id(1)

        # -------- conv_1: one (Cout, 9*Cin_pad) @ (9*Cin_pad, (TD+4)*HW) -----
        x = x_ref[0, 0]                               # (Cin_pad, Lx) f32
        taps, mi = [], 0
        for kh in range(3):
            for kw in range(3):
                off = guard + (kh - 1) * width + (kw - 1)
                sl = x[:, off:off + lw]               # constant lane shift
                if not (kh == 1 and kw == 1):
                    sl = sl * m_ref[mi:mi + 1, :]     # zero H/W-edge crossings
                    mi += 1
                taps.append(sl)
        patch = jnp.concatenate(taps, axis=0)         # (9*Cin_pad, LW), aligned

        d1 = jnp.dot(w1_ref[...], patch, preferred_element_type=jnp.float32)
        d1 = _leaky(d1 + b1_ref[...])                 # (Cout, (TD+4)*HW) f32
        d1_ref[...] = d1.astype(d1_ref.dtype)

        # conv_2's depth zero-padding: slots mapping to virtual d1 indices
        # -1 / D+2 must be 0 (not leaky(b1)).  Boundary blocks only.
        @pl.when(t == 0)
        def _():
            d1_ref[:, 0:hw] = jnp.zeros((cout, hw), d1_ref.dtype)

        @pl.when(t == db - 1)
        def _():
            d1_ref[:, (td + 3) * hw:(td + 4) * hw] = jnp.zeros(
                (cout, hw), d1_ref.dtype)

        # -------- conv_2: one (Cout, 5*Cout) @ (5*Cout, TD*HW) ----------------
        rhs = jnp.concatenate(
            [d1_ref[:, kd * hw: kd * hw + td * hw] for kd in range(5)], axis=0)
        out = jnp.dot(w2_ref[...], rhs, preferred_element_type=jnp.float32)
        o_ref[0, 0] = _leaky(out + b2_ref[...]).astype(o_ref.dtype)

    return kernel


# ---------------------------------------------------------------------------
# Wrapper: NCDHW in / NCDHW out (PyTorch convention).
#   w1: (Cout, Cin, 1, 3, 3)   b1: (Cout,)
#   w2: (Cout, Cout, 5, 1, 1)  b2: (Cout,)
# ---------------------------------------------------------------------------
def sep_3dlayer_a_forward(x_ncdhw, w1, b1, w2, b2):
    N, Cin, D, H, W = x_ncdhw.shape
    Cout = w1.shape[0]
    HW = H * W

    TD = _pick_depth_tile(D)              # output depth slices per grid step
    DB = D // TD
    G = W + 1                             # lane guard so all 9 tap shifts fit
    LW = (TD + 4) * HW                    # lanes of the d1 slab
    Lx = LW + 2 * G
    Cin_pad = -(-Cin // 8) * 8            # f32 sublane quantum -> aligned im2col

    # bf16 slab / conv_2 operands only when the 5-tap sublane concat stays
    # tile-aligned for bf16 (16-sublane tiles); otherwise keep f32.
    act_dtype = jnp.bfloat16 if (Cout % 16 == 0) else jnp.float32
    act_bytes = jnp.dtype(act_dtype).itemsize

    # ---------------- input prep (wrapper-side layout plumbing) --------------
    xt = jnp.transpose(x_ncdhw, (0, 2, 1, 3, 4))                # (N,D,Cin,H,W)
    if Cin_pad > Cin:
        xt = jnp.pad(xt, ((0, 0), (0, 0), (0, Cin_pad - Cin), (0, 0), (0, 0)))
    xdp = jnp.pad(xt, ((0, 0), (2, 2), (0, 0), (0, 0), (0, 0)))  # depth halo 2
    wins = jnp.stack([xdp[:, t * TD: t * TD + TD + 4] for t in range(DB)],
                     axis=1)                                     # (N,DB,TD+4,Cp,H,W)
    xw = jnp.transpose(wins, (0, 1, 3, 2, 4, 5)).reshape(N, DB, Cin_pad, LW)
    xw = jnp.pad(xw, ((0, 0), (0, 0), (0, 0), (G, G)))           # (N,DB,Cp,Lx)

    # ---------------- H/W boundary masks for the 8 non-center taps -----------
    lane = np.arange(LW)
    hh = (lane % HW) // W
    ww = lane % W
    mh = {0: hh > 0, 1: np.ones(LW, bool), 2: hh < H - 1}
    mw = {0: ww > 0, 1: np.ones(LW, bool), 2: ww < W - 1}
    rows = [(mh[kh] & mw[kw]).astype(np.float32)
            for kh in range(3) for kw in range(3) if not (kh == 1 and kw == 1)]
    mask = jnp.asarray(np.stack(rows, axis=0))                   # (8, LW)

    # ---------------- weight / bias repacking ---------------------------------
    # w1r[o, (kh*3+kw)*Cin_pad + c] = w1[o, c, 0, kh, kw]
    w1r = jnp.transpose(w1[:, :, 0, :, :], (0, 2, 3, 1))         # (Cout,3,3,Cin)
    w1r = jnp.pad(w1r, ((0, 0), (0, 0), (0, 0), (0, Cin_pad - Cin)))
    w1r = w1r.reshape(Cout, 9 * Cin_pad).astype(jnp.float32)
    # w2r[o, kd*Cout + c] = w2[o, c, kd, 0, 0]
    w2r = jnp.transpose(w2[:, :, :, 0, 0], (0, 2, 1)).reshape(
        Cout, 5 * Cout).astype(act_dtype)
    b1r = b1.reshape(Cout, 1).astype(jnp.float32)
    b2r = b2.reshape(Cout, 1).astype(jnp.float32)

    # ---------------- VMEM budget from actual buffer sizes -------------------
    est = (2 * Cin_pad * Lx * 4                 # double-buffered x windows
           + 2 * Cout * TD * HW * 4             # double-buffered output blocks
           + 8 * LW * 4                         # resident tap masks
           + Cout * 9 * Cin_pad * 4 + Cout * 5 * Cout * act_bytes + 2 * Cout * 4
           + Cout * LW * act_bytes              # d1 slab scratch
           + 3 * 9 * Cin_pad * LW * 4           # im2col patch temporaries
           + 2 * 5 * Cout * TD * HW * act_bytes)  # conv_2 RHS temporaries
    vmem_limit = int(min(max(2 * est, 16 * 2 ** 20), 64 * 2 ** 20))

    kernel = _make_kernel(td=TD, db=DB, width=W, hw=HW, lw=LW, guard=G,
                          cout=Cout)

    out = pl.pallas_call(
        kernel,
        out_shape=jax.ShapeDtypeStruct((N, DB, Cout, TD * HW), jnp.float32),
        grid_spec=pltpu.PrefetchScalarGridSpec(
            num_scalar_prefetch=0,
            grid=(N, DB),
            in_specs=[
                pl.BlockSpec((1, 1, Cin_pad, Lx), lambda n, t: (n, t, 0, 0)),
                pl.BlockSpec((8, LW), lambda n, t: (0, 0)),
                pl.BlockSpec((Cout, 9 * Cin_pad), lambda n, t: (0, 0)),
                pl.BlockSpec((Cout, 1), lambda n, t: (0, 0)),
                pl.BlockSpec((Cout, 5 * Cout), lambda n, t: (0, 0)),
                pl.BlockSpec((Cout, 1), lambda n, t: (0, 0)),
            ],
            out_specs=pl.BlockSpec((1, 1, Cout, TD * HW),
                                   lambda n, t: (n, t, 0, 0)),
            scratch_shapes=[pltpu.VMEM((Cout, LW), act_dtype)],
        ),
        compiler_params=pltpu.CompilerParams(
            dimension_semantics=("parallel", "parallel"),
            vmem_limit_bytes=vmem_limit),
    )(xw, mask, w1r, b1r, w2r, b2r)

    # TODO(synk): nn.MaxPool3d branch (downsample_mode == 'max') is dead code
    # under the default downsample_mode='stride' and is not implemented.
    out = out.reshape(N, DB, Cout, TD, H, W)
    return jnp.transpose(out, (0, 2, 1, 3, 4, 5)).reshape(N, Cout, D, H, W)


# ---------------------------------------------------------------------------
# Pure-JAX reference (lax conv, HIGHEST precision) for correctness check.
# ---------------------------------------------------------------------------
def ref_forward(x, w1, b1, w2, b2):
    dn = jax.lax.conv_dimension_numbers(x.shape, w1.shape,
                                        ('NCDHW', 'OIDHW', 'NCDHW'))
    d1 = jax.lax.conv_general_dilated(
        x, w1, window_strides=(1, 1, 1),
        padding=[(1, 1), (1, 1), (1, 1)], dimension_numbers=dn,
        precision=jax.lax.Precision.HIGHEST)
    d1 = _leaky(d1 + b1[None, :, None, None, None])
    dn2 = jax.lax.conv_dimension_numbers(d1.shape, w2.shape,
                                         ('NCDHW', 'OIDHW', 'NCDHW'))
    d = jax.lax.conv_general_dilated(
        d1, w2, window_strides=(1, 1, 1),
        padding=[(1, 1), (0, 0), (0, 0)], dimension_numbers=dn2,
        precision=jax.lax.Precision.HIGHEST)
    return _leaky(d + b2[None, :, None, None, None])


if __name__ == "__main__":
    # Small deterministic config: stride=1, bias=True, downsample_mode='stride'.
    N, Cin, Cout, D, H, W = 2, 4, 8, 8, 16, 16

    key = jax.random.PRNGKey(0)
    kx, kw1, kb1, kw2, kb2 = jax.random.split(key, 5)

    x = jax.random.normal(kx, (N, Cin, D, H, W), jnp.float32)
    # PyTorch parameter shapes: conv_1.weight (Cout,Cin,1,3,3), conv_2.weight (Cout,Cout,5,1,1).
    w1 = jax.random.normal(kw1, (Cout, Cin, 1, 3, 3), jnp.float32) * 0.1
    b1 = jax.random.normal(kb1, (Cout,), jnp.float32) * 0.1
    w2 = jax.random.normal(kw2, (Cout, Cout, 5, 1, 1), jnp.float32) * 0.1
    b2 = jax.random.normal(kb2, (Cout,), jnp.float32) * 0.1

    out = jax.block_until_ready(jax.jit(sep_3dlayer_a_forward)(x, w1, b1, w2, b2))
    ref = jax.block_until_ready(ref_forward(x, w1, b1, w2, b2))

    assert out.shape == (N, Cout, D, H, W), out.shape
    if not np.allclose(np.asarray(out), np.asarray(ref), atol=2e-2, rtol=2e-2):
        raise AssertionError(
            "mismatch: max abs diff = "
            f"{np.max(np.abs(np.asarray(out) - np.asarray(ref)))}")
    print("KERNEL_OK")
</pallas_src>

<mosaic_0001>
module attributes {stable_mosaic.version = 11 : i64} {
  func.func @kernel(%arg0: i32, %arg1: i32, %arg2: memref<1x1x8x3106xf32, #tpu.memory_space<vmem>>, %arg3: memref<8x3072xf32, #tpu.memory_space<vmem>>, %arg4: memref<8x72xf32, #tpu.memory_space<vmem>>, %arg5: memref<8x1xf32, #tpu.memory_space<vmem>>, %arg6: memref<8x40xf32, #tpu.memory_space<vmem>>, %arg7: memref<8x1xf32, #tpu.memory_space<vmem>>, %arg8: memref<1x1x8x2048xf32, #tpu.memory_space<vmem>>, %arg9: memref<8x3072xf32, #tpu.memory_space<vmem>>) attributes {dimension_semantics = [#tpu.dimension_semantics<parallel>, #tpu.dimension_semantics<parallel>], iteration_bounds = array<i64: 2, 1>, scalar_prefetch = 0 : i64, scratch_operands = 1 : i64, tpu.core_type = #tpu.core_type<tc>, window_params = [{transform_indices = @transform_0, window_bounds = array<i64: 1, 1, 8, 3106>}, {pipeline_mode = #tpu.pipeline_mode<synchronous>, transform_indices = @transform_1, window_bounds = array<i64: 8, 3072>}, {pipeline_mode = #tpu.pipeline_mode<synchronous>, transform_indices = @transform_2, window_bounds = array<i64: 8, 72>}, {pipeline_mode = #tpu.pipeline_mode<synchronous>, transform_indices = @transform_3, window_bounds = array<i64: 8, 1>}, {pipeline_mode = #tpu.pipeline_mode<synchronous>, transform_indices = @transform_4, window_bounds = array<i64: 8, 40>}, {pipeline_mode = #tpu.pipeline_mode<synchronous>, transform_indices = @transform_5, window_bounds = array<i64: 8, 1>}, {transform_indices = @transform_6, window_bounds = array<i64: 1, 1, 8, 2048>}]} {
    %c0 = arith.constant 0 : index
    %c0_0 = arith.constant 0 : index
    %c0_1 = arith.constant 0 : index
    %c0_2 = arith.constant 0 : index
    %0 = vector.load %arg2[%c0, %c0_0, %c0_1, %c0_2] : memref<1x1x8x3106xf32, #tpu.memory_space<vmem>>, vector<1x1x8x3106xf32>
    %1 = vector.shape_cast %0 : vector<1x1x8x3106xf32> to vector<8x3106xf32>
    %2 = vector.extract_strided_slice %1 {offsets = [0, 0], sizes = [8, 3072], strides = [1, 1]} : vector<8x3106xf32> to vector<8x3072xf32>
    %c0_3 = arith.constant 0 : index
    %c0_4 = arith.constant 0 : index
    %3 = vector.load %arg3[%c0_3, %c0_4] : memref<8x3072xf32, #tpu.memory_space<vmem>>, vector<1x3072xf32>
    %4 = vector.broadcast %3 : vector<1x3072xf32> to vector<8x3072xf32>
    %5 = arith.mulf %2, %4 : vector<8x3072xf32>
    %6 = vector.extract_strided_slice %1 {offsets = [0, 1], sizes = [8, 3072], strides = [1, 1]} : vector<8x3106xf32> to vector<8x3072xf32>
    %c1 = arith.constant 1 : index
    %c0_5 = arith.constant 0 : index
    %7 = vector.load %arg3[%c1, %c0_5] : memref<8x3072xf32, #tpu.memory_space<vmem>>, vector<1x3072xf32>
    %8 = vector.broadcast %7 : vector<1x3072xf32> to vector<8x3072xf32>
    %9 = arith.mulf %6, %8 : vector<8x3072xf32>
    %10 = vector.extract_strided_slice %1 {offsets = [0, 2], sizes = [8, 3072], strides = [1, 1]} : vector<8x3106xf32> to vector<8x3072xf32>
    %c2 = arith.constant 2 : index
    %c0_6 = arith.constant 0 : index
    %11 = vector.load %arg3[%c2, %c0_6] : memref<8x3072xf32, #tpu.memory_space<vmem>>, vector<1x3072xf32>
    %12 = vector.broadcast %11 : vector<1x3072xf32> to vector<8x3072xf32>
    %13 = arith.mulf %10, %12 : vector<8x3072xf32>
    %14 = vector.extract_strided_slice %1 {offsets = [0, 16], sizes = [8, 3072], strides = [1, 1]} : vector<8x3106xf32> to vector<8x3072xf32>
    %c3 = arith.constant 3 : index
    %c0_7 = arith.constant 0 : index
    %15 = vector.load %arg3[%c3, %c0_7] : memref<8x3072xf32, #tpu.memory_space<vmem>>, vector<1x3072xf32>
    %16 = vector.broadcast %15 : vector<1x3072xf32> to vector<8x3072xf32>
    %17 = arith.mulf %14, %16 : vector<8x3072xf32>
    %18 = vector.extract_strided_slice %1 {offsets = [0, 17], sizes = [8, 3072], strides = [1, 1]} : vector<8x3106xf32> to vector<8x3072xf32>
    %19 = vector.extract_strided_slice %1 {offsets = [0, 18], sizes = [8, 3072], strides = [1, 1]} : vector<8x3106xf32> to vector<8x3072xf32>
    %c4 = arith.constant 4 : index
    %c0_8 = arith.constant 0 : index
    %20 = vector.load %arg3[%c4, %c0_8] : memref<8x3072xf32, #tpu.memory_space<vmem>>, vector<1x3072xf32>
    %21 = vector.broadcast %20 : vector<1x3072xf32> to vector<8x3072xf32>
    %22 = arith.mulf %19, %21 : vector<8x3072xf32>
    %23 = vector.extract_strided_slice %1 {offsets = [0, 32], sizes = [8, 3072], strides = [1, 1]} : vector<8x3106xf32> to vector<8x3072xf32>
    %c5 = arith.constant 5 : index
    %c0_9 = arith.constant 0 : index
    %24 = vector.load %arg3[%c5, %c0_9] : memref<8x3072xf32, #tpu.memory_space<vmem>>, vector<1x3072xf32>
    %25 = vector.broadcast %24 : vector<1x3072xf32> to vector<8x3072xf32>
    %26 = arith.mulf %23, %25 : vector<8x3072xf32>
    %27 = vector.extract_strided_slice %1 {offsets = [0, 33], sizes = [8, 3072], strides = [1, 1]} : vector<8x3106xf32> to vector<8x3072xf32>
    %c6 = arith.constant 6 : index
    %c0_10 = arith.constant 0 : index
    %28 = vector.load %arg3[%c6, %c0_10] : memref<8x3072xf32, #tpu.memory_space<vmem>>, vector<1x3072xf32>
    %29 = vector.broadcast %28 : vector<1x3072xf32> to vector<8x3072xf32>
    %30 = arith.mulf %27, %29 : vector<8x3072xf32>
    %31 = vector.extract_strided_slice %1 {offsets = [0, 34], sizes = [8, 3072], strides = [1, 1]} : vector<8x3106xf32> to vector<8x3072xf32>
    %c7 = arith.constant 7 : index
    %c0_11 = arith.constant 0 : index
    %32 = vector.load %arg3[%c7, %c0_11] : memref<8x3072xf32, #tpu.memory_space<vmem>>, vector<1x3072xf32>
    %33 = vector.broadcast %32 : vector<1x3072xf32> to vector<8x3072xf32>
    %34 = arith.mulf %31, %33 : vector<8x3072xf32>
    %35 = tpu.concatenate %5, %9, %13, %17, %18, %22, %26, %30, %34 in 0 : vector<8x3072xf32>, vector<8x3072xf32>, vector<8x3072xf32>, vector<8x3072xf32>, vector<8x3072xf32>, vector<8x3072xf32>, vector<8x3072xf32>, vector<8x3072xf32>, vector<8x3072xf32> -> vector<72x3072xf32>
    %c0_12 = arith.constant 0 : index
    %c0_13 = arith.constant 0 : index
    %36 = vector.load %arg4[%c0_12, %c0_13] : memref<8x72xf32, #tpu.memory_space<vmem>>, vector<8x72xf32>
    %cst = arith.constant dense<0.000000e+00> : vector<8x3072xf32>
    %37 = tpu.matmul %36, %35, %cst {dimension_numbers = #tpu.dot_dimension_numbers<[1], [0], [0], [1], [0, 0, 1, 1], [], []>} : vector<8x72xf32>, vector<72x3072xf32>, vector<8x3072xf32> -> vector<8x3072xf32>
    %c0_14 = arith.constant 0 : index
    %c0_15 = arith.constant 0 : index
    %38 = vector.load %arg5[%c0_14, %c0_15] : memref<8x1xf32, #tpu.memory_space<vmem>>, vector<8x1xf32>
    %39 = vector.broadcast %38 : vector<8x1xf32> to vector<8x3072xf32>
    %40 = arith.addf %37, %39 : vector<8x3072xf32>
    %cst_16 = arith.constant 0.000000e+00 : f32
    %41 = vector.broadcast %cst_16 : f32 to vector<8x3072xf32>
    %42 = arith.cmpf oge, %40, %41 : vector<8x3072xf32>
    %cst_17 = arith.constant 2.000000e-01 : f32
    %43 = vector.broadcast %cst_17 : f32 to vector<8x3072xf32>
    %44 = arith.mulf %43, %40 : vector<8x3072xf32>
    %45 = arith.select %42, %40, %44 : vector<8x3072xi1>, vector<8x3072xf32>
    %c0_18 = arith.constant 0 : index
    %c0_19 = arith.constant 0 : index
    %46 = vector.load %arg9[%c0_18, %c0_19] : memref<8x3072xf32, #tpu.memory_space<vmem>>, vector<8x3072xf32>
    tpu.vector_store %arg9[%c0_18, %c0_19], %45 {strides = array<i32>} : memref<8x3072xf32, #tpu.memory_space<vmem>>, vector<8x3072xf32>,
    %c0_i32 = arith.constant 0 : i32
    %47 = arith.cmpi eq, %arg1, %c0_i32 : i32
    %48 = arith.extui %47 : i1 to i32
    %c0_i32_20 = arith.constant 0 : i32
    %49 = arith.cmpi ne, %48, %c0_i32_20 : i32
    scf.if %49 {
      %cst_40 = arith.constant 0.000000e+00 : f32
      %72 = vector.broadcast %cst_40 : f32 to vector<8x256xf32>
      %c0_41 = arith.constant 0 : index
      %c0_42 = arith.constant 0 : index
      %73 = vector.load %arg9[%c0_41, %c0_42] : memref<8x3072xf32, #tpu.memory_space<vmem>>, vector<8x256xf32>
      tpu.vector_store %arg9[%c0_41, %c0_42], %72 {strides = array<i32>} : memref<8x3072xf32, #tpu.memory_space<vmem>>, vector<8x256xf32>,
    } else {
    }
    %c0_i32_21 = arith.constant 0 : i32
    %50 = arith.cmpi eq, %arg1, %c0_i32_21 : i32
    %51 = arith.extui %50 : i1 to i32
    %c0_i32_22 = arith.constant 0 : i32
    %52 = arith.cmpi ne, %51, %c0_i32_22 : i32
    scf.if %52 {
      %cst_40 = arith.constant 0.000000e+00 : f32
      %72 = vector.broadcast %cst_40 : f32 to vector<8x256xf32>
      %c0_41 = arith.constant 0 : index
      %c2816 = arith.constant 2816 : index
      %73 = vector.load %arg9[%c0_41, %c2816] : memref<8x3072xf32, #tpu.memory_space<vmem>>, vector<8x256xf32>
      tpu.vector_store %arg9[%c0_41, %c2816], %72 {strides = array<i32>} : memref<8x3072xf32, #tpu.memory_space<vmem>>, vector<8x256xf32>,
    } else {
    }
    %c0_23 = arith.constant 0 : index
    %c0_24 = arith.constant 0 : index
    %53 = vector.load %arg9[%c0_23, %c0_24] : memref<8x3072xf32, #tpu.memory_space<vmem>>, vector<8x2048xf32>
    %c0_25 = arith.constant 0 : index
    %c256 = arith.constant 256 : index
    %54 = vector.load %arg9[%c0_25, %c256] : memref<8x3072xf32, #tpu.memory_space<vmem>>, vector<8x2048xf32>
    %c0_26 = arith.constant 0 : index
    %c512 = arith.constant 512 : index
    %55 = vector.load %arg9[%c0_26, %c512] : memref<8x3072xf32, #tpu.memory_space<vmem>>, vector<8x2048xf32>
    %c0_27 = arith.constant 0 : index
    %c768 = arith.constant 768 : index
    %56 = vector.load %arg9[%c0_27, %c768] : memref<8x3072xf32, #tpu.memory_space<vmem>>, vector<8x2048xf32>
    %c0_28 = arith.constant 0 : index
    %c1024 = arith.constant 1024 : index
    %57 = vector.load %arg9[%c0_28, %c1024] : memref<8x3072xf32, #tpu.memory_space<vmem>>, vector<8x2048xf32>
    %58 = tpu.concatenate %53, %54, %55, %56, %57 in 0 : vector<8x2048xf32>, vector<8x2048xf32>, vector<8x2048xf32>, vector<8x2048xf32>, vector<8x2048xf32> -> vector<40x2048xf32>
    %c0_29 = arith.constant 0 : index
    %c0_30 = arith.constant 0 : index
    %59 = vector.load %arg6[%c0_29, %c0_30] : memref<8x40xf32, #tpu.memory_space<vmem>>, vector<8x40xf32>
    %cst_31 = arith.constant dense<0.000000e+00> : vector<8x2048xf32>
    %60 = tpu.matmul %59, %58, %cst_31 {dimension_numbers = #tpu.dot_dimension_numbers<[1], [0], [0], [1], [0, 0, 1, 1], [], []>} : vector<8x40xf32>, vector<40x2048xf32>, vector<8x2048xf32> -> vector<8x2048xf32>
    %c0_32 = arith.constant 0 : index
    %c0_33 = arith.constant 0 : index
    %61 = vector.load %arg7[%c0_32, %c0_33] : memref<8x1xf32, #tpu.memory_space<vmem>>, vector<8x1xf32>
    %62 = vector.broadcast %61 : vector<8x1xf32> to vector<8x2048xf32>
    %63 = arith.addf %60, %62 : vector<8x2048xf32>
    %cst_34 = arith.constant 0.000000e+00 : f32
    %64 = vector.broadcast %cst_34 : f32 to vector<8x2048xf32>
    %65 = arith.cmpf oge, %63, %64 : vector<8x2048xf32>
    %cst_35 = arith.constant 2.000000e-01 : f32
    %66 = vector.broadcast %cst_35 : f32 to vector<8x2048xf32>
    %67 = arith.mulf %66, %63 : vector<8x2048xf32>
    %68 = arith.select %65, %63, %67 : vector<8x2048xi1>, vector<8x2048xf32>
    %c0_36 = arith.constant 0 : index
    %c0_37 = arith.constant 0 : index
    %c0_38 = arith.constant 0 : index
    %c0_39 = arith.constant 0 : index
    %69 = vector.load %arg8[%c0_36, %c0_37, %c0_38, %c0_39] : memref<1x1x8x2048xf32, #tpu.memory_space<vmem>>, vector<1x1x8x2048xf32>
    %70 = vector.shape_cast %69 : vector<1x1x8x2048xf32> to vector<8x2048xf32>
    %71 = vector.shape_cast %68 : vector<8x2048xf32> to vector<1x1x8x2048xf32>
    tpu.vector_store %arg8[%c0_36, %c0_37, %c0_38, %c0_39], %71 {strides = array<i32>} : memref<1x1x8x2048xf32, #tpu.memory_space<vmem>>, vector<1x1x8x2048xf32>,
    return
  }
  func.func @transform_0(%arg0: i32, %arg1: i32) -> (i32, i32, i32, i32) {
    %c0_i32 = arith.constant 0 : i32
    %c0_i32_0 = arith.constant 0 : i32
    %c0_i32_1 = arith.constant 0 : i32
    return %arg0, %arg1, %c0_i32, %c0_i32_0 : i32, i32, i32, i32
  }
  func.func @transform_1(%arg0: i32, %arg1: i32) -> (i32, i32) {
    %c0_i32 = arith.constant 0 : i32
    %c0_i32_0 = arith.constant 0 : i32
    %c0_i32_1 = arith.constant 0 : i32
    return %c0_i32, %c0_i32_0 : i32, i32
  }
  func.func @transform_2(%arg0: i32, %arg1: i32) -> (i32, i32) {
    %c0_i32 = arith.constant 0 : i32
    %c0_i32_0 = arith.constant 0 : i32
    %c0_i32_1 = arith.constant 0 : i32
    return %c0_i32, %c0_i32_0 : i32, i32
  }
  func.func @transform_3(%arg0: i32, %arg1: i32) -> (i32, i32) {
    %c0_i32 = arith.constant 0 : i32
    %c0_i32_0 = arith.constant 0 : i32
    %c0_i32_1 = arith.constant 0 : i32
    return %c0_i32, %c0_i32_0 : i32, i32
  }
  func.func @transform_4(%arg0: i32, %arg1: i32) -> (i32, i32) {
    %c0_i32 = arith.constant 0 : i32
    %c0_i32_0 = arith.constant 0 : i32
    %c0_i32_1 = arith.constant 0 : i32
    return %c0_i32, %c0_i32_0 : i32, i32
  }
  func.func @transform_5(%arg0: i32, %arg1: i32) -> (i32, i32) {
    %c0_i32 = arith.constant 0 : i32
    %c0_i32_0 = arith.constant 0 : i32
    %c0_i32_1 = arith.constant 0 : i32
    return %c0_i32, %c0_i32_0 : i32, i32
  }
  func.func @transform_6(%arg0: i32, %arg1: i32) -> (i32, i32, i32, i32) {
    %c0_i32 = arith.constant 0 : i32
    %c0_i32_0 = arith.constant 0 : i32
    %c0_i32_1 = arith.constant 0 : i32
    return %arg0, %arg1, %c0_i32, %c0_i32_0 : i32, i32, i32, i32
  }
}

</mosaic_0001>

<bundles_post_ra>
// kernel: sep_3dlayer_a_forward.1
= control target key start
LH: loop header
LB: loop body
LE: loop exit
PB: predicated region body
PF: predicated region fallthrough
CT: control target
= control target key end

     0   :  { %s5725_s21 = smov 0   ;;  %s5727_s22 = smov 0   ;;  %s8542_s0 = inlined_call_operand.vmem [shape: f32[2,1,8,3106], index: 0, kind: input, shape index: {}]   ;;  %s8543_s1 = inlined_call_operand.vmem [shape: f32[8,3072], index: 1, kind: input, shape index: {}]   ;;  %s8544_s2 = inlined_call_operand.vmem [shape: f32[8,72], index: 2, kind: input, shape index: {}]   ;;  %s8545_s3 = inlined_call_operand.vmem [shape: f32[8,1], index: 3, kind: input, shape index: {}]   ;;  %s8546_s4 = inlined_call_operand.vmem [shape: f32[8,40], index: 4, kind: input, shape index: {}]   ;;  %s8547_s5 = inlined_call_operand.vmem [shape: f32[8,1], index: 5, kind: input, shape index: {}]   ;;  %s8548_s6 = inlined_call_operand.vmem [shape: f32[2,1,8,2048], index: 6, kind: output, shape index: {}]  }
   0x1   :  { %s5729_s23 = smov 0  }
   0x2 LB: > { %s28_s24 = sadd.s32 1, %s5667_s22  ;;  %p4838_p0 = scmp.ge.s32.totalorder %s5671_s23, 1  ;;  %s5671_s23 = sphi %s5729_s23, %s16_s23   ;;  %s5667_s22 = sphi %s5727_s22, %s8868_s22   ;;  %s5663_s21 = sphi %s5725_s21, %s8867_s21  }
   0x3   : > { %p30_p1 = scmp.ge.s32.totalorder %s28_s24, 2  ;;  %p232_p2 = scmp.lt.s32.totalorder %s5671_s23, 3 }
   0x5   : > { %s8870_s24 = smov (%p30_p1, %s28_s24), 0  ;;  %p233_p3 = pnand %p4838_p0, %p232_p2 }
   0x7   : > { %236 = sbr.rel (%p233_p3) target bundleno = 1120 (0x460), region = 44 }
   0xe   : > { %v327_v0 = vlaneseq  ;;  %v4846_v1 = vld [vmem:[%s8543_s1 + $0x1] ss:$8 sm:$0xf]  ;;  %s5673_s29 = smov 1   ;;  %s5674_s18 = smov 2   ;;  %vm630_vm0 = vcmask 7168  }
   0xf   : > { %v4847_v2 = vld [vmem:[%s8543_s1 + $0x1] ss:$8 sm:$0xf0]  ;;  %v4852_v41 = vld [vmem:[%s8543_s1 + $0x2] ss:$8 sm:$0xf] }
  0x10   : > { %v328_v3 = vshrl.u32 %v327_v0, 7  ;;  %v474_v4 = vor.u32 %v4847_v2, %v4846_v1  ;;  %v4848_v19 = vld [vmem:[%s8543_s1 + $0x41] ss:$8 sm:$0xf]  ;;  %s5675_s11 = smov 16   ;;  %s5676_s16 = smov 18  }
  0x11   : > { %v4849_v20 = vld [vmem:[%s8543_s1 + $0x41] ss:$8 sm:$0xf0]  ;;  %v4853_v42 = vld [vmem:[%s8543_s1 + $0x2] ss:$8 sm:$0xf0] }
  0x12   : > { %v5751_v5 = vsub.s32 2, %v328_v3  ;;  %v5753_v6 = vsub.s32 0, %v328_v3  ;;  %v5755_v7 = vsub.s32 3, %v328_v3  ;;  %v5757_v8 = vsub.s32 1, %v328_v3  ;;  %s5677_s26 = smov 32   ;;  %s5678_s27 = smov 33  }
  0x13   : > { %v5765_v13 = vsub.s32 5, %v328_v3  ;;  %v5767_v14 = vsub.s32 4, %v328_v3  ;;  %v5773_v17 = vsub.s32 7, %v328_v3  ;;  %v5775_v18 = vsub.s32 6, %v328_v3  ;;  %s5679_s8 = smov 34   ;;  %p270_p4 = scmp.lt.s32.totalorder %s5663_s21, 1 }
  0x14   : > { %8655 = vst [vmem:[#allocation3_spill] sm:$0xff] %v5751_v5  ;;  %8656 = vst [vmem:[#allocation4_spill] sm:$0xff] %v5753_v6  ;;  %v497_v9 = vrot.slane %v474_v4, %v5751_v5  ;;  %v489_v10 = vrot.slane %v474_v4, %v5753_v6  ;;  %v501_v11 = vrot.slane %v474_v4, %v5755_v7  ;;  %v4850_v30 = vld [vmem:[%s8543_s1 + $0x81] ss:$8 sm:$0xf]  ;;  %s5680_s28 = smov 127  }
  0x15   : > { %8657 = vst [vmem:[#allocation5_spill] sm:$0xff] %v5755_v7  ;;  %8658 = vst [vmem:[#allocation6_spill] sm:$0xff] %v5757_v8  ;;  %v493_v12 = vrot.slane %v474_v4, %v5757_v8  ;;  %v509_v15 = vrot.slane %v474_v4, %v5765_v13  ;;  %v505_v16 = vrot.slane %v474_v4, %v5767_v14  ;;  %v4851_v31 = vld [vmem:[%s8543_s1 + $0x81] ss:$8 sm:$0xf0]  ;;  %s8872_s21 = smov (!%p270_p4, %s5663_s21), 1 }
  0x16   : > { %586 = vrot.lane.b32.xlu1 %v497_v9, %s5673_s29  ;;  %582 = vrot.lane.b32.xlu0 %v489_v10, %s5673_s29  ;;  %8659 = vst [vmem:[#allocation7_spill] sm:$0xff] %v5765_v13  ;;  %8660 = vst [vmem:[#allocation8_spill] sm:$0xff] %v5767_v14  ;;  %v517_v21 = vrot.slane %v474_v4, %v5773_v17  ;;  %v513_v22 = vrot.slane %v474_v4, %v5775_v18  ;;  %v4854_v52 = vld [vmem:[%s8543_s1 + $0x42] ss:$8 sm:$0xf]  ;;  %s5167_s17 = smul.u32 200, %s8872_s21 }
  0x17   : > { %8661 = vst [vmem:[#allocation9_spill] sm:$0xff] %v5773_v17  ;;  %8662 = vst [vmem:[#allocation10_spill] sm:$0xff] %v5775_v18  ;;  %v478_v23 = vor.u32 %v4849_v20, %v4848_v19  ;;  %v482_v34 = vor.u32 %v4851_v31, %v4850_v30  ;;  %v707_v45 = vor.u32 %v4853_v42, %v4852_v41  ;;  %v4855_v53 = vld [vmem:[%s8543_s1 + $0x42] ss:$8 sm:$0xf0]  ;;  %vm863_vm1 = vcmask 15360  }
  0x18   : > { %v5853_v56 = vor.u32 %v4855_v53, %v4854_v52  ;;  %v4858_v61 = vld [vmem:[%s8543_s1 + $0x3] ss:$8 sm:$0xf]  ;;  %v4864_v2 = vld [vmem:[%s8543_s1 + $0x4] ss:$8 sm:$0xf]  ;;  %s6217_s25 = scalar_lea.vmem %s8542_s0, %s5167_s17 }
  0x19   : > { %v525_v24 = vrot.slane %v478_v23, %v5757_v8  ;;  %v521_v25 = vrot.slane %v478_v23, %v5753_v6  ;;  %v533_v26 = vrot.slane %v478_v23, %v5755_v7  ;;  %v529_v27 = vrot.slane %v478_v23, %v5751_v5  ;;  %v4859_v62 = vld [vmem:[%s8543_s1 + $0x3] ss:$8 sm:$0xf0]  ;;  %v4865_v3 = vld [vmem:[%s8543_s1 + $0x4] ss:$8 sm:$0xf0] }
  0x1a   : > { %588 = vrot.lane.b32.xlu1 %v501_v11, %s5673_s29  ;;  %584 = vrot.lane.b32.xlu0 %v493_v12, %s5673_s29  ;;  %v541_v28 = vrot.slane %v478_v23, %v5765_v13  ;;  %v537_v29 = vrot.slane %v478_v23, %v5767_v14  ;;  %v549_v32 = vrot.slane %v478_v23, %v5773_v17  ;;  %v4882_v31 = vld [vmem:[%s8543_s1 + $0x7] ss:$8 sm:$0xf]  ;;  %vm1096_vm2 = vcmask 130048   ;;  %s5682_s30 = smov 112   ;;  %s5683_s13 = smov 111  }
  0x1b   : > { %v545_v33 = vrot.slane %v478_v23, %v5775_v18  ;;  %v557_v35 = vrot.slane %v482_v34, %v5757_v8  ;;  %v553_v36 = vrot.slane %v482_v34, %v5753_v6  ;;  %v565_v37 = vrot.slane %v482_v34, %v5755_v7  ;;  %v4877_v23 = vld [vmem:[%s8543_s1 + $0x6] ss:$8 sm:$0xf0]  ;;  %s5684_s14 = smov 110   ;;  %s5685_s7 = smov 96  }
  0x1c   : > { %v561_v38 = vrot.slane %v482_v34, %v5751_v5  ;;  %v573_v39 = vrot.slane %v482_v34, %v5765_v13  ;;  %v569_v40 = vrot.slane %v482_v34, %v5767_v14  ;;  %v581_v43 = vrot.slane %v482_v34, %v5773_v17  ;;  %s5686_s9 = smov 95   ;;  %s5687_s15 = smov 94  }
  0x1d   : > { %v577_v44 = vrot.slane %v482_v34, %v5775_v18  ;;  %v726_v46 = vrot.slane %v707_v45, %v5757_v8  ;;  %v722_v47 = vrot.slane %v707_v45, %v5753_v6  ;;  %v734_v48 = vrot.slane %v707_v45, %v5755_v7 }
  0x1e   : > { %592 = vrot.lane.b32.xlu1 %v509_v15, %s5673_s29  ;;  %590 = vrot.lane.b32.xlu0 %v505_v16, %s5673_s29  ;;  %v730_v49 = vrot.slane %v707_v45, %v5751_v5  ;;  %v742_v50 = vrot.slane %v707_v45, %v5765_v13  ;;  %v738_v51 = vrot.slane %v707_v45, %v5767_v14  ;;  %v4870_v15 = vld [vmem:[%s8543_s1 + $0x5] ss:$8 sm:$0xf]  ;;  %vm1329_vm3 = vcmask 146432  }
  0x1f   : > { %v750_v54 = vrot.slane %v707_v45, %v5773_v17  ;;  %v746_v55 = vrot.slane %v707_v45, %v5775_v18  ;;  %v758_v57 = vrot.slane %v5853_v56, %v5757_v8  ;;  %v754_v58 = vrot.slane %v5853_v56, %v5753_v6  ;;  %v4871_v16 = vld [vmem:[%s8543_s1 + $0x5] ss:$8 sm:$0xf0] }
  0x20   : > { %v766_v59 = vrot.slane %v5853_v56, %v5755_v7  ;;  %v762_v60 = vrot.slane %v5853_v56, %v5751_v5  ;;  %v774_v63 = vrot.slane %v5853_v56, %v5765_v13  ;;  %v770_v0 = vrot.slane %v5853_v56, %v5767_v14 }
  0x21   : > { %v5879_v1 = vor.u32 %v4859_v62, %v4858_v61  ;;  %v5893_v10 = vor.u32 %v4865_v3, %v4864_v2  ;;  %v4860_v2 = vld [vmem:[%s8543_s1 + $0x43] ss:$8 sm:$0xf]  ;;  %vm1795_vm4 = vcmask 269312   ;;  %vm1562_vm5 = vcmask 261120  }
  0x22   : > { %596 = vrot.lane.b32.xlu1 %v517_v21, %s5673_s29  ;;  %594 = vrot.lane.b32.xlu0 %v513_v22, %s5673_s29  ;;  %v5913_v21 = vor.u32 %v4871_v16, %v4870_v15  ;;  %v4876_v22 = vld [vmem:[%s8543_s1 + $0x6] ss:$8 sm:$0xf]  ;;  %v4861_v3 = vld [vmem:[%s8543_s1 + $0x43] ss:$8 sm:$0xf0] }
  0x23   : > { %v959_v4 = vrot.slane %v5879_v1, %v5757_v8  ;;  %v955_v9 = vrot.slane %v5879_v1, %v5753_v6  ;;  %v1188_v11 = vrot.slane %v5893_v10, %v5753_v6  ;;  %v963_v12 = vrot.slane %v5879_v1, %v5751_v5 }
  0x24   : > { %v1196_v19 = vrot.slane %v5893_v10, %v5751_v5  ;;  %v1192_v20 = vrot.slane %v5893_v10, %v5757_v8  ;;  %v967_v34 = vrot.slane %v5879_v1, %v5755_v7  ;;  %v979_v41 = vrot.slane %v5879_v1, %v5775_v18 }
  0x25   : > { %v1208_v42 = vrot.slane %v5893_v10, %v5765_v13  ;;  %v6045_v15 = vor.u32 %v4861_v3, %v4860_v2  ;;  %vm2028_vm6 = vcmask 277504   ;;  %vm2177_vm7 = vcmask 1039360  }
  0x26   : > { %600 = vrot.lane.b32.xlu1 %v525_v24, %s5673_s29  ;;  %598 = vrot.lane.b32.xlu0 %v521_v25, %s5673_s29  ;;  %v1425_v24 = vrot.slane %v5913_v21, %v5757_v8  ;;  %v1421_v25 = vrot.slane %v5913_v21, %v5753_v6  ;;  %vm2301_vm8 = vcmask 1031168   ;;  %vm2425_vm9 = vcmask 916480  }
  0x27   : > { %vm2549_vm10 = vcmask 908288   ;;  %vm2673_vm11 = vcmask 900096   ;;  %vm2797_vm12 = vcmask 785408   ;;  %vm2921_vm13 = vcmask 777216  }
  0x28   : > { %vm3045_vm14 = vcmask 769024   ;;  %vm3101_vm15 = vcmask 588800  }
  0x2a   : > { %604 = vrot.lane.b32.xlu1 %v533_v26, %s5673_s29  ;;  %602 = vrot.lane.b32.xlu0 %v529_v27, %s5673_s29  ;;  %v5927_v26 = vor.u32 %v4877_v23, %v4876_v22  ;;  %v987_v22 = vrot.slane %v6045_v15, %v5753_v6 }
  0x2c   : > { %v1654_v27 = vrot.slane %v5927_v26, %v5753_v6  ;;  %v1658_v30 = vrot.slane %v5927_v26, %v5757_v8 }
  0x2e   : > { %608 = vrot.lane.b32.xlu1 %v541_v28, %s5673_s29  ;;  %606 = vrot.lane.b32.xlu0 %v537_v29, %s5673_s29  ;;  %v1429_v28 = vrot.slane %v5913_v21, %v5751_v5  ;;  %v1662_v29 = vrot.slane %v5927_v26, %v5751_v5 }
  0x32   : > { %612 = vrot.lane.b32.xlu1 %v549_v32, %s5673_s29  ;;  %610 = vrot.lane.b32.xlu0 %v545_v33, %s5673_s29  ;;  %v4883_v32 = vld [vmem:[%s8543_s1 + $0x7] ss:$8 sm:$0xf0]  ;;  %v971_v33 = vrot.slane %v5879_v1, %v5767_v14 }
  0x36   : > { %616 = vrot.lane.b32.xlu1 %v557_v35, %s5673_s29  ;;  %614 = vrot.lane.b32.xlu0 %v553_v36, %s5673_s29  ;;  %v5953_v35 = vor.u32 %v4883_v32, %v4882_v31  ;;  %v1216_v31 = vrot.slane %v5893_v10, %v5773_v17  ;;  %v995_v32 = vrot.slane %v6045_v15, %v5751_v5 }
  0x38   : > { %v1891_v36 = vrot.slane %v5953_v35, %v5757_v8 }
  0x3a   : > { %620 = vrot.lane.b32.xlu1 %v565_v37, %s5673_s29  ;;  %618 = vrot.lane.b32.xlu0 %v561_v38, %s5673_s29  ;;  %v1887_v37 = vrot.slane %v5953_v35, %v5753_v6  ;;  %v975_v38 = vrot.slane %v5879_v1, %v5765_v13 }
  0x3e   : > { %624 = vrot.lane.b32.xlu1 %v573_v39, %s5673_s29  ;;  %622 = vrot.lane.b32.xlu0 %v569_v40, %s5673_s29  ;;  %v1895_v39 = vrot.slane %v5953_v35, %v5751_v5  ;;  %v1200_v40 = vrot.slane %v5893_v10, %v5755_v7 }
  0x42   : > { %628 = vrot.lane.b32.xlu1 %v581_v43, %s5673_s29  ;;  %626 = vrot.lane.b32.xlu0 %v577_v44, %s5673_s29  ;;  %v1204_v43 = vrot.slane %v5893_v10, %v5767_v14  ;;  %s5681_s29 = smov 126  }
  0x46   : > { %817 = vrot.lane.b32.xlu1 %v726_v46, %s5674_s18  ;;  %815 = vrot.lane.b32.xlu0 %v722_v47, %s5674_s18  ;;  %v1433_v46 = vrot.slane %v5913_v21, %v5755_v7  ;;  %v1212_v47 = vrot.slane %v5893_v10, %v5775_v18  ;;  %v4872_v10 = vld [vmem:[%s8543_s1 + $0x45] ss:$8 sm:$0xf] }
  0x4a   : > { %821 = vrot.lane.b32.xlu1 %v734_v48, %s5674_s18  ;;  %819 = vrot.lane.b32.xlu0 %v730_v49, %s5674_s18 }
  0x4e   : > { %825 = vrot.lane.b32.xlu1 %v742_v50, %s5674_s18  ;;  %823 = vrot.lane.b32.xlu0 %v738_v51, %s5674_s18  ;;  %v1666_v50 = vrot.slane %v5927_v26, %v5755_v7  ;;  %v1437_v51 = vrot.slane %v5913_v21, %v5767_v14 }
  0x52   : > { %829 = vrot.lane.b32.xlu1 %v750_v54, %s5674_s18  ;;  %827 = vrot.lane.b32.xlu0 %v746_v55, %s5674_s18  ;;  %v1441_v54 = vrot.slane %v5913_v21, %v5765_v13  ;;  %v1670_v55 = vrot.slane %v5927_v26, %v5767_v14 }
  0x56   : > { %833 = vrot.lane.b32.xlu1 %v758_v57, %s5674_s18  ;;  %831 = vrot.lane.b32.xlu0 %v754_v58, %s5674_s18 }
  0x5a   : > { %837 = vrot.lane.b32.xlu1 %v766_v59, %s5674_s18  ;;  %835 = vrot.lane.b32.xlu0 %v762_v60, %s5674_s18  ;;  %v1674_v59 = vrot.slane %v5927_v26, %v5765_v13  ;;  %v1445_v60 = vrot.slane %v5913_v21, %v5775_v18 }
  0x5e   : > { %841 = vrot.lane.b32.xlu1 %v774_v63, %s5674_s18  ;;  %839 = vrot.lane.b32.xlu0 %v770_v0, %s5674_s18  ;;  %v1899_v63 = vrot.slane %v5953_v35, %v5755_v7  ;;  %v1678_v0 = vrot.slane %v5927_v26, %v5775_v18 }
  0x62   : > { %1050 = vrot.lane.b32.xlu1 %v959_v4, %s5675_s11  ;;  %1048 = vrot.lane.b32.xlu0 %v955_v9, %s5675_s11 }
  0x66   : > { %1281 = vrot.lane.b32.xlu1 %v1188_v11, %s5676_s16  ;;  %1052 = vrot.lane.b32.xlu0 %v963_v12, %s5675_s11  ;;  %v983_v11 = vrot.slane %v5879_v1, %v5773_v17  ;;  %v1903_v12 = vrot.slane %v5953_v35, %v5767_v14 }
  0x6a   : > { %1285 = vrot.lane.b32.xlu1 %v1196_v19, %s5676_s16  ;;  %1283 = vrot.lane.b32.xlu0 %v1192_v20, %s5676_s16  ;;  %v1907_v20 = vrot.slane %v5953_v35, %v5765_v13 }
  0x6e   : > { %1516 = vrot.lane.b32.xlu1 %v1425_v24, %s5677_s26  ;;  %1514 = vrot.lane.b32.xlu0 %v1421_v25, %s5677_s26  ;;  %v991_v24 = vrot.slane %v6045_v15, %v5757_v8  ;;  %v1911_v25 = vrot.slane %v5953_v35, %v5775_v18 }
  0x72   : > { %1747 = vrot.lane.b32.xlu1 %v1654_v27, %s5678_s27  ;;  %1518 = vrot.lane.b32.xlu0 %v1429_v28, %s5677_s26  ;;  %v4866_v27 = vld [vmem:[%s8543_s1 + $0x44] ss:$8 sm:$0xf] }
  0x73   : > { %v4867_v28 = vld [vmem:[%s8543_s1 + $0x44] ss:$8 sm:$0xf0] }
  0x76   : > { %1751 = vrot.lane.b32.xlu1 %v1662_v29, %s5678_s27  ;;  %1749 = vrot.lane.b32.xlu0 %v1658_v30, %s5678_s27 }
  0x7a   : > { %1056 = vrot.lane.b32.xlu1 %v971_v33, %s5675_s11  ;;  %1054 = vrot.lane.b32.xlu0 %v967_v34, %s5675_s11  ;;  %v6083_v33 = vor.u32 %v4867_v28, %v4866_v27  ;;  %v1915_v27 = vrot.slane %v5953_v35, %v5773_v17 }
  0x7e   : > { %1982 = vrot.lane.b32.xlu1 %v1891_v36, %s5679_s8  ;;  %1980 = vrot.lane.b32.xlu0 %v1887_v37, %s5679_s8  ;;  %v1224_v37 = vrot.slane %v6083_v33, %v5757_v8 }
  0x82   : > { %1058 = vrot.lane.b32.xlu1 %v975_v38, %s5675_s11  ;;  %1984 = vrot.lane.b32.xlu0 %v1895_v39, %s5679_s8  ;;  %v1220_v38 = vrot.slane %v6083_v33, %v5753_v6  ;;  %v4873_v39 = vld [vmem:[%s8543_s1 + $0x45] ss:$8 sm:$0xf0] }
  0x86   : > { %1287 = vrot.lane.b32.xlu1 %v1200_v40, %s5676_s16  ;;  %1060 = vrot.lane.b32.xlu0 %v979_v41, %s5675_s11 }
  0x88   : > { %v5979_v44 = vpop.permute.xlu1 %586  ;;  %v5981_v45 = vpop.permute.xlu0 %582 }
  0x8a   : > { %1291 = vrot.lane.b32.xlu1 %v1208_v42, %s5676_s16  ;;  %1289 = vrot.lane.b32.xlu0 %v1204_v43, %s5676_s16  ;;  %v1449_v42 = vrot.slane %v5913_v21, %v5773_v17  ;;  %v1228_v43 = vrot.slane %v6083_v33, %v5751_v5  ;;  %v1682_v21 = vrot.slane %v5927_v26, %v5773_v17 }
  0x8c   : > { %v5989_v48 = vpop.permute.xlu1 %588  ;;  %v5991_v49 = vpop.permute.xlu0 %584 }
  0x8e   : > { %1520 = vrot.lane.b32.xlu1 %v1433_v46, %s5677_s26  ;;  %1293 = vrot.lane.b32.xlu0 %v1212_v47, %s5676_s16  ;;  %v6111_v46 = vor.u32 %v4873_v39, %v4872_v10  ;;  %v4878_v47 = vld [vmem:[%s8543_s1 + $0x46] ss:$8 sm:$0xf] }
  0x90   : > { %v5999_v52 = vpop.permute.xlu1 %592  ;;  %v6001_v53 = vpop.permute.xlu0 %590 }
  0x92   : > { %1753 = vrot.lane.b32.xlu1 %v1666_v50, %s5678_s27  ;;  %1522 = vrot.lane.b32.xlu0 %v1437_v51, %s5677_s26  ;;  %v4879_v50 = vld [vmem:[%s8543_s1 + $0x46] ss:$8 sm:$0xf0] }
  0x94   : > { %v6009_v57 = vpop.permute.xlu1 %596  ;;  %v6011_v58 = vpop.permute.xlu0 %594 }
  0x96   : > { %1524 = vrot.lane.b32.xlu1 %v1441_v54, %s5677_s26  ;;  %1755 = vrot.lane.b32.xlu0 %v1670_v55, %s5678_s27  ;;  %v1453_v55 = vrot.slane %v6111_v46, %v5753_v6 }
  0x98   : > { %v6019_v61 = vpop.permute.xlu1 %600  ;;  %v6021_v62 = vpop.permute.xlu0 %598 }
  0x99   : > { %8663 = vst [vmem:[#allocation11_spill] sm:$0xff] %v6019_v61  ;;  %8664 = vst [vmem:[#allocation12_spill] sm:$0xff] %v6021_v62  ;;  %v6467_v62 = vld [vmem:[%s6217_s25 + $0x28] sm:$0xff] }
  0x9a   : > { %1757 = vrot.lane.b32.xlu1 %v1674_v59, %s5678_s27  ;;  %1526 = vrot.lane.b32.xlu0 %v1445_v60, %s5677_s26  ;;  %v6129_v59 = vor.u32 %v4879_v50, %v4878_v47 }
  0x9c   : > { %v6035_v4 = vpop.permute.xlu1 %604  ;;  %v6037_v9 = vpop.permute.xlu0 %602  ;;  %v1686_v2 = vrot.slane %v6129_v59, %v5753_v6  ;;  %v1694_v28 = vrot.slane %v6129_v59, %v5751_v5 }
  0x9d   : > { %8665 = vst [vmem:[#allocation13_spill] sm:$0xff] %v6035_v4  ;;  %8666 = vst [vmem:[#allocation14_spill] sm:$0xff] %v6037_v9 }
  0x9e   : > { %1986 = vrot.lane.b32.xlu1 %v1899_v63, %s5679_s8  ;;  %1759 = vrot.lane.b32.xlu0 %v1678_v0, %s5678_s27  ;;  %v1457_v0 = vrot.slane %v6111_v46, %v5757_v8 }
  0xa0   : > { %v6047_v16 = vpop.permute.xlu1 %608  ;;  %v6049_v19 = vpop.permute.xlu0 %606 }
  0xa1   : > { %8667 = vst [vmem:[#allocation15_spill] sm:$0xff] %v6047_v16  ;;  %8668 = vst [vmem:[#allocation16_spill] sm:$0xff] %v6049_v19 }
  0xa2   : > { %1062 = vrot.lane.b32.xlu1 %v983_v11, %s5675_s11  ;;  %1988 = vrot.lane.b32.xlu0 %v1903_v12, %s5679_s8  ;;  %v1690_v11 = vrot.slane %v6129_v59, %v5757_v8  ;;  %v1461_v12 = vrot.slane %v6111_v46, %v5751_v5 }
  0xa4   : > { %v6057_v1 = vpop.permute.xlu1 %612  ;;  %v6059_v23 = vpop.permute.xlu0 %610 }
  0xa5   : > { %8669 = vst [vmem:[#allocation17_spill] sm:$0xff] %v6057_v1  ;;  %8670 = vst [vmem:[#allocation18_spill] sm:$0xff] %v6059_v23 }
  0xa6   : > { %1990 = vrot.lane.b32.xlu1 %v1907_v20, %s5679_s8  ;;  %1064 = vrot.lane.b32.xlu0 %v987_v22, %s5675_s11  ;;  %v4884_v20 = vld [vmem:[%s8543_s1 + $0x47] ss:$8 sm:$0xf] }
  0xa7   : > { %v4885_v22 = vld [vmem:[%s8543_s1 + $0x47] ss:$8 sm:$0xf0] }
  0xa8   : > { %v6073_v29 = vpop.permute.xlu1 %616  ;;  %v6075_v30 = vpop.permute.xlu0 %614 }
  0xa9   : > { %8671 = vst [vmem:[#allocation19_spill] sm:$0xff] %v6073_v29  ;;  %8672 = vst [vmem:[#allocation20_spill] sm:$0xff] %v6075_v30 }
  0xaa   : > { %1066 = vrot.lane.b32.xlu1 %v991_v24, %s5675_s11  ;;  %1992 = vrot.lane.b32.xlu0 %v1911_v25, %s5679_s8 }
  0xac   : > { %v6085_v34 = vpop.permute.xlu1 %620  ;;  %v6087_v36 = vpop.permute.xlu0 %618 }
  0xad   : > { %8673 = vst [vmem:[#allocation21_spill] sm:$0xff] %v6085_v34  ;;  %8674 = vst [vmem:[#allocation22_spill] sm:$0xff] %v6087_v36 }
  0xae   : > { %1295 = vrot.lane.b32.xlu1 %v1216_v31, %s5676_s16  ;;  %1068 = vrot.lane.b32.xlu0 %v995_v32, %s5675_s11  ;;  %v6167_v31 = vor.u32 %v4885_v22, %v4884_v20 }
  0xb0   : > { %v6101_v40 = vpop.permute.xlu1 %624  ;;  %v6103_v41 = vpop.permute.xlu0 %622  ;;  %v1919_v35 = vrot.slane %v6167_v31, %v5753_v6 }
  0xb1   : > { %8675 = vst [vmem:[#allocation23_spill] sm:$0xff] %v6101_v40  ;;  %8676 = vst [vmem:[#allocation24_spill] sm:$0xff] %v6103_v41  ;;  %v6274_v41 = vld [vmem:[%s6217_s25] sm:$0xff] }
  0xb2   : > { %1299 = vrot.lane.b32.xlu1 %v1224_v37, %s5676_s16  ;;  %1297 = vrot.lane.b32.xlu0 %v1220_v38, %s5676_s16  ;;  %v999_v38 = vrot.slane %v6045_v15, %v5755_v7 }
  0xb4   : > { %v6119_v51 = vpop.permute.xlu1 %628  ;;  %v6121_v54 = vpop.permute.xlu0 %626 }
  0xb5   : > { %8677 = vst [vmem:[#allocation25_spill] sm:$0xff] %v6119_v51  ;;  %8678 = vst [vmem:[#allocation26_spill] sm:$0xff] %v6121_v54 }
  0xb6   : > { %1528 = vrot.lane.b32.xlu1 %v1449_v42, %s5677_s26  ;;  %1301 = vrot.lane.b32.xlu0 %v1228_v43, %s5676_s16  ;;  %v1923_v42 = vrot.slane %v6167_v31, %v5757_v8  ;;  %v1003_v43 = vrot.slane %v6045_v15, %v5767_v14 }
  0xb8   : > { %v6131_v60 = vpop.permute.xlu1 %817  ;;  %v6133_v63 = vpop.permute.xlu0 %815 }
  0xb9   : > { %v864_v30 = vsel %vm863_vm1, %v6133_v63, %v6131_v60 }
  0xba   : > { %1761 = vrot.lane.b32.xlu1 %v1682_v21, %s5678_s27  ;;  %1530 = vrot.lane.b32.xlu0 %v1453_v55, %s5677_s26  ;;  %v778_v21 = vrot.slane %v5853_v56, %v5775_v18  ;;  %v1927_v55 = vrot.slane %v6167_v31, %v5751_v5 }
  0xbc   : > { %v6141_v26 = vpop.permute.xlu1 %821  ;;  %v6143_v3 = vpop.permute.xlu0 %819 }
  0xbe   : > { %1532 = vrot.lane.b32.xlu1 %v1457_v0, %s5677_s26  ;;  %1763 = vrot.lane.b32.xlu0 %v1686_v2, %s5678_s27 }
  0xc0   : > { %v6157_v24 = vpop.permute.xlu1 %825  ;;  %v6159_v25 = vpop.permute.xlu0 %823 }
  0xc2   : > { %1765 = vrot.lane.b32.xlu1 %v1690_v11, %s5678_s27  ;;  %1534 = vrot.lane.b32.xlu0 %v1461_v12, %s5677_s26  ;;  %v1011_v11 = vrot.slane %v6045_v15, %v5775_v18  ;;  %v1007_v12 = vrot.slane %v6045_v15, %v5765_v13 }
  0xc4   : > { %v6169_v32 = vpop.permute.xlu1 %829  ;;  %v6171_v37 = vpop.permute.xlu0 %827 }
  0xc6   : > { %1994 = vrot.lane.b32.xlu1 %v1915_v27, %s5679_s8  ;;  %1767 = vrot.lane.b32.xlu0 %v1694_v28, %s5678_s27  ;;  %v6222_v27 = vld [vmem:[%s6217_s25 + $0x8] sm:$0xff]  ;;  %v6225_v28 = vld [vmem:[%s6217_s25 + $0x10] sm:$0xff] }
  0xc8   : > { %v6180_v10 = vpop.permute.xlu1 %833  ;;  %v6182_v39 = vpop.permute.xlu0 %831 }
  0xc9   : > { %8679 = vst [vmem:[#allocation27_spill] sm:$0xff] %v6180_v10  ;;  %8680 = vst [vmem:[#allocation28_spill] sm:$0xff] %v6182_v39 }
  0xca   : > { %1070 = vrot.lane.b32.xlu1 %v999_v38, %s5675_s11  ;;  %1996 = vrot.lane.b32.xlu0 %v1919_v35, %s5679_s8  ;;  %v631_v38 = vsel %vm630_vm0, %v5981_v45, %v5991_v49  ;;  %v632_v35 = vsel %vm630_vm0, %v5991_v49, %v5979_v44  ;;  %v1240_v49 = vrot.slane %v6083_v33, %v5765_v13 }
  0xcc   : > { %v6193_v47 = vpop.permute.xlu1 %837  ;;  %v6195_v50 = vpop.permute.xlu0 %835 }
  0xcd   : > { %8681 = vst [vmem:[#allocation29_spill] sm:$0xff] %v6193_v47  ;;  %8682 = vst [vmem:[#allocation30_spill] sm:$0xff] %v6195_v50 }
  0xce   : > { %1998 = vrot.lane.b32.xlu1 %v1923_v42, %s5679_s8  ;;  %1072 = vrot.lane.b32.xlu0 %v1003_v43, %s5675_s11  ;;  %v1236_v42 = vrot.slane %v6083_v33, %v5767_v14  ;;  %v1232_v43 = vrot.slane %v6083_v33, %v5755_v7 }
  0xd0   : > { %v6204_v0 = vpop.permute.xlu1 %841  ;;  %v6206_v2 = vpop.permute.xlu0 %839 }
  0xd1   : > { %8683 = vst [vmem:[#allocation31_spill] sm:$0xff] %v6204_v0  ;;  %8684 = vst [vmem:[#allocation32_spill] sm:$0xff] %v6206_v2 }
  0xd2   : > { %843 = vrot.lane.b32.xlu1 %v778_v21, %s5674_s18  ;;  %2000 = vrot.lane.b32.xlu0 %v1927_v55, %s5679_s8  ;;  %v680_v21 = vmul.f32 %v631_v38, %v6222_v27  ;;  %v681_v55 = vmul.f32 %v632_v35, %v6225_v28  ;;  %v1465_v38 = vrot.slane %v6111_v46, %v5755_v7 }
  0xd3   : > { %v1244_v35 = vrot.slane %v6083_v33, %v5775_v18 }
  0xd4   : > { %v1051_v20 = vpop.permute.xlu1 %1050  ;;  %v6219_v22 = vpop.permute.xlu0 %1048 }
  0xd5   : > { %v1097_v0 = vsel %vm1096_vm2, %v6219_v22, %v1051_v20 }
  0xd6   : > { %1076 = vrot.lane.b32.xlu1 %v1011_v11, %s5675_s11  ;;  %1074 = vrot.lane.b32.xlu0 %v1007_v12, %s5675_s11  ;;  %v5209_v11 = vpack.i.bf16 %v681_v55, %v680_v21  ;;  %v6262_v21 = vld [vmem:[%s6217_s25 + $0x18] sm:$0xff]  ;;  %v633_v55 = vsel %vm630_vm0, %v5979_v44, %v5989_v48  ;;  %v865_v44 = vsel %vm863_vm1, %v6131_v60, %v6143_v3 }
  0xd7   : > { %v682_v34 = vmul.f32 %v633_v55, %v6262_v21  ;;  %v1702_v55 = vrot.slane %v6129_v59, %v5767_v14  ;;  %v914_v1 = vmul.f32 %v865_v44, %v6225_v28  ;;  %v1146_v16 = vmul.f32 %v1097_v0, %v6222_v27 }
  0xd8   : > { %v6241_v51 = vpop.permute.xlu1 %1281  ;;  %v1053_v54 = vpop.permute.xlu0 %1052  ;;  %v1477_v0 = vrot.slane %v6111_v46, %v5775_v18 }
  0xda   : > { %1305 = vrot.lane.b32.xlu1 %v1236_v42, %s5676_s16  ;;  %1303 = vrot.lane.b32.xlu0 %v1232_v43, %s5676_s16 }
  0xdc   : > { %v6247_v12 = vpop.permute.xlu1 %1285  ;;  %v6249_v40 = vpop.permute.xlu0 %1283 }
  0xde   : > { %1307 = vrot.lane.b32.xlu1 %v1240_v49, %s5676_s16  ;;  %5210 = vrot.lane.b32.xlu0 %v5209_v11, %s5680_s28  ;;  %v1698_v49 = vrot.slane %v6129_v59, %v5755_v7  ;;  %v1469_v11 = vrot.slane %v6111_v46, %v5767_v14 }
  0xe0   : > { %v6257_v42 = vpop.permute.xlu1 %1516  ;;  %v6259_v43 = vpop.permute.xlu0 %1514 }
  0xe2   : > { %1536 = vrot.lane.b32.xlu1 %v1465_v38, %s5677_s26  ;;  %1309 = vrot.lane.b32.xlu0 %v1244_v35, %s5676_s16  ;;  %v1098_v38 = vsel %vm1096_vm2, %v1051_v20, %v1053_v54  ;;  %v679_v35 = vmul.f32 %v5981_v45, %v6274_v41 }
  0xe3   : > { %v1147_v23 = vmul.f32 %v1098_v38, %v6225_v28 }
  0xe4   : > { %v6277_v36 = vpop.permute.xlu1 %1747  ;;  %v6279_v29 = vpop.permute.xlu0 %1518  ;;  %v5214_v2 = vpack.i.bf16 %v682_v34, %v679_v35 }
  0xe5   : > { %v5224_v19 = vpack.i.bf16 %v1147_v23, %v1146_v16  ;;  %v866_v16 = vsel %vm863_vm1, %v6143_v3, %v6141_v26 }
  0xe6   : > { %1769 = vrot.lane.b32.xlu1 %v1698_v49, %s5678_s27  ;;  %1538 = vrot.lane.b32.xlu0 %v1469_v11, %s5677_s26  ;;  %v913_v11 = vmul.f32 %v864_v30, %v6222_v27  ;;  %v1473_v30 = vrot.slane %v6111_v46, %v5765_v13  ;;  %v915_v38 = vmul.f32 %v866_v16, %v6262_v21 }
  0xe8   : > { %v6298_v45 = vpop.permute.xlu1 %1751  ;;  %v6300_v49 = vpop.permute.xlu0 %1749  ;;  %v5219_v60 = vpack.i.bf16 %v914_v1, %v913_v11  ;;  %v1145_v11 = vmul.f32 %v6219_v22, %v6274_v41  ;;  %v1931_v22 = vrot.slane %v6167_v31, %v5755_v7 }
  0xea   : > { %1771 = vrot.lane.b32.xlu0 %v1702_v55, %s5678_s27  ;;  %5215 = vrot.lane.b32.xlu1 %v5214_v2, %s5680_s28  ;;  %v1710_v2 = vrot.slane %v6129_v59, %v5775_v18 }
  0xec   : > { %v6306_v20 = vpop.permute.xlu1 %1056  ;;  %v6308_v34 = vpop.permute.xlu0 %1054 }
  0xed   : > { %v1099_v23 = vsel %vm1096_vm2, %v1053_v54, %v6308_v34  ;;  %v912_v54 = vmul.f32 %v6133_v63, %v6274_v41  ;;  %v1331_v63 = vsel %vm1329_vm3, %v6249_v40, %v6247_v12 }
  0xee   : > { %5220 = vrot.lane.b32.xlu0 %v5219_v60, %s5681_s29  ;;  %5225 = vrot.lane.b32.xlu1 %v5224_v19, %s5682_s30  ;;  %v1706_v19 = vrot.slane %v6129_v59, %v5765_v13  ;;  %v1148_v35 = vmul.f32 %v1099_v23, %v6262_v21  ;;  %v1330_v23 = vsel %vm1329_vm3, %v6241_v51, %v6249_v40 }
  0xef   : > { %v5229_v60 = vpack.i.bf16 %v915_v38, %v912_v54  ;;  %v1380_v38 = vmul.f32 %v1331_v63, %v6225_v28 }
  0xf0   : > { %v6316_v44 = vpop.permute.xlu1 %1982  ;;  %v6318_v1 = vpop.permute.xlu0 %1980 }
  0xf2   : > { %1540 = vrot.lane.b32.xlu0 %v1473_v30, %s5677_s26  ;;  %1542 = vrot.lane.b32.xlu1 %v1477_v0, %s5677_s26  ;;  %v5234_v30 = vpack.i.bf16 %v1148_v35, %v1145_v11  ;;  %v5239_v11 = vpack.i.bf16 %v6225_v28, %v6222_v27 }
  0xf4   : > { %v6333_v55 = vpop.permute.xlu1 %1058  ;;  %v6335_v3 = vpop.permute.xlu0 %1984 }
  0xf6   : > { %1773 = vrot.lane.b32.xlu0 %v1706_v19, %s5678_s27  ;;  %1775 = vrot.lane.b32.xlu1 %v1710_v2, %s5678_s27  ;;  %v1935_v19 = vrot.slane %v6167_v31, %v5767_v14  ;;  %v1379_v2 = vmul.f32 %v1330_v23, %v6222_v27 }
  0xf8   : > { %v6343_v0 = vpop.permute.xlu1 %1287  ;;  %v6345_v16 = vpop.permute.xlu0 %1060  ;;  %v5244_v23 = vpack.i.bf16 %v1380_v38, %v1379_v2  ;;  %v4862_v2 = vld [vmem:[%s8543_s1 + $0x83] ss:$8 sm:$0xf] }
  0xf9   : > { %v1332_v40 = vsel %vm1329_vm3, %v6247_v12, %v6343_v0  ;;  %v4863_v38 = vld [vmem:[%s8543_s1 + $0x83] ss:$8 sm:$0xf0] }
  0xfa   : > { %5230 = vrot.lane.b32.xlu0 %v5229_v60, %s5681_s29  ;;  %5235 = vrot.lane.b32.xlu1 %v5234_v30, %s5682_s30  ;;  %v4856_v60 = vld [vmem:[%s8543_s1 + $0x82] ss:$8 sm:$0xf]  ;;  %v1381_v63 = vmul.f32 %v1332_v40, %v6262_v21 }
  0xfb   : > { %v4857_v30 = vld [vmem:[%s8543_s1 + $0x82] ss:$8 sm:$0xf0] }
  0xfc   : > { %v6361_v35 = vpop.permute.xlu1 %1291  ;;  %v6363_v54 = vpop.permute.xlu0 %1289  ;;  %v6389_v50 = vor.u32 %v4857_v30, %v4856_v60  ;;  %v782_v60 = vrot.slane %v5853_v56, %v5773_v17 }
  0xfe   : > { %2002 = vrot.lane.b32.xlu0 %v1931_v22, %s5679_s8  ;;  %2004 = vrot.lane.b32.xlu1 %v1935_v19, %s5679_s8  ;;  %v1378_v22 = vmul.f32 %v6241_v51, %v6274_v41  ;;  %v5249_v19 = vpack.i.bf16 %v6262_v21, %v6274_v41  ;;  %8685 = vst [vmem:[#allocation33_spill] sm:$0xff] %v6389_v50 }
  0xff   : > { %v786_v30 = vrot.slane %v6389_v50, %v5753_v6 }
 0x100   : > { %v6379_v47 = vpop.permute.xlu1 %1520  ;;  %v6381_v12 = vpop.permute.xlu0 %1293  ;;  %v5254_v51 = vpack.i.bf16 %v1381_v63, %v1378_v22  ;;  %v1015_v63 = vrot.slane %v6045_v15, %v5773_v17  ;;  %v1797_v15 = vsel %vm1795_vm4, %v6300_v49, %v6298_v45 }
 0x102   : > { %5240 = vrot.lane.b32.xlu0 %v5239_v11, %s5683_s13  ;;  %5245 = vrot.lane.b32.xlu1 %v5244_v23, %s5684_s14  ;;  %v6407_v23 = vor.u32 %v4863_v38, %v4862_v2  ;;  %v1564_v2 = vsel %vm1562_vm5, %v6257_v42, %v6279_v29  ;;  %v1796_v38 = vsel %vm1795_vm4, %v6277_v36, %v6300_v49 }
 0x103   : > { %v1613_v4 = vmul.f32 %v1564_v2, %v6225_v28  ;;  %v1845_v9 = vmul.f32 %v1796_v38, %v6222_v27  ;;  %v1846_v49 = vmul.f32 %v1797_v15, %v6225_v28 }
 0x104   : > { %v6397_v40 = vpop.permute.xlu1 %1753  ;;  %v6399_v11 = vpop.permute.xlu0 %1522  ;;  %8686 = vst [vmem:[#allocation34_spill] sm:$0xff] %v6407_v23  ;;  %v1019_v56 = vrot.slane %v6407_v23, %v5753_v6 }
 0x105   : > { %v5264_v15 = vpack.i.bf16 %v1846_v49, %v1845_v9  ;;  %v1844_v9 = vmul.f32 %v6277_v36, %v6274_v41  ;;  %v790_v36 = vrot.slane %v6389_v50, %v5757_v8 }
 0x106   : > { %5250 = vrot.lane.b32.xlu0 %v5249_v19, %s5683_s13  ;;  %5255 = vrot.lane.b32.xlu1 %v5254_v51, %s5684_s14  ;;  %v1939_v51 = vrot.slane %v6167_v31, %v5765_v13 }
 0x108   : > { %v6409_v10 = vpop.permute.xlu1 %1524  ;;  %v6411_v39 = vpop.permute.xlu0 %1755 }
 0x10a   : > { %845 = vrot.lane.b32.xlu0 %v782_v60, %s5674_s18  ;;  %847 = vrot.lane.b32.xlu1 %v786_v30, %s5674_s18  ;;  %v1943_v60 = vrot.slane %v6167_v31, %v5775_v18  ;;  %v1563_v30 = vsel %vm1562_vm5, %v6259_v43, %v6257_v42  ;;  %v1565_v18 = vsel %vm1562_vm5, %v6279_v29, %v6379_v47  ;;  %v6464_v29 = vld [vmem:[%s6217_s25 + $0x20] sm:$0xff] }
 0x10b   : > { %v1798_v42 = vsel %vm1795_vm4, %v6298_v45, %v6397_v40  ;;  %v1612_v2 = vmul.f32 %v1563_v30, %v6222_v27  ;;  %v1614_v13 = vmul.f32 %v1565_v18, %v6262_v21  ;;  %8689 = vst [vmem:[#allocation37_spill] sm:$0xff] %v6464_v29  ;;  %v634_v45 = vsel %vm630_vm0, %v5989_v48, %v6001_v53 }
 0x10c   : > { %v6419_v22 = vpop.permute.xlu1 %1757  ;;  %v6421_v19 = vpop.permute.xlu0 %1526  ;;  %v1611_v18 = vmul.f32 %v6259_v43, %v6274_v41 }
 0x10d   : > { %v5259_v38 = vpack.i.bf16 %v1613_v4, %v1612_v2  ;;  %v635_v4 = vsel %vm630_vm0, %v6001_v53, %v5999_v52 }
 0x10e   : > { %1078 = vrot.lane.b32.xlu0 %v1015_v63, %s5675_s11  ;;  %1080 = vrot.lane.b32.xlu1 %v1019_v56, %s5675_s11  ;;  %v684_v48 = vmul.f32 %v635_v4, %v6467_v62 }
 0x110   : > { %v6444_v63 = vpop.permute.xlu1 %1986  ;;  %v6446_v56 = vpop.permute.xlu0 %1759 }
 0x111   : > { %8687 = vst [vmem:[#allocation35_spill] sm:$0xff] %v6444_v63  ;;  %8688 = vst [vmem:[#allocation36_spill] sm:$0xff] %v6446_v56  ;;  %v1847_v63 = vmul.f32 %v1798_v42, %v6262_v21 }
 0x112   : > { %2006 = vrot.lane.b32.xlu0 %v1939_v51, %s5679_s8  ;;  %2008 = vrot.lane.b32.xlu1 %v1943_v60, %s5679_s8  ;;  %v683_v51 = vmul.f32 %v634_v45, %v6464_v29  ;;  %v5269_v60 = vpack.i.bf16 %v1614_v13, %v1611_v18  ;;  %v794_v13 = vrot.slane %v6389_v50, %v5751_v5  ;;  %v6512_v18 = vld [vmem:[%s6217_s25 + $0x30] sm:$0xff] }
 0x113   : > { %v5274_v30 = vpack.i.bf16 %v1847_v63, %v1844_v9  ;;  %v1023_v63 = vrot.slane %v6407_v23, %v5757_v8  ;;  %v6515_v9 = vld [vmem:[%s6217_s25 + $0x38] sm:$0xff] }
 0x114   : > { %v6459_v56 = vpop.permute.xlu1 %1062  ;;  %v6461_v61 = vpop.permute.xlu0 %1988  ;;  %v5279_v43 = vpack.i.bf16 %v684_v48, %v683_v51  ;;  %8692 = vst [vmem:[#allocation40_spill] sm:$0xff] %v6515_v9  ;;  %v636_v51 = vsel %vm630_vm0, %v5999_v52, %v6011_v58  ;;  %v637_v48 = vsel %vm630_vm0, %v6011_v58, %v6009_v57  ;;  %v867_v58 = vsel %vm863_vm1, %v6141_v26, %v6159_v25 }
 0x115   : > { %v686_v52 = vmul.f32 %v637_v48, %v6515_v9 }
 0x116   : > { %5260 = vrot.lane.b32.xlu0 %v5259_v38, %s5685_s7  ;;  %5265 = vrot.lane.b32.xlu1 %v5264_v15, %s5686_s9  ;;  %v4868_v38 = vld [vmem:[%s8543_s1 + $0x84] ss:$8 sm:$0xf] }
 0x117   : > { %v4869_v15 = vld [vmem:[%s8543_s1 + $0x84] ss:$8 sm:$0xf0] }
 0x118   : > { %v6483_v49 = vpop.permute.xlu1 %1990  ;;  %v6485_v53 = vpop.permute.xlu0 %1064 }
 0x11a   : > { %5270 = vrot.lane.b32.xlu0 %v5269_v60, %s5685_s7  ;;  %5275 = vrot.lane.b32.xlu1 %v5274_v30, %s5686_s9  ;;  %v1027_v60 = vrot.slane %v6407_v23, %v5751_v5  ;;  %v1248_v30 = vrot.slane %v6083_v33, %v5773_v17  ;;  %v1101_v33 = vsel %vm1096_vm2, %v6306_v20, %v6333_v55 }
 0x11c   : > { %v6491_v42 = vpop.permute.xlu1 %1066  ;;  %v6493_v2 = vpop.permute.xlu0 %1992 }
 0x11d   : > { %8690 = vst [vmem:[#allocation38_spill] sm:$0xff] %v6493_v2 }
 0x11e   : > { %5280 = vrot.lane.b32.xlu0 %v5279_v43, %s5680_s28  ;;  %849 = vrot.lane.b32.xlu1 %v790_v36, %s5674_s18  ;;  %v6529_v36 = vor.u32 %v4869_v15, %v4868_v38  ;;  %v685_v43 = vmul.f32 %v636_v51, %v6512_v18  ;;  %v1100_v38 = vsel %vm1096_vm2, %v6308_v34, %v6306_v20 }
 0x11f   : > { %v916_v15 = vmul.f32 %v867_v58, %v6464_v29  ;;  %v1150_v51 = vmul.f32 %v1101_v33, %v6467_v62  ;;  %v2030_v58 = vsel %vm2028_vm6, %v6316_v44, %v6335_v3  ;;  %v4875_v33 = vld [vmem:[%s8543_s1 + $0x85] ss:$8 sm:$0xf0] }
 0x120   : > { %v6507_v45 = vpop.permute.xlu1 %1295  ;;  %v6509_v4 = vpop.permute.xlu0 %1068  ;;  %8693 = vst [vmem:[#allocation41_spill] sm:$0xff] %v6529_v36  ;;  %v5284_v26 = vpack.i.bf16 %v686_v52, %v685_v43  ;;  %v2029_v52 = vsel %vm2028_vm6, %v6318_v1, %v6316_v44  ;;  %v1256_v44 = vrot.slane %v6529_v36, %v5757_v8 }
 0x121   : > { %8691 = vst [vmem:[#allocation39_spill] sm:$0xff] %v6509_v4 }
 0x122   : > { %851 = vrot.lane.b32.xlu0 %v794_v13, %s5674_s18  ;;  %1082 = vrot.lane.b32.xlu1 %v1023_v63, %s5675_s11  ;;  %v868_v13 = vsel %vm863_vm1, %v6159_v25, %v6157_v24  ;;  %v1252_v63 = vrot.slane %v6529_v36, %v5753_v6 }
 0x123   : > { %v917_v25 = vmul.f32 %v868_v13, %v6467_v62  ;;  %v4874_v13 = vld [vmem:[%s8543_s1 + $0x85] ss:$8 sm:$0xf] }
 0x124   : > { %v6533_v4 = vpop.permute.xlu1 %1299  ;;  %v6535_v2 = vpop.permute.xlu0 %1297 }
 0x125   : > { %8694 = vst [vmem:[#allocation42_spill] sm:$0xff] %v6533_v4 }
 0x126   : > { %1084 = vrot.lane.b32.xlu0 %v1027_v60, %s5675_s11  ;;  %1311 = vrot.lane.b32.xlu1 %v1248_v30, %s5676_s16  ;;  %v1149_v60 = vmul.f32 %v1100_v38, %v6464_v29  ;;  %v5289_v30 = vpack.i.bf16 %v917_v25, %v916_v15  ;;  %v2079_v38 = vmul.f32 %v2030_v58, %v6225_v28  ;;  %v4880_v28 = vld [vmem:[%s8543_s1 + $0x86] ss:$8 sm:$0xf] }
 0x127   : > { %v1260_v25 = vrot.slane %v6529_v36, %v5751_v5 }
 0x128   : > { %v6556_v48 = vpop.permute.xlu1 %1528  ;;  %v6558_v4 = vpop.permute.xlu0 %1301  ;;  %v5294_v20 = vpack.i.bf16 %v1150_v51, %v1149_v60  ;;  %v6593_v51 = vor.u32 %v4875_v33, %v4874_v13  ;;  %v4881_v60 = vld [vmem:[%s8543_s1 + $0x86] ss:$8 sm:$0xf0] }
 0x129   : > { %v6611_v13 = vor.u32 %v4881_v60, %v4880_v28 }
 0x12a   : > { %1313 = vrot.lane.b32.xlu0 %v1252_v63, %s5676_s16  ;;  %5285 = vrot.lane.b32.xlu1 %v5284_v26, %s5680_s28  ;;  %v2078_v63 = vmul.f32 %v2029_v52, %v6222_v27  ;;  %8695 = vst [vmem:[#allocation43_spill] sm:$0xff] %v6593_v51  ;;  %v1481_v52 = vrot.slane %v6111_v46, %v5773_v17 }
 0x12b   : > { %v1485_v58 = vrot.slane %v6593_v51, %v5753_v6  ;;  %8697 = vst [vmem:[#allocation45_spill] sm:$0xff] %v6611_v13  ;;  %v870_v46 = vsel %vm863_vm1, %v6171_v37, %v6169_v32  ;;  %v1718_v28 = vrot.slane %v6611_v13, %v5753_v6 }
 0x12c   : > { %v6563_v34 = vpop.permute.xlu1 %1761  ;;  %v6565_v43 = vpop.permute.xlu0 %1530 }
 0x12e   : > { %5290 = vrot.lane.b32.xlu0 %v5289_v30, %s5681_s29  ;;  %5295 = vrot.lane.b32.xlu1 %v5294_v20, %s5682_s30 }
 0x130   : > { %v6583_v26 = vpop.permute.xlu1 %1532  ;;  %v6585_v15 = vpop.permute.xlu0 %1763 }
 0x132   : > { %2997 = vrot.lane.b32.xlu0 %v2078_v63, %s5687_s15  ;;  %2999 = vrot.lane.b32.xlu1 %v2079_v38, %s5687_s15  ;;  %v8580_v38 = vmov 0.0  }
 0x133   : > { %3169 = vmatprep.mubr.f32.mxu0 %v8580_v38  ;;  %3240 = vmatprep.mubr.f32.mxu1 %v8580_v38  ;;  %v919_v38 = vmul.f32 %v870_v46, %v6515_v9 }
 0x134   : > { %v6601_v30 = vpop.permute.xlu1 %1765  ;;  %v6603_v20 = vpop.permute.xlu0 %1534 }
 0x135   : > { %8696 = vst [vmem:[#allocation44_spill] sm:$0xff] %v6603_v20 }
 0x136   : > { %1315 = vrot.lane.b32.xlu0 %v1256_v44, %s5676_s16  ;;  %1317 = vrot.lane.b32.xlu1 %v1260_v25, %s5676_s16  ;;  %v869_v44 = vsel %vm863_vm1, %v6157_v24, %v6171_v37  ;;  %v1714_v25 = vrot.slane %v6129_v59, %v5773_v17  ;;  %v1103_v37 = vsel %vm1096_vm2, %v6345_v16, %v6459_v56 }
 0x137   : > { %v918_v60 = vmul.f32 %v869_v44, %v6512_v18  ;;  %v1102_v59 = vsel %vm1096_vm2, %v6333_v55, %v6345_v16  ;;  %v1152_v44 = vmul.f32 %v1103_v37, %v6515_v9 }
 0x138   : > { %v6613_v33 = vpop.permute.xlu1 %1994  ;;  %v6615_v63 = vpop.permute.xlu0 %1767  ;;  %v1151_v55 = vmul.f32 %v1102_v59, %v6512_v18  ;;  %v314_v59 = vld [vmem:[%s8543_s1] ss:$8 sm:$0xf0] }
 0x139   : > { %8698 = vst [vmem:[#allocation46_spill] sm:$0xff] %v6613_v33  ;;  %8699 = vst [vmem:[#allocation47_spill] sm:$0xff] %v6615_v63  ;;  %v8730_v63 = vld [vmem:[#allocation27_spill] sm:$0xff] }
 0x13a   : > { %1544 = vrot.lane.b32.xlu0 %v1481_v52, %s5677_s26  ;;  %1546 = vrot.lane.b32.xlu1 %v1485_v58, %s5677_s26  ;;  %v5299_v52 = vpack.i.bf16 %v919_v38, %v918_v60  ;;  %v2077_v58 = vmul.f32 %v6318_v1, %v6274_v41  ;;  %v5309_v1 = vpack.i.bf16 %v6467_v62, %v6464_v29 }
 0x13b   : > { %v5304_v60 = vpack.i.bf16 %v1152_v44, %v1151_v55  ;;  %v1493_v55 = vrot.slane %v6593_v51, %v5751_v5 }
 0x13c   : > { %v6633_v33 = vpop.permute.xlu1 %1070  ;;  %v6635_v24 = vpop.permute.xlu0 %1996 }
 0x13d   : > { %8700 = vst [vmem:[#allocation48_spill] sm:$0xff] %v6635_v24 }
 0x13e   : > { %1777 = vrot.lane.b32.xlu0 %v1714_v25, %s5678_s27  ;;  %1779 = vrot.lane.b32.xlu1 %v1718_v28, %s5678_s27  ;;  %v1333_v25 = vsel %vm1329_vm3, %v6343_v0, %v6363_v54  ;;  %v1334_v28 = vsel %vm1329_vm3, %v6363_v54, %v6361_v35  ;;  %v313_v54 = vld [vmem:[%s8543_s1] ss:$8 sm:$0xf] }
 0x13f   : > { %v1382_v16 = vmul.f32 %v1333_v25, %v6464_v29  ;;  %v1383_v38 = vmul.f32 %v1334_v28, %v6467_v62  ;;  %v6683_v28 = vor.u32 %v314_v59, %v313_v54 }
 0x140   : > { %v6648_v46 = vpop.permute.xlu1 %1998  ;;  %v6650_v24 = vpop.permute.xlu0 %1072 }
 0x141   : > { %8701 = vst [vmem:[#allocation49_spill] sm:$0xff] %v6648_v46  ;;  %8702 = vst [vmem:[#allocation50_spill] sm:$0xff] %v6650_v24  ;;  %v334_v59 = vrot.slane %v6683_v28, %v5757_v8 }
 0x142   : > { %2995 = vrot.lane.b32.xlu0 %v2077_v58, %s5687_s15  ;;  %5300 = vrot.lane.b32.xlu1 %v5299_v52, %s5681_s29  ;;  %v1489_v52 = vrot.slane %v6593_v51, %v5757_v8  ;;  %v5314_v58 = vpack.i.bf16 %v1383_v38, %v1382_v16  ;;  %v4886_v16 = vld [vmem:[%s8543_s1 + $0x87] ss:$8 sm:$0xf] }
 0x143   : > { %v4887_v38 = vld [vmem:[%s8543_s1 + $0x87] ss:$8 sm:$0xf0] }
 0x144   : > { %v6665_v37 = vpop.permute.xlu1 %843  ;;  %v6667_v0 = vpop.permute.xlu0 %2000 }
 0x145   : > { %8703 = vst [vmem:[#allocation51_spill] sm:$0xff] %v6665_v37  ;;  %8704 = vst [vmem:[#allocation52_spill] sm:$0xff] %v6667_v0  ;;  %v448_v37 = vmul.f32 %v334_v59, %v6222_v27  ;;  %v5319_v59 = vpack.i.bf16 %v6515_v9, %v6512_v18 }
 0x146   : > { %5305 = vrot.lane.b32.xlu0 %v5304_v60, %s5682_s30  ;;  %5310 = vrot.lane.b32.xlu1 %v5309_v1, %s5683_s13  ;;  %v1722_v1 = vrot.slane %v6611_v13, %v5757_v8 }
 0x148   : > { %v6679_v44 = vpop.permute.xlu1 %1076  ;;  %v6681_v25 = vpop.permute.xlu0 %1074 }
 0x149   : > { %8705 = vst [vmem:[#allocation53_spill] sm:$0xff] %v6679_v44  ;;  %8706 = vst [vmem:[#allocation54_spill] sm:$0xff] %v6681_v25  ;;  %v6709_v44 = vor.u32 %v4887_v38, %v4886_v16  ;;  %v1335_v16 = vsel %vm1329_vm3, %v6361_v35, %v6381_v12 }
 0x14a   : > { %5315 = vrot.lane.b32.xlu0 %v5314_v58, %s5684_s14  ;;  %1548 = vrot.lane.b32.xlu1 %v1489_v52, %s5677_s26  ;;  %v1726_v52 = vrot.slane %v6611_v13, %v5751_v5  ;;  %v1947_v58 = vrot.slane %v6167_v31, %v5773_v17  ;;  %v1567_v31 = vsel %vm1562_vm5, %v6399_v11, %v6409_v10 }
 0x14b   : > { %8708 = vst [vmem:[#allocation56_spill] sm:$0xff] %v6709_v44  ;;  %v1951_v27 = vrot.slane %v6709_v44, %v5753_v6  ;;  %v1616_v35 = vmul.f32 %v1567_v31, %v6467_v62 }
 0x14c   : > { %v6697_v60 = vpop.permute.xlu1 %1305  ;;  %v6699_v54 = vpop.permute.xlu0 %1303 }
 0x14d   : > { %8707 = vst [vmem:[#allocation55_spill] sm:$0xff] %v6697_v60 }
 0x14e   : > { %1550 = vrot.lane.b32.xlu0 %v1493_v55, %s5677_s26  ;;  %1781 = vrot.lane.b32.xlu1 %v1722_v1, %s5678_s27  ;;  %v1336_v55 = vsel %vm1329_vm3, %v6381_v12, %v6507_v45  ;;  %v1800_v12 = vsel %vm1795_vm4, %v6411_v39, %v6419_v22 }
 0x150   : > { %v6711_v0 = vpop.permute.xlu1 %1307  ;;  %v6713_v60 = vpop.permute.xlu0 %5210 }
 0x151   : > { %8709 = vst [vmem:[#allocation57_spill] sm:$0xff] %v6711_v0  ;;  %v8593_v1 = vunpack.i.h.bf16 %v6713_v60  ;;  %v5212_v46 = vunpack.i.l.bf16 %v6713_v60 }
 0x152   : > { %1783 = vrot.lane.b32.xlu0 %v1726_v52, %s5678_s27  ;;  %2010 = vrot.lane.b32.xlu1 %v1947_v58, %s5679_s8  ;;  %v1566_v52 = vsel %vm1562_vm5, %v6379_v47, %v6399_v11  ;;  %v1385_v58 = vmul.f32 %v1336_v55, %v6515_v9  ;;  %v1799_v11 = vsel %vm1795_vm4, %v6397_v40, %v6411_v39 }
 0x153   : > { %v2179_v38 = vsel %vm2177_vm7, %v5212_v46, %v8593_v1  ;;  %v1384_v1 = vmul.f32 %v1335_v16, %v6512_v18  ;;  %v1615_v47 = vmul.f32 %v1566_v52, %v6464_v29  ;;  %v798_v39 = vrot.slane %v6389_v50, %v5755_v7 }
 0x154   : > { %v6740_v17 = vpop.permute.xlu1 %1536  ;;  %v6742_v0 = vpop.permute.xlu0 %1309  ;;  %v4911_v24 = vpack.c.bf16 %v2179_v38, %v448_v37  ;;  %v1849_v37 = vmul.f32 %v1800_v12, %v6467_v62  ;;  %v1031_v12 = vrot.slane %v6407_v23, %v5755_v7 }
 0x155   : > { %8710 = vst [vmem:[#allocation58_spill] sm:$0xff] %v6740_v17  ;;  %8711 = vst [vmem:[#allocation59_spill] sm:$0xff] %v6742_v0  ;;  %v5324_v55 = vpack.i.bf16 %v1385_v58, %v1384_v1  ;;  %v5329_v16 = vpack.i.bf16 %v1616_v35, %v1615_v47  ;;  %v802_v35 = vrot.slane %v6389_v50, %v5767_v14 }
 0x156   : > { %4912 = vmatprep.subr.bf16.mxu0 %v4911_v24  ;;  %2012 = vrot.lane.b32.xlu0 %v1951_v27, %s5679_s8  ;;  %v330_v24 = vrot.slane %v6683_v28, %v5753_v6  ;;  %v1848_v27 = vmul.f32 %v1799_v11, %v6464_v29  ;;  %v6802_v6 = vld [vmem:[%s6217_s25 + $0x48] sm:$0xff] }
 0x157   : > { %5320 = vrot.lane.b32.xlu1 %v5319_v59, %s5683_s13 }
 0x158   : > { %v6756_v31 = vpop.permute.xlu1 %1769  ;;  %v6758_v38 = vpop.permute.xlu0 %1538  ;;  %v5334_v40 = vpack.i.bf16 %v1849_v37, %v1848_v27  ;;  %v447_v52 = vmul.f32 %v330_v24, %v6274_v41 }
 0x159   : > { %8712 = vst [vmem:[#allocation60_spill] sm:$0xff] %v6756_v31  ;;  %8713 = vst [vmem:[#allocation61_spill] sm:$0xff] %v6758_v38 }
 0x15a   : > { %5325 = vrot.lane.b32.xlu0 %v5324_v55, %s5684_s14 }
 0x15b   : > { %5330 = vrot.lane.b32.xlu1 %v5329_v16, %s5685_s7 }
 0x15c   : > { %v6767_v59 = vpop.permute.xlu0 %1771  ;;  %v6769_v1 = vpop.permute.xlu1 %5215 }
 0x15d   : > { %8714 = vst [vmem:[#allocation62_spill] sm:$0xff] %v6767_v59  ;;  %v5217_v58 = vunpack.i.l.bf16 %v6769_v1  ;;  %v8718_v59 = vld [vmem:[#allocation11_spill] sm:$0xff] }
 0x15e   : > { %5335 = vrot.lane.b32.xlu0 %v5334_v40, %s5686_s9  ;;  %v1955_v40 = vrot.slane %v6709_v44, %v5757_v8 }
 0x15f   : > { %853 = vrot.lane.b32.xlu1 %v798_v39, %s5674_s18  ;;  %v2178_v47 = vsel %vm2177_vm7, %v5217_v58, %v5212_v46  ;;  %v1569_v39 = vsel %vm1562_vm5, %v6421_v19, %v6556_v48  ;;  %v1035_v46 = vrot.slane %v6407_v23, %v5767_v14 }
 0x160   : > { %v5221_v11 = vpop.permute.xlu0 %5220  ;;  %v5226_v37 = vpop.permute.xlu1 %5225  ;;  %v4913_v55 = vpack.c.bf16 %v2178_v47, %v447_v52  ;;  %v1568_v47 = vsel %vm1562_vm5, %v6409_v10, %v6421_v19  ;;  %v1618_v0 = vmul.f32 %v1569_v39, %v6515_v9  ;;  %v8719_v10 = vld [vmem:[#allocation36_spill] sm:$0xff] }
 0x161   : > { %v5223_v41 = vunpack.i.h.bf16 %v5221_v11  ;;  %v5222_v24 = vunpack.i.l.bf16 %v5221_v11  ;;  %v5228_v16 = vunpack.i.h.bf16 %v5226_v37  ;;  %v5227_v27 = vunpack.i.l.bf16 %v5226_v37 }
 0x162   : > { %855 = vrot.lane.b32.xlu0 %v802_v35, %s5674_s18  ;;  %4914 = vmatpush1.bf16.msra.mxu0 %v4913_v55  ;;  %v6799_v55 = vld [vmem:[%s6217_s25 + $0x40] sm:$0xff]  ;;  %v1802_v19 = vsel %vm1795_vm4, %v8719_v10, %v6563_v34 }
 0x163   : > { %1086 = vrot.lane.b32.xlu1 %v1031_v12, %s5675_s11  ;;  %v2303_v52 = vsel %vm2301_vm8, %v5222_v24, %v5223_v41  ;;  %v2427_v58 = vsel %vm2425_vm9, %v5227_v27, %v5228_v16  ;;  %v8717_v12 = vld [vmem:[#allocation12_spill] sm:$0xff] }
 0x164   : > { %v6794_v11 = vpop.permute.xlu0 %1540  ;;  %v6796_v35 = vpop.permute.xlu1 %1542  ;;  %v4915_v37 = vpack.c.bf16 %v2427_v58, %v2303_v52  ;;  %v638_v8 = vsel %vm630_vm0, %v6009_v57, %v8717_v12  ;;  %v639_v38 = vsel %vm630_vm0, %v8717_v12, %v8718_v59  ;;  %v1959_v52 = vrot.slane %v6709_v44, %v5751_v5 }
 0x165   : > { %8715 = vst [vmem:[#allocation63_spill] sm:$0xff] %v6794_v11  ;;  %8716 = vst [vmem:[#allocation64_spill] sm:$0xff] %v6796_v35  ;;  %v1617_v58 = vmul.f32 %v1568_v47, %v6512_v18  ;;  %v1801_v57 = vsel %vm1795_vm4, %v6419_v22, %v8719_v10  ;;  %v687_v39 = vmul.f32 %v638_v8, %v6799_v55  ;;  %v8722_v47 = vld [vmem:[#allocation35_spill] sm:$0xff] }
 0x166   : > { %1088 = vrot.lane.b32.xlu0 %v1035_v46, %s5675_s11  ;;  %4916 = vmatprep.subr.bf16.mxu0 %v4915_v37  ;;  %v688_v12 = vmul.f32 %v639_v38, %v6802_v6  ;;  %v1851_v35 = vmul.f32 %v1802_v19, %v6515_v9  ;;  %v1850_v25 = vmul.f32 %v1801_v57, %v6512_v18 }
 0x167   : > { %2014 = vrot.lane.b32.xlu1 %v1955_v40, %s5679_s8  ;;  %v5339_v37 = vpack.i.bf16 %v1618_v0, %v1617_v58  ;;  %v2031_v8 = vsel %vm2028_vm6, %v6335_v3, %v8722_v47  ;;  %v2032_v57 = vsel %vm2028_vm6, %v8722_v47, %v6461_v61 }
 0x168   : > { %v6825_v11 = vpop.permute.xlu0 %1773  ;;  %v6827_v46 = vpop.permute.xlu1 %1775  ;;  %v5349_v22 = vpack.i.bf16 %v688_v12, %v687_v39  ;;  %v5344_v40 = vpack.i.bf16 %v1851_v35, %v1850_v25  ;;  %v2080_v12 = vmul.f32 %v2031_v8, %v6262_v21 }
 0x169   : > { %8720 = vst [vmem:[#allocation12_spill] sm:$0xff] %v6825_v11  ;;  %8721 = vst [vmem:[#allocation11_spill] sm:$0xff] %v6827_v46  ;;  %v6896_v46 = vld [vmem:[%s6217_s25 + $0x50] sm:$0xff]  ;;  %v6899_v11 = vld [vmem:[%s6217_s25 + $0x58] sm:$0xff] }
 0x16a   : > { %2016 = vrot.lane.b32.xlu0 %v1959_v52, %s5679_s8 }
 0x16b   : > { %5340 = vrot.lane.b32.xlu1 %v5339_v37, %s5685_s7 }
 0x16c   : > { %v6835_v38 = vpop.permute.xlu0 %5230  ;;  %v6837_v10 = vpop.permute.xlu1 %5235 }
 0x16d   : > { %v8605_v19 = vunpack.i.h.bf16 %v6835_v38  ;;  %v5232_v0 = vunpack.i.l.bf16 %v6835_v38  ;;  %v8604_v58 = vunpack.i.h.bf16 %v6837_v10  ;;  %v5237_v52 = vunpack.i.l.bf16 %v6837_v10 }
 0x16e   : > { %5345 = vrot.lane.b32.xlu0 %v5344_v40, %s5686_s9 }
 0x16f   : > { %5350 = vrot.lane.b32.xlu1 %v5349_v22, %s5680_s28  ;;  %v2302_v3 = vsel %vm2301_vm8, %v5232_v0, %v5222_v24  ;;  %v2426_v25 = vsel %vm2425_vm9, %v5237_v52, %v5227_v27  ;;  %v6853_v35 = vsel %vm2301_vm8, %v5223_v41, %v8605_v19  ;;  %v6858_v39 = vsel %vm2425_vm9, %v5228_v16, %v8604_v58  ;;  %v8725_v41 = vld [vmem:[#allocation7_spill] sm:$0xff]  ;;  %v8726_v16 = vld [vmem:[#allocation10_spill] sm:$0xff] }
 0x170   : > { %v6861_v37 = vpop.permute.xlu0 %2002  ;;  %v6863_v47 = vpop.permute.xlu1 %2004  ;;  %v4917_v22 = vpack.c.bf16 %v2426_v25, %v2302_v3  ;;  %v2081_v27 = vmul.f32 %v2032_v57, %v6464_v29  ;;  %v806_v40 = vrot.slane %v6389_v50, %v8725_v41  ;;  %v810_v8 = vrot.slane %v6389_v50, %v8726_v16  ;;  %v8727_v19 = vld [vmem:[#allocation14_spill] sm:$0xff]  ;;  %v8728_v50 = vld [vmem:[#allocation13_spill] sm:$0xff] }
 0x171   : > { %8723 = vst [vmem:[#allocation36_spill] sm:$0xff] %v6861_v37  ;;  %8724 = vst [vmem:[#allocation35_spill] sm:$0xff] %v6863_v47 }
 0x172   : > { %3001 = vrot.lane.b32.xlu0 %v2080_v12, %s5687_s15  ;;  %4918 = vmatpush1.bf16.msra.mxu0 %v4917_v22  ;;  %v1039_v12 = vrot.slane %v6407_v23, %v8725_v41  ;;  %v1043_v22 = vrot.slane %v6407_v23, %v8726_v16 }
 0x173   : > { %3003 = vrot.lane.b32.xlu1 %v2081_v27, %s5687_s15 }
 0x174   : > { %v5241_v0 = vpop.permute.xlu0 %5240  ;;  %v5246_v52 = vpop.permute.xlu1 %5245 }
 0x175   : > { %v5243_v3 = vunpack.i.h.bf16 %v5241_v0  ;;  %v5242_v25 = vunpack.i.l.bf16 %v5241_v0  ;;  %v5248_v57 = vunpack.i.h.bf16 %v5246_v52  ;;  %v5247_v24 = vunpack.i.l.bf16 %v5246_v52  ;;  %v8729_v52 = vld [vmem:[#allocation28_spill] sm:$0xff] }
 0x176   : > { %857 = vrot.lane.b32.xlu0 %v806_v40, %s5674_s18  ;;  %v640_v0 = vsel %vm630_vm0, %v8718_v59, %v8727_v19  ;;  %v641_v40 = vsel %vm630_vm0, %v8727_v19, %v8728_v50  ;;  %v871_v47 = vsel %vm863_vm1, %v6169_v32, %v8729_v52  ;;  %v872_v32 = vsel %vm863_vm1, %v8729_v52, %v8730_v63 }
 0x177   : > { %859 = vrot.lane.b32.xlu1 %v810_v8, %s5674_s18  ;;  %v2551_v27 = vsel %vm2549_vm10, %v5242_v25, %v5243_v3  ;;  %v2675_v58 = vsel %vm2673_vm11, %v5247_v24, %v5248_v57  ;;  %v689_v52 = vmul.f32 %v640_v0, %v6896_v46  ;;  %v690_v17 = vmul.f32 %v641_v40, %v6899_v11 }
 0x178   : > { %v6891_v8 = vpop.permute.xlu0 %5250  ;;  %v6893_v37 = vpop.permute.xlu1 %5255  ;;  %v4919_v23 = vpack.c.bf16 %v2675_v58, %v2551_v27  ;;  %v1264_v58 = vrot.slane %v6529_v36, %v5755_v7  ;;  %v1268_v27 = vrot.slane %v6529_v36, %v5767_v14  ;;  %v1104_v0 = vsel %vm1096_vm2, %v6459_v56, %v6485_v53 }
 0x179   : > { %v5252_v59 = vunpack.i.l.bf16 %v6891_v8  ;;  %v5257_v19 = vunpack.i.l.bf16 %v6893_v37  ;;  %v8731_v31 = vunpack.i.h.bf16 %v6891_v8 }
 0x17a   : > { %1090 = vrot.lane.b32.xlu0 %v1039_v12, %s5675_s11  ;;  %4920 = vmatprep.subr.bf16.mxu0 %v4919_v23  ;;  %v8732_v12 = vunpack.i.h.bf16 %v6893_v37 }
 0x17b   : > { %1092 = vrot.lane.b32.xlu1 %v1043_v22, %s5675_s11  ;;  %v2550_v9 = vsel %vm2549_vm10, %v5252_v59, %v5242_v25  ;;  %v2674_v29 = vsel %vm2673_vm11, %v5257_v19, %v5247_v24  ;;  %v6919_v20 = vsel %vm2549_vm10, %v5243_v3, %v8731_v31  ;;  %v920_v31 = vmul.f32 %v871_v47, %v6799_v55 }
 0x17c   : > { %v6924_v23 = vsel %vm2673_vm11, %v5248_v57, %v8732_v12  ;;  %v6928_v50 = vpop.permute.xlu0 %845  ;;  %v6930_v22 = vpop.permute.xlu1 %847  ;;  %v4921_v25 = vpack.c.bf16 %v2674_v29, %v2550_v9  ;;  %v921_v3 = vmul.f32 %v872_v32, %v6802_v6  ;;  %v1105_v57 = vsel %vm1096_vm2, %v6485_v53, %v6491_v42 }
 0x17d   : > { %8733 = vst [vmem:[#allocation14_spill] sm:$0xff] %v6930_v22  ;;  %v5354_v29 = vpack.i.bf16 %v690_v17, %v689_v52  ;;  %v1154_v9 = vmul.f32 %v1105_v57, %v6802_v6  ;;  %v2033_v19 = vsel %vm2028_vm6, %v6461_v61, %v6483_v49  ;;  %v1153_v32 = vmul.f32 %v1104_v0, %v6799_v55 }
 0x17e   : > { %1319 = vrot.lane.b32.xlu0 %v1264_v58, %s5676_s16  ;;  %4922 = vmatpush1.bf16.msra.mxu0 %v4921_v25  ;;  %v5359_v59 = vpack.i.bf16 %v921_v3, %v920_v31  ;;  %v2082_v58 = vmul.f32 %v2033_v19, %v6467_v62  ;;  %v1272_v61 = vrot.slane %v6529_v36, %v8725_v41  ;;  %v8738_v19 = vld [vmem:[#allocation30_spill] sm:$0xff] }
 0x17f   : > { %1321 = vrot.lane.b32.xlu1 %v1268_v27, %s5676_s16  ;;  %v5364_v56 = vpack.i.bf16 %v1154_v9, %v1153_v32  ;;  %v8737_v27 = vld [vmem:[#allocation38_spill] sm:$0xff]  ;;  %v1497_v9 = vrot.slane %v6593_v51, %v5755_v7  ;;  %v873_v32 = vsel %vm863_vm1, %v8730_v63, %v8738_v19  ;;  %v8739_v63 = vld [vmem:[#allocation29_spill] sm:$0xff] }
 0x180   : > { %v6945_v40 = vpop.permute.xlu0 %1078  ;;  %v6947_v47 = vpop.permute.xlu1 %1080  ;;  %v2034_v12 = vsel %vm2028_vm6, %v6483_v49, %v8737_v27  ;;  %v1276_v49 = vrot.slane %v6529_v36, %v8726_v16 }
 0x181   : > { %8734 = vst [vmem:[#allocation28_spill] sm:$0xff] %v6947_v47  ;;  %v2083_v52 = vmul.f32 %v2034_v12, %v6512_v18 }
 0x182   : > { %5355 = vrot.lane.b32.xlu0 %v5354_v29, %s5680_s28 }
 0x183   : > { %5360 = vrot.lane.b32.xlu1 %v5359_v59, %s5681_s29 }
 0x184   : > { %v6955_v53 = vpop.permute.xlu0 %2006  ;;  %v6957_v17 = vpop.permute.xlu1 %2008 }
 0x185   : > { %8735 = vst [vmem:[#allocation27_spill] sm:$0xff] %v6955_v53  ;;  %8736 = vst [vmem:[#allocation65_spill] sm:$0xff] %v6957_v17  ;;  %v874_v17 = vsel %vm863_vm1, %v8738_v19, %v8739_v63  ;;  %v922_v53 = vmul.f32 %v873_v32, %v6896_v46 }
 0x186   : > { %5365 = vrot.lane.b32.xlu0 %v5364_v56, %s5682_s30 }
 0x187   : > { %3005 = vrot.lane.b32.xlu1 %v2082_v58, %s5687_s15 }
 0x188   : > { %v5261_v25 = vpop.permute.xlu0 %5260  ;;  %v5266_v31 = vpop.permute.xlu1 %5265 }
 0x189   : > { %v5263_v3 = vunpack.i.h.bf16 %v5261_v25  ;;  %v5262_v57 = vunpack.i.l.bf16 %v5261_v25  ;;  %v5268_v0 = vunpack.i.h.bf16 %v5266_v31  ;;  %v5267_v29 = vunpack.i.l.bf16 %v5266_v31 }
 0x18a   : > { %3007 = vrot.lane.b32.xlu0 %v2083_v52, %s5687_s15  ;;  %v342_v52 = vrot.slane %v6683_v28, %v5755_v7  ;;  %v1730_v25 = vrot.slane %v6611_v13, %v5755_v7 }
 0x18b   : > { %1323 = vrot.lane.b32.xlu1 %v1272_v61, %s5676_s16  ;;  %v2799_v18 = vsel %vm2797_vm12, %v5262_v57, %v5263_v3  ;;  %v2923_v59 = vsel %vm2921_vm13, %v5267_v29, %v5268_v0  ;;  %v338_v61 = vrot.slane %v6683_v28, %v5751_v5 }
 0x18c   : > { %v6979_v56 = vpop.permute.xlu0 %5270  ;;  %v6981_v58 = vpop.permute.xlu1 %5275  ;;  %v4923_v12 = vpack.c.bf16 %v2923_v59, %v2799_v18  ;;  %v5218_v18 = vunpack.i.h.bf16 %v6769_v1  ;;  %v1501_v59 = vrot.slane %v6593_v51, %v5767_v14 }
 0x18d   : > { %v5272_v31 = vunpack.i.l.bf16 %v6979_v56  ;;  %v5277_v36 = vunpack.i.l.bf16 %v6981_v58  ;;  %v8740_v19 = vunpack.i.h.bf16 %v6979_v56 }
 0x18e   : > { %1325 = vrot.lane.b32.xlu0 %v1276_v49, %s5676_s16  ;;  %4924 = vmatprep.subr.bf16.mxu0 %v4923_v12  ;;  %v8741_v49 = vunpack.i.h.bf16 %v6981_v58 }
 0x18f   : > { %1552 = vrot.lane.b32.xlu1 %v1497_v9, %s5677_s26  ;;  %v2798_v24 = vsel %vm2797_vm12, %v5272_v31, %v5262_v57  ;;  %v2922_v5 = vsel %vm2921_vm13, %v5277_v36, %v5267_v29  ;;  %v7006_v1 = vsel %vm2797_vm12, %v5263_v3, %v8740_v19  ;;  %v450_v57 = vmul.f32 %v342_v52, %v6262_v21  ;;  %v8742_v29 = vld [vmem:[#allocation39_spill] sm:$0xff]  ;;  %v5630_v19 = vld [vmem:[%s6217_s25 + $0x10] sm:$0xff] }
 0x190   : > { %v7011_v12 = vsel %vm2921_vm13, %v5268_v0, %v8741_v49  ;;  %v7014_v47 = vpop.permute.xlu0 %5280  ;;  %v7016_v22 = vpop.permute.xlu1 %849  ;;  %v4925_v9 = vpack.c.bf16 %v2922_v5, %v2798_v24  ;;  %v923_v3 = vmul.f32 %v874_v17, %v6899_v11  ;;  %v1107_v31 = vsel %vm1096_vm2, %v8742_v29, %v6633_v33  ;;  %v8754_v36 = vld [vmem:[#allocation13_spill] sm:$0xff] }
 0x191   : > { %v8627_v0 = vunpack.i.l.bf16 %v7014_v47  ;;  %v449_v32 = vmul.f32 %v5630_v19, %v338_v61  ;;  %v1734_v5 = vrot.slane %v6611_v13, %v5767_v14  ;;  %v8743_v21 = vunpack.i.h.bf16 %v6713_v60 }
 0x192   : > { %1554 = vrot.lane.b32.xlu0 %v1501_v59, %s5677_s26  ;;  %4926 = vmatpush1.bf16.msra.mxu0 %v4925_v9  ;;  %v1106_v17 = vsel %vm1096_vm2, %v6491_v42, %v8742_v29  ;;  %v1156_v61 = vmul.f32 %v1107_v31, %v6899_v11  ;;  %v5369_v60 = vpack.i.bf16 %v923_v3, %v922_v53 }
 0x193   : > { %v2180_v24 = vsel %vm2177_vm7, %v8743_v21, %v5218_v18  ;;  %1785 = vrot.lane.b32.xlu1 %v1730_v25, %s5678_s27  ;;  %v2181_v52 = vsel %vm2177_vm7, %v5218_v18, %v8627_v0  ;;  %v1337_v19 = vsel %vm1329_vm3, %v6507_v45, %v6535_v2  ;;  %v8744_v21 = vld [vmem:[#allocation42_spill] sm:$0xff]  ;;  %v1155_v29 = vmul.f32 %v1106_v17, %v6896_v46 }
 0x194   : > { %v7041_v59 = vpop.permute.xlu0 %851  ;;  %v7043_v49 = vpop.permute.xlu1 %1082  ;;  %v4927_v9 = vpack.c.bf16 %v2181_v52, %v450_v57  ;;  %v1338_v42 = vsel %vm1329_vm3, %v6535_v2, %v8744_v21  ;;  %v4929_v25 = vpack.c.bf16 %v2180_v24, %v449_v32  ;;  %v5379_v53 = vpack.i.bf16 %v6802_v6, %v6799_v55 }
 0x195   : > { %v1386_v18 = vmul.f32 %v1337_v19, %v6799_v55  ;;  %v1387_v45 = vmul.f32 %v1338_v42, %v6802_v6  ;;  %v5374_v57 = vpack.i.bf16 %v1156_v61, %v1155_v29  ;;  %v1505_v31 = vrot.slane %v6593_v51, %v8725_v41 }
 0x196   : > { %1787 = vrot.lane.b32.xlu0 %v1734_v5, %s5678_s27  ;;  %4928 = vmatprep.subr.bf16.mxu1 %v4927_v9  ;;  %v1509_v17 = vrot.slane %v6593_v51, %v8726_v16  ;;  %v1738_v52 = vrot.slane %v6611_v13, %v8725_v41  ;;  %v1742_v42 = vrot.slane %v6611_v13, %v8726_v16  ;;  %v8747_v29 = vunpack.i.h.bf16 %v6835_v38  ;;  %v8759_v51 = vld [vmem:[#allocation60_spill] sm:$0xff] }
 0x197   : > { %5370 = vrot.lane.b32.xlu1 %v5369_v60, %s5681_s29  ;;  %4930 = vmatpush1.bf16.msra.mxu1 %v4929_v25  ;;  %v5384_v32 = vpack.i.bf16 %v1387_v45, %v1386_v18  ;;  %v1963_v25 = vrot.slane %v6709_v44, %v5755_v7  ;;  %v8748_v18 = vunpack.i.h.bf16 %v6837_v10  ;;  %v1967_v10 = vrot.slane %v6709_v44, %v5767_v14 }
 0x198   : > { %v7058_v3 = vpop.permute.xlu0 %1084  ;;  %v7060_v2 = vpop.permute.xlu1 %1311 }
 0x199   : > { %8745 = vst [vmem:[#allocation38_spill] sm:$0xff] %v7058_v3 }
 0x19a   : > { %5375 = vrot.lane.b32.xlu0 %v5374_v57, %s5682_s30 }
 0x19b   : > { %5380 = vrot.lane.b32.xlu1 %v5379_v53, %s5683_s13 }
 0x19c   : > { %v7066_v5 = vpop.permute.xlu0 %1313  ;;  %v7068_v24 = vpop.permute.xlu1 %5285 }
 0x19d   : > { %8746 = vst [vmem:[#allocation30_spill] sm:$0xff] %v7066_v5 }
 0x19e   : > { %5385 = vrot.lane.b32.xlu0 %v5384_v32, %s5684_s14 }
 0x19f   : > { %1556 = vrot.lane.b32.xlu1 %v1505_v31, %s5677_s26 }
 0x1a0   : > { %v7076_v61 = vpop.permute.xlu0 %5290  ;;  %v7078_v9 = vpop.permute.xlu1 %5295 }
 0x1a1   : > { %v8626_v60 = vunpack.i.l.bf16 %v7076_v61  ;;  %v8625_v19 = vunpack.i.l.bf16 %v7078_v9 }
 0x1a2   : > { %1558 = vrot.lane.b32.xlu0 %v1509_v17, %s5677_s26  ;;  %v1340_v17 = vsel %vm1329_vm3, %v6558_v4, %v6699_v54 }
 0x1a3   : > { %1789 = vrot.lane.b32.xlu1 %v1738_v52, %s5678_s27  ;;  %v2305_v53 = vsel %vm2301_vm8, %v8747_v29, %v8626_v60  ;;  %v2429_v45 = vsel %vm2425_vm9, %v8748_v18, %v8625_v19  ;;  %v1571_v52 = vsel %vm1562_vm5, %v6565_v43, %v6583_v26  ;;  %v1339_v29 = vsel %vm1329_vm3, %v8744_v21, %v6558_v4 }
 0x1a4   : > { %v7098_v57 = vpop.permute.xlu0 %2997  ;;  %v7100_v31 = vpop.permute.xlu1 %2999  ;;  %v4931_v32 = vpack.c.bf16 %v2429_v45, %v2305_v53  ;;  %v5389_v53 = vpack.i.bf16 %v6899_v11, %v6896_v46  ;;  %v1570_v18 = vsel %vm1562_vm5, %v6556_v48, %v6565_v43  ;;  %v8749_v45 = vpack.c.bf16 %v6858_v39, %v6853_v35 }
 0x1a5   : > { %v3047_v38 = vsel %vm3045_vm14, %v7098_v57, %v7100_v31  ;;  %v1620_v21 = vmul.f32 %v1571_v52, %v6802_v6  ;;  %v1619_v48 = vmul.f32 %v1570_v18, %v6799_v55  ;;  %v1803_v43 = vsel %vm1795_vm4, %v6563_v34, %v6585_v15  ;;  %v8753_v18 = vld [vmem:[#allocation16_spill] sm:$0xff] }
 0x1a6   : > { %1791 = vrot.lane.b32.xlu0 %v1742_v42, %s5678_s27  ;;  %3121 = vmatprep.subr.mxu0 %v3047_v38  ;;  %v1389_v42 = vmul.f32 %v1340_v17, %v6899_v11  ;;  %v642_v19 = vsel %vm630_vm0, %v8754_v36, %v8753_v18  ;;  %v1852_v34 = vmul.f32 %v1803_v43, %v6799_v55 }
 0x1a7   : > { %2018 = vrot.lane.b32.xlu1 %v1963_v25, %s5679_s8  ;;  %4932 = vmatprep.subr.bf16.mxu1 %v4931_v32  ;;  %v1804_v25 = vsel %vm1795_vm4, %v6585_v15, %v6601_v30  ;;  %v1388_v32 = vmul.f32 %v1339_v29, %v6896_v46  ;;  %v7150_v29 = vld [vmem:[%s6217_s25 + $0x60] sm:$0xff]  ;;  %v8755_v15 = vld [vmem:[#allocation58_spill] sm:$0xff]  ;;  %v1971_v36 = vrot.slane %v6709_v44, %v8725_v41 }
 0x1a8   : > { %4934 = vmatpush1.bf16.msra.mxu1 %v8749_v45  ;;  %v7127_v38 = vpop.permute.xlu0 %1315  ;;  %v7129_v4 = vpop.permute.xlu1 %1317  ;;  %v1853_v35 = vmul.f32 %v1804_v25, %v6802_v6  ;;  %v5399_v45 = vpack.i.bf16 %v1620_v21, %v1619_v48  ;;  %v7162_v21 = vld [vmem:[%s6217_s25 + $0x68] sm:$0xff]  ;;  %v346_v43 = vrot.slane %v6683_v28, %v5767_v14  ;;  %v8762_v14 = vld [vmem:[#allocation18_spill] sm:$0xff] }
 0x1a9   : > { %8750 = vst [vmem:[#allocation29_spill] sm:$0xff] %v7127_v38  ;;  %8751 = vst [vmem:[#allocation39_spill] sm:$0xff] %v7129_v4  ;;  %v5394_v39 = vpack.i.bf16 %v1389_v42, %v1388_v32  ;;  %v8757_v32 = vld [vmem:[#allocation15_spill] sm:$0xff] }
 0x1aa   : > { %2020 = vrot.lane.b32.xlu0 %v1967_v10, %s5679_s8  ;;  %v350_v10 = vrot.slane %v6683_v28, %v8725_v41  ;;  %v643_v48 = vsel %vm630_vm0, %v8753_v18, %v8757_v32  ;;  %v5404_v60 = vpack.i.bf16 %v1853_v35, %v1852_v34  ;;  %v691_v18 = vmul.f32 %v642_v19, %v7150_v29  ;;  %v8760_v41 = vld [vmem:[#allocation47_spill] sm:$0xff] }
 0x1ab   : > { %5390 = vrot.lane.b32.xlu1 %v5389_v53, %s5683_s13  ;;  %v8756_v53 = vld [vmem:[#allocation44_spill] sm:$0xff]  ;;  %v1806_v7 = vsel %vm1795_vm4, %v8760_v41, %v8759_v51  ;;  %v692_v34 = vmul.f32 %v643_v48, %v7162_v21  ;;  %v1975_v19 = vrot.slane %v6709_v44, %v8726_v16 }
 0x1ac   : > { %v7143_v17 = vpop.permute.xlu0 %1544  ;;  %v7145_v52 = vpop.permute.xlu1 %1546  ;;  %v1573_v42 = vsel %vm1562_vm5, %v8756_v53, %v8755_v15  ;;  %v1572_v0 = vsel %vm1562_vm5, %v6583_v26, %v8756_v53  ;;  %v452_v35 = vmul.f32 %v350_v10, %v6467_v62  ;;  %v1805_v26 = vsel %vm1795_vm4, %v6601_v30, %v8760_v41  ;;  %v8763_v10 = vld [vmem:[#allocation17_spill] sm:$0xff] }
 0x1ad   : > { %8752 = vst [vmem:[#allocation42_spill] sm:$0xff] %v7145_v52  ;;  %v8761_v53 = vunpack.i.l.bf16 %v7068_v24  ;;  %v644_v62 = vsel %vm630_vm0, %v8757_v32, %v8762_v14  ;;  %v645_v48 = vsel %vm630_vm0, %v8762_v14, %v8763_v10  ;;  %v1621_v30 = vmul.f32 %v1572_v0, %v6896_v46  ;;  %v8764_v41 = vld [vmem:[#allocation37_spill] sm:$0xff]  ;;  %v7218_v0 = vld [vmem:[%s6217_s25 + $0x78] sm:$0xff] }
 0x1ae   : > { %5395 = vrot.lane.b32.xlu0 %v5394_v39, %s5684_s14  ;;  %v5283_v39 = vunpack.i.h.bf16 %v7014_v47  ;;  %v8766_v52 = vunpack.i.l.bf16 %v7014_v47  ;;  %v7215_v14 = vld [vmem:[%s6217_s25 + $0x70] sm:$0xff]  ;;  %v5293_v47 = vunpack.i.h.bf16 %v7076_v61 }
 0x1af   : > { %5400 = vrot.lane.b32.xlu1 %v5399_v45, %s5685_s7  ;;  %v1622_v45 = vmul.f32 %v1573_v42, %v6899_v11 }
 0x1b0   : > { %v7176_v25 = vpop.permute.xlu0 %1777  ;;  %v7178_v13 = vpop.permute.xlu1 %1779  ;;  %v2183_v42 = vsel %vm2177_vm7, %v5283_v39, %v8761_v53  ;;  %v1855_v53 = vmul.f32 %v1806_v7, %v6899_v11  ;;  %v2182_v32 = vsel %vm2177_vm7, %v8766_v52, %v5283_v39  ;;  %v7226_v7 = vld [vmem:[%s8544_s2] sm:$0xff]  ;;  %v5298_v52 = vunpack.i.h.bf16 %v7078_v9 }
 0x1b1   : > { %8758 = vst [vmem:[#allocation16_spill] sm:$0xff] %v7178_v13  ;;  %v8765_v13 = vld [vmem:[#allocation32_spill] sm:$0xff] }
 0x1b2   : > { %5405 = vrot.lane.b32.xlu0 %v5404_v60, %s5686_s9  ;;  %v451_v60 = vmul.f32 %v346_v43, %v8764_v41  ;;  %v875_v44 = vsel %vm863_vm1, %v8739_v63, %v8765_v13  ;;  %v5409_v43 = vpack.i.bf16 %v1622_v45, %v1621_v30  ;;  %v4943_v41 = vpack.c.bf16 %v2183_v42, %v452_v35 }
 0x1b3   : > { %2022 = vrot.lane.b32.xlu1 %v1971_v36, %s5679_s8  ;;  %v1854_v36 = vmul.f32 %v1805_v26, %v6896_v46  ;;  %v5419_v45 = vpack.i.bf16 %v692_v34, %v691_v18  ;;  %v694_v35 = vmul.f32 %v645_v48, %v7218_v0  ;;  %v8768_v26 = vld [vmem:[#allocation31_spill] sm:$0xff]  ;;  %v924_v18 = vmul.f32 %v875_v44, %v7150_v29  ;;  %v8770_v34 = vld [vmem:[#allocation46_spill] sm:$0xff] }
 0x1b4   : > { %v2996_v4 = vpop.permute.xlu0 %2995  ;;  %v7212_v5 = vpop.permute.xlu1 %5300  ;;  %v876_v42 = vsel %vm863_vm1, %v8765_v13, %v8768_v26  ;;  %v8771_v13 = vmov 0.0   ;;  %v8774_v44 = vunpack.i.l.bf16 %v7078_v9 }
 0x1b5   : > { %8767 = vst [vmem:[#allocation13_spill] sm:$0xff] %v7212_v5  ;;  %v3046_v63 = vsel %vm3045_vm14, %v2996_v4, %v7098_v57  ;;  %v5302_v38 = vunpack.i.l.bf16 %v7212_v5  ;;  %v4945_v57 = vpack.c.bf16 %v2182_v32, %v451_v60  ;;  %v693_v4 = vmul.f32 %v644_v62, %v7215_v14  ;;  %v8772_v60 = vld [vmem:[#allocation48_spill] sm:$0xff] }
 0x1b6   : > { %2024 = vrot.lane.b32.xlu0 %v1975_v19, %s5679_s8  ;;  %3122 = vmatpush1.msra.mxu0 %v3046_v63  ;;  %v5414_v30 = vpack.i.bf16 %v1855_v53, %v1854_v36  ;;  %v2035_v19 = vsel %vm2028_vm6, %v8737_v27, %v8770_v34  ;;  %v2036_v53 = vsel %vm2028_vm6, %v8770_v34, %v8772_v60  ;;  %v8773_v32 = vunpack.i.l.bf16 %v7076_v61 }
 0x1b7   : > { %5410 = vrot.lane.b32.xlu1 %v5409_v43, %s5685_s7  ;;  %4944 = vmatprep.subr.bf16.mxu0 %v4943_v41  ;;  %v2430_v43 = vsel %vm2425_vm9, %v8774_v44, %v5298_v52  ;;  %v8775_v27 = vunpack.i.h.bf16 %v7212_v5  ;;  %v2307_v9 = vsel %vm2301_vm8, %v5293_v47, %v5302_v38  ;;  %v925_v34 = vmul.f32 %v876_v42, %v7162_v21  ;;  %v8777_v5 = vld [vmem:[#allocation54_spill] sm:$0xff] }
 0x1b8   : > { %v7239_v39 = vpop.permute.xlu0 %5305  ;;  %v7241_v3 = vpop.permute.xlu1 %5310  ;;  %4888 = vmatmul.mubr.msk.f32.vlgmr.msra.gmra.mrb[0].mxu0 %vm3101_vm15, %v7226_v7  ;;  %v2306_v36 = vsel %vm2301_vm8, %v8773_v32, %v5293_v47  ;;  %v8776_v32 = vld [vmem:[#allocation40_spill] sm:$0xff]  ;;  %v2085_v61 = vmul.f32 %v2036_v53, %v6799_v55  ;;  %v8780_v55 = vunpack.i.h.bf16 %v6891_v8  ;;  %v8781_v53 = vunpack.i.h.bf16 %v6893_v37 }
 0x1b9   : > { %8769 = vst [vmem:[#allocation58_spill] sm:$0xff] %v7239_v39  ;;  %v8643_v62 = vunpack.i.h.bf16 %v7239_v39  ;;  %v5307_v48 = vunpack.i.l.bf16 %v7239_v39  ;;  %4946 = vmatpush1.bf16.msra.mxu0 %v4945_v57  ;;  %3311 = vmatprep.mubr.f32.mxu0 %v8771_v13  ;;  %v7264_v63 = vsel %vm2301_vm8, %v5302_v38, %v8775_v27  ;;  %v2084_v44 = vmul.f32 %v2035_v19, %v8776_v32  ;;  %v8782_v32 = vld [vmem:[#allocation49_spill] sm:$0xff] }
 0x1ba   : > { %5415 = vrot.lane.b32.xlu0 %v5414_v30, %s5686_s9  ;;  %v8779_v19 = vunpack.i.l.bf16 %v7241_v3  ;;  %v2037_v8 = vsel %vm2028_vm6, %v8772_v60, %v8782_v32 }
 0x1bb   : > { %v7270_v41 = vsel %vm2425_vm9, %v5307_v48, %v8643_v62  ;;  %5420 = vrot.lane.b32.xlu1 %v5419_v45, %s5680_s28  ;;  %v2431_v57 = vsel %vm2425_vm9, %v5298_v52, %v5307_v48  ;;  %v8778_v45 = vld [vmem:[#allocation50_spill] sm:$0xff]  ;;  %v4949_v52 = vpack.c.bf16 %v2430_v43, %v2306_v36  ;;  %v8795_v62 = vld [vmem:[#allocation12_spill] sm:$0xff] }
 0x1bc   : > { %v7278_v27 = vpop.permute.xlu0 %5315  ;;  %v7280_v30 = vpop.permute.xlu1 %1548  ;;  %v4947_v39 = vpack.c.bf16 %v2431_v57, %v2307_v9  ;;  %v1109_v38 = vsel %vm1096_vm2, %v8778_v45, %v8777_v5  ;;  %v1108_v42 = vsel %vm1096_vm2, %v6633_v33, %v8778_v45  ;;  %v2553_v48 = vsel %vm2549_vm10, %v8780_v55, %v8779_v19  ;;  %v8783_v45 = vld [vmem:[#allocation51_spill] sm:$0xff] }
 0x1bd   : > { %v5317_v47 = vunpack.i.l.bf16 %v7278_v27  ;;  %v1158_v43 = vmul.f32 %v1109_v38, %v7162_v21  ;;  %v5429_v57 = vpack.i.bf16 %v925_v34, %v924_v18  ;;  %v878_v37 = vsel %vm863_vm1, %v8783_v45, %v6928_v50 }
 0x1be   : > { %3009 = vrot.lane.b32.xlu0 %v2084_v44, %s5687_s15  ;;  %4948 = vmatprep.subr.bf16.mxu0 %v4947_v39  ;;  %v5424_v39 = vpack.i.bf16 %v694_v35, %v693_v4  ;;  %v1157_v44 = vmul.f32 %v1108_v42, %v7150_v29  ;;  %v8784_v4 = vpack.c.bf16 %v6924_v23, %v6919_v20  ;;  %v8786_v20 = vld [vmem:[#allocation53_spill] sm:$0xff] }
 0x1bf   : > { %3011 = vrot.lane.b32.xlu1 %v2085_v61, %s5687_s15  ;;  %4950 = vmatpush1.bf16.msra.mxu0 %v4949_v52  ;;  %v2677_v36 = vsel %vm2673_vm11, %v8781_v53, %v5317_v47  ;;  %v877_v35 = vsel %vm863_vm1, %v8768_v26, %v8783_v45  ;;  %v2086_v38 = vmul.f32 %v2037_v8, %v6802_v6  ;;  %v8785_v52 = vld [vmem:[#allocation52_spill] sm:$0xff]  ;;  %v5313_v8 = vunpack.i.h.bf16 %v7241_v3 }
 0x1c0   : > { %v7305_v9 = vpop.permute.xlu0 %1550  ;;  %v7307_v33 = vpop.permute.xlu1 %1781  ;;  %v4935_v61 = vpack.c.bf16 %v2677_v36, %v2553_v48  ;;  %v5434_v18 = vpack.i.bf16 %v1158_v43, %v1157_v44  ;;  %v2038_v42 = vsel %vm2028_vm6, %v8782_v32, %v8785_v52  ;;  %v927_v19 = vmul.f32 %v878_v37, %v7218_v0  ;;  %v8787_v48 = vld [vmem:[#allocation55_spill] sm:$0xff]  ;;  %v8788_v43 = vld [vmem:[#allocation57_spill] sm:$0xff] }
 0x1c1   : > { %v1111_v23 = vsel %vm1096_vm2, %v8786_v20, %v6945_v40  ;;  %v926_v26 = vmul.f32 %v877_v35, %v7215_v14  ;;  %v1110_v55 = vsel %vm1096_vm2, %v8777_v5, %v8786_v20  ;;  %v2087_v6 = vmul.f32 %v2038_v42, %v6896_v46  ;;  %v8789_v35 = vld [vmem:[#allocation59_spill] sm:$0xff] }
 0x1c2   : > { %5425 = vrot.lane.b32.xlu0 %v5424_v39, %s5680_s28  ;;  %4936 = vmatprep.subr.bf16.mxu1 %v4935_v61  ;;  %v1341_v53 = vsel %vm1329_vm3, %v6699_v54, %v8787_v48  ;;  %v1160_v36 = vmul.f32 %v1111_v23, %v7218_v0  ;;  %v1342_v61 = vsel %vm1329_vm3, %v8787_v48, %v8788_v43  ;;  %v5318_v46 = vunpack.i.h.bf16 %v7278_v27  ;;  %v8792_v48 = vld [vmem:[#allocation61_spill] sm:$0xff] }
 0x1c3   : > { %5430 = vrot.lane.b32.xlu1 %v5429_v57, %s5681_s29  ;;  %4938 = vmatpush1.bf16.msra.mxu1 %v8784_v4  ;;  %v5439_v57 = vpack.i.bf16 %v927_v19, %v926_v26  ;;  %v1159_v5 = vmul.f32 %v1110_v55, %v7215_v14  ;;  %v1390_v54 = vmul.f32 %v1341_v53, %v7150_v29 }
 0x1c4   : > { %v7324_v60 = vpop.permute.xlu0 %1783  ;;  %v7326_v34 = vpop.permute.xlu1 %2010  ;;  %v5449_v37 = vpack.i.bf16 %v7162_v21, %v7150_v29  ;;  %v1391_v4 = vmul.f32 %v1342_v61, %v7162_v21  ;;  %v5459_v19 = vpack.i.bf16 %v7218_v0, %v7215_v14  ;;  %v1344_v20 = vsel %vm1329_vm3, %v8789_v35, %v7060_v2 }
 0x1c5   : > { %v1574_v53 = vsel %vm1562_vm5, %v8755_v15, %v8792_v48  ;;  %v8794_v61 = vunpack.i.l.bf16 %v7241_v3  ;;  %v1393_v27 = vmul.f32 %v1344_v20, %v7218_v0 }
 0x1c6   : > { %5435 = vrot.lane.b32.xlu0 %v5434_v18, %s5682_s30  ;;  %v1343_v18 = vsel %vm1329_vm3, %v8788_v43, %v8789_v35 }
 0x1c7   : > { %3013 = vrot.lane.b32.xlu1 %v2086_v38, %s5687_s15  ;;  %v5444_v38 = vpack.i.bf16 %v1160_v36, %v1159_v5  ;;  %v8793_v36 = vld [vmem:[#allocation63_spill] sm:$0xff]  ;;  %v2678_v5 = vsel %vm2673_vm11, %v5317_v47, %v5318_v46 }
 0x1c8   : > { %v7347_v39 = vpop.permute.xlu0 %2012  ;;  %v1575_v43 = vsel %vm1562_vm5, %v8792_v48, %v8793_v36 }
 0x1c9   : > { %v7352_v32 = vpop.permute.xlu1 %5320 }
 0x1ca   : > { %v8645_v44 = vunpack.i.h.bf16 %v7352_v32  ;;  %3015 = vrot.lane.b32.xlu0 %v2087_v6, %s5687_s15  ;;  %v5322_v45 = vunpack.i.l.bf16 %v7352_v32 }
 0x1cb   : > { %5440 = vrot.lane.b32.xlu1 %v5439_v57, %s5681_s29  ;;  %v2554_v57 = vsel %vm2549_vm10, %v8794_v61, %v5313_v8  ;;  %v5454_v61 = vpack.i.bf16 %v1391_v4, %v1390_v54  ;;  %v1392_v54 = vmul.f32 %v1343_v18, %v7215_v14  ;;  %v8797_v4 = vld [vmem:[#allocation64_spill] sm:$0xff] }
 0x1cc   : > { %v7368_v42 = vpop.permute.xlu0 %5325  ;;  %v7378_v23 = vsel %vm2549_vm10, %v5322_v45, %v8645_v44  ;;  %v2555_v48 = vsel %vm2549_vm10, %v5313_v8, %v5322_v45  ;;  %v1623_v45 = vmul.f32 %v1574_v53, %v7150_v29  ;;  %v1577_v20 = vsel %vm1562_vm5, %v8797_v4, %v7143_v17 }
 0x1cd   : > { %8790 = vst [vmem:[#allocation44_spill] sm:$0xff] %v7368_v42  ;;  %8791 = vst [vmem:[#allocation15_spill] sm:$0xff] %v7378_v23  ;;  %v8646_v26 = vunpack.i.h.bf16 %v7368_v42  ;;  %v5327_v55 = vunpack.i.l.bf16 %v7368_v42  ;;  %v7382_v6 = vpop.permute.xlu1 %5330  ;;  %v8796_v42 = vld [vmem:[#allocation62_spill] sm:$0xff]  ;;  %v8799_v53 = vunpack.i.h.bf16 %v6979_v56 }
 0x1ce   : > { %5445 = vrot.lane.b32.xlu0 %v5444_v38, %s5682_s30  ;;  %v1808_v15 = vsel %vm1795_vm4, %v8796_v42, %v8795_v62  ;;  %v8798_v18 = vunpack.i.l.bf16 %v7382_v6 }
 0x1cf   : > { %v7400_v35 = vsel %vm2673_vm11, %v5327_v55, %v8646_v26  ;;  %5450 = vrot.lane.b32.xlu1 %v5449_v37, %s5683_s13  ;;  %v2679_v3 = vsel %vm2673_vm11, %v5318_v46, %v5327_v55  ;;  %v1624_v26 = vmul.f32 %v1575_v43, %v7162_v21  ;;  %v4953_v46 = vpack.c.bf16 %v2678_v5, %v2554_v57 }
 0x1d0   : > { %v7407_v44 = vpop.permute.xlu0 %5335  ;;  %v4951_v47 = vpack.c.bf16 %v2679_v3, %v2555_v48  ;;  %v1807_v55 = vsel %vm1795_vm4, %v8759_v51, %v8796_v42  ;;  %v2801_v43 = vsel %vm2797_vm12, %v8799_v53, %v8798_v18  ;;  %v8800_v57 = vunpack.i.h.bf16 %v6981_v58  ;;  %v8801_v3 = vld [vmem:[#allocation20_spill] sm:$0xff] }
 0x1d1   : > { %v8648_v37 = vunpack.i.l.bf16 %v7407_v44  ;;  %v7416_v8 = vpop.permute.xlu1 %853  ;;  %v1576_v51 = vsel %vm1562_vm5, %v8793_v36, %v8797_v4  ;;  %v1857_v42 = vmul.f32 %v1808_v15, %v7162_v21  ;;  %v1626_v58 = vmul.f32 %v1577_v20, %v7218_v0  ;;  %v7454_v36 = vld [vmem:[%s6217_s25 + $0x80] sm:$0xff]  ;;  %v7457_v15 = vld [vmem:[%s6217_s25 + $0x88] sm:$0xff]  ;;  %v7463_v4 = vld [vmem:[%s6217_s25 + $0x90] sm:$0xff] }
 0x1d2   : > { %5455 = vrot.lane.b32.xlu0 %v5454_v61, %s5684_s14  ;;  %4952 = vmatprep.subr.bf16.mxu0 %v4951_v47  ;;  %v646_v61 = vsel %vm630_vm0, %v8763_v10, %v8801_v3  ;;  %v5469_v47 = vpack.i.bf16 %v1624_v26, %v1623_v45  ;;  %v8804_v10 = vld [vmem:[#allocation22_spill] sm:$0xff]  ;;  %v1856_v45 = vmul.f32 %v1807_v55, %v7150_v29 }
 0x1d3   : > { %5460 = vrot.lane.b32.xlu1 %v5459_v19, %s5683_s13  ;;  %4954 = vmatpush1.bf16.msra.mxu0 %v4953_v46  ;;  %v2925_v5 = vsel %vm2921_vm13, %v8800_v57, %v8648_v37  ;;  %v5464_v19 = vpack.i.bf16 %v1393_v27, %v1392_v54  ;;  %v8802_v46 = vld [vmem:[#allocation11_spill] sm:$0xff]  ;;  %v7471_v20 = vld [vmem:[%s6217_s25 + $0x98] sm:$0xff]  ;;  %v8806_v55 = vpack.c.bf16 %v7011_v12, %v7006_v1  ;;  %v8807_v1 = vld [vmem:[#allocation9_spill] sm:$0xff] }
 0x1d4   : > { %v7442_v48 = vpop.permute.xlu0 %855  ;;  %v4939_v56 = vpack.c.bf16 %v2925_v5, %v2801_v43  ;;  %v1810_v18 = vsel %vm1795_vm4, %v8802_v46, %v7176_v25  ;;  %v8803_v27 = vld [vmem:[#allocation19_spill] sm:$0xff]  ;;  %v8805_v43 = vld [vmem:[#allocation21_spill] sm:$0xff]  ;;  %v1625_v5 = vmul.f32 %v1576_v51, %v7215_v14  ;;  %v695_v38 = vmul.f32 %v646_v61, %v7454_v36  ;;  %v8808_v61 = vld [vmem:[#allocation36_spill] sm:$0xff] }
 0x1d5   : > { %v7451_v53 = vpop.permute.xlu1 %1086  ;;  %v647_v54 = vsel %vm630_vm0, %v8801_v3, %v8803_v27  ;;  %v648_v26 = vsel %vm630_vm0, %v8803_v27, %v8804_v10  ;;  %v649_v57 = vsel %vm630_vm0, %v8804_v10, %v8805_v43  ;;  %v1809_v3 = vsel %vm1795_vm4, %v8795_v62, %v8802_v46 }
 0x1d6   : > { %5465 = vrot.lane.b32.xlu0 %v5464_v19, %s5684_s14  ;;  %4940 = vmatprep.subr.bf16.mxu1 %v4939_v56  ;;  %v5474_v19 = vpack.i.bf16 %v1857_v42, %v1856_v45  ;;  %v1859_v56 = vmul.f32 %v1810_v18, %v7218_v0  ;;  %v696_v10 = vmul.f32 %v647_v54, %v7457_v15 }
 0x1d7   : > { %5470 = vrot.lane.b32.xlu1 %v5469_v47, %s5685_s7  ;;  %4942 = vmatpush1.bf16.msra.mxu1 %v8806_v55  ;;  %v697_v51 = vmul.f32 %v648_v26, %v7463_v4  ;;  %v5479_v37 = vpack.i.bf16 %v1626_v58, %v1625_v5  ;;  %v698_v62 = vmul.f32 %v649_v57, %v7471_v20  ;;  %v8809_v26 = vld [vmem:[#allocation35_spill] sm:$0xff]  ;;  %v8810_v57 = vld [vmem:[#allocation14_spill] sm:$0xff] }
 0x1d8   : > { %v7485_v27 = vpop.permute.xlu0 %1088  ;;  %v1858_v47 = vmul.f32 %v1809_v3, %v7215_v14  ;;  %v358_v12 = vrot.slane %v6683_v28, %v8807_v1  ;;  %v354_v42 = vrot.slane %v6683_v28, %v8726_v16  ;;  %v2039_v58 = vsel %vm2028_vm6, %v8785_v52, %v8808_v61 }
 0x1d9   : > { %v7490_v23 = vpop.permute.xlu1 %2014  ;;  %v5489_v54 = vpack.i.bf16 %v696_v10, %v695_v38  ;;  %v2040_v45 = vsel %vm2028_vm6, %v8808_v61, %v8809_v26  ;;  %v879_v5 = vsel %vm863_vm1, %v6928_v50, %v8810_v57  ;;  %v880_v28 = vsel %vm863_vm1, %v8810_v57, %v7016_v22  ;;  %v5631_v38 = vld [vmem:[%s6217_s25 + $0x38] sm:$0xff] }
 0x1da   : > { %5475 = vrot.lane.b32.xlu0 %v5474_v19, %s5686_s9  ;;  %v5484_v46 = vpack.i.bf16 %v1859_v56, %v1858_v47  ;;  %v5494_v3 = vpack.i.bf16 %v698_v62, %v697_v51  ;;  %v5338_v52 = vunpack.i.h.bf16 %v7407_v44  ;;  %v454_v55 = vmul.f32 %v5631_v38, %v358_v12  ;;  %v5632_v19 = vld [vmem:[%s6217_s25 + $0x30] sm:$0xff]  ;;  %v8812_v47 = vld [vmem:[#allocation28_spill] sm:$0xff] }
 0x1db   : > { %5480 = vrot.lane.b32.xlu1 %v5479_v37, %s5685_s7  ;;  %v453_v56 = vmul.f32 %v5632_v19, %v354_v42  ;;  %v2088_v10 = vmul.f32 %v2039_v58, %v6899_v11  ;;  %v1112_v50 = vsel %vm1096_vm2, %v6945_v40, %v8812_v47  ;;  %v2089_v51 = vmul.f32 %v2040_v45, %v7150_v29  ;;  %v8814_v45 = vld [vmem:[#allocation27_spill] sm:$0xff] }
 0x1dc   : > { %v7503_v18 = vpop.permute.xlu0 %2016  ;;  %v928_v62 = vmul.f32 %v879_v5, %v7454_v36  ;;  %v929_v12 = vmul.f32 %v880_v28, %v7457_v15  ;;  %v1113_v11 = vsel %vm1096_vm2, %v8812_v47, %v7043_v49  ;;  %v5288_v40 = vunpack.i.h.bf16 %v7068_v24 }
 0x1dd   : > { %v7514_v37 = vpop.permute.xlu1 %5340  ;;  %v5333_v58 = vunpack.i.h.bf16 %v7382_v6  ;;  %v1161_v29 = vmul.f32 %v1112_v50, %v7454_v36  ;;  %v2041_v5 = vsel %vm2028_vm6, %v8809_v26, %v8814_v45  ;;  %v8815_v28 = vunpack.i.l.bf16 %v7407_v44 }
 0x1de   : > { %8811 = vst [vmem:[#allocation60_spill] sm:$0xff] %v7514_v37  ;;  %5485 = vrot.lane.b32.xlu0 %v5484_v46, %s5686_s9  ;;  %v8651_v61 = vunpack.i.h.bf16 %v7514_v37  ;;  %v5342_v57 = vunpack.i.l.bf16 %v7514_v37  ;;  %v5499_v37 = vpack.i.bf16 %v929_v12, %v928_v62  ;;  %v8821_v12 = vld [vmem:[#allocation65_spill] sm:$0xff] }
 0x1df   : > { %5490 = vrot.lane.b32.xlu1 %v5489_v54, %s5680_s28  ;;  %v2926_v19 = vsel %vm2921_vm13, %v8815_v28, %v5338_v52  ;;  %v1162_v28 = vmul.f32 %v1113_v11, %v7457_v15 }
 0x1e0   : > { %v7533_v42 = vpop.permute.xlu0 %5345  ;;  %v7553_v46 = vsel %vm2797_vm12, %v5342_v57, %v8651_v61  ;;  %v2803_v44 = vsel %vm2797_vm12, %v5333_v58, %v5342_v57  ;;  %v8820_v57 = vunpack.i.l.bf16 %v7382_v6  ;;  %v2042_v6 = vsel %vm2028_vm6, %v8814_v45, %v8821_v12  ;;  %v8822_v45 = vld [vmem:[#allocation38_spill] sm:$0xff] }
 0x1e1   : > { %8813 = vst [vmem:[#allocation47_spill] sm:$0xff] %v7533_v42  ;;  %v5347_v54 = vunpack.i.l.bf16 %v7533_v42  ;;  %v7539_v38 = vpop.permute.xlu1 %5350  ;;  %8816 = vst [vmem:[#allocation18_spill] sm:$0xff] %v7553_v46  ;;  %v8817_v16 = vunpack.i.h.bf16 %v7533_v42  ;;  %v5634_v46 = vld [vmem:[%s6217_s25 + $0x40] sm:$0xff] }
 0x1e2   : > { %3017 = vrot.lane.b32.xlu0 %v2088_v10, %s5687_s15  ;;  %v8818_v1 = vunpack.i.l.bf16 %v7539_v38 }
 0x1e3   : > { %v7558_v50 = vsel %vm2921_vm13, %v5347_v54, %v8817_v16  ;;  %3019 = vrot.lane.b32.xlu1 %v2089_v51, %s5687_s15  ;;  %v2927_v26 = vsel %vm2921_vm13, %v5338_v52, %v5347_v54  ;;  %v8819_v16 = vunpack.i.l.bf16 %v7068_v24  ;;  %v2802_v52 = vsel %vm2797_vm12, %v8820_v57, %v5333_v58 }
 0x1e4   : > { %v3002_v47 = vpop.permute.xlu0 %3001  ;;  %v4955_v10 = vpack.c.bf16 %v2927_v26, %v2803_v44  ;;  %v2185_v61 = vsel %vm2177_vm7, %v5288_v40, %v8818_v1  ;;  %v882_v1 = vsel %vm863_vm1, %v7041_v59, %v7416_v8  ;;  %v4957_v62 = vpack.c.bf16 %v2926_v19, %v2802_v52 }
 0x1e5   : > { %v2184_v51 = vsel %vm2177_vm7, %v8819_v16, %v5288_v40  ;;  %v7575_v54 = vpop.permute.xlu1 %3003  ;;  %v3048_v11 = vsel %vm3045_vm14, %v7100_v31, %v3002_v47  ;;  %v4959_v40 = vpack.c.bf16 %v2185_v61, %v454_v55  ;;  %v881_v31 = vsel %vm863_vm1, %v7016_v22, %v7041_v59  ;;  %v8823_v61 = vld [vmem:[#allocation29_spill] sm:$0xff] }
 0x1e6   : > { %5495 = vrot.lane.b32.xlu0 %v5494_v3, %s5680_s28  ;;  %v3049_v24 = vsel %vm3045_vm14, %v3002_v47, %v7575_v54  ;;  %4956 = vmatprep.subr.bf16.mxu0 %v4955_v10  ;;  %v5504_v58 = vpack.i.bf16 %v1162_v28, %v1161_v29  ;;  %v4961_v47 = vpack.c.bf16 %v2184_v51, %v453_v56  ;;  %v8824_v29 = vld [vmem:[#allocation30_spill] sm:$0xff] }
 0x1e7   : > { %5500 = vrot.lane.b32.xlu1 %v5499_v37, %s5681_s29  ;;  %3192 = vmatprep.subr.mxu1 %v3049_v24  ;;  %v2090_v19 = vmul.f32 %v2041_v5, %v7162_v21  ;;  %v931_v44 = vmul.f32 %v882_v1, %v7471_v20  ;;  %v1115_v37 = vsel %vm1096_vm2, %v8822_v45, %v7451_v53 }
 0x1e8   : > { %3193 = vmatpush1.msra.mxu1 %v3048_v11  ;;  %4958 = vmatpush1.bf16.msra.mxu0 %v4957_v62  ;;  %v7592_v3 = vpop.permute.xlu0 %857  ;;  %v930_v22 = vmul.f32 %v881_v31, %v7463_v4  ;;  %v1114_v59 = vsel %vm1096_vm2, %v7043_v49, %v8822_v45  ;;  %v2091_v21 = vmul.f32 %v2042_v6, %v7215_v14  ;;  %v8825_v11 = vld [vmem:[#allocation39_spill] sm:$0xff] }
 0x1e9   : > { %v7599_v26 = vpop.permute.xlu1 %859  ;;  %4960 = vmatprep.subr.bf16.mxu1 %v4959_v40  ;;  %4889 = vmatmul.mubr.msk.f32.vlgmr.msra.gmra.mrb[0].mxu1 %vm3101_vm15, %v7226_v7  ;;  %v1164_v55 = vmul.f32 %v1115_v37, %v7471_v20  ;;  %v1346_v5 = vsel %vm1329_vm3, %v8824_v29, %v8823_v61  ;;  %v1163_v16 = vmul.f32 %v1114_v59, %v7463_v4  ;;  %v4843_v62 = vld [vmem:[%s8543_s1 + $0x40] ss:$8 sm:$0xf0] }
 0x1ea   : > { %4962 = vmatpush1.bf16.msra.mxu1 %v4961_v47  ;;  %5505 = vrot.lane.b32.xlu0 %v5504_v58, %s5682_s30  ;;  %v5509_v28 = vpack.i.bf16 %v931_v44, %v930_v22  ;;  %v1345_v49 = vsel %vm1329_vm3, %v7060_v2, %v8824_v29  ;;  %v5519_v14 = vpack.i.bf16 %v7457_v15, %v7454_v36  ;;  %v4842_v2 = vld [vmem:[%s8543_s1 + $0x40] ss:$8 sm:$0xf] }
 0x1eb   : > { %3021 = vrot.lane.b32.xlu1 %v2090_v19, %s5687_s15  ;;  %3382 = vmatprep.mubr.f32.mxu1 %v8771_v13  ;;  %v1395_v51 = vmul.f32 %v1346_v5, %v7457_v15  ;;  %v5514_v57 = vpack.i.bf16 %v1164_v55, %v1163_v16  ;;  %v1394_v6 = vmul.f32 %v1345_v49, %v7454_v36  ;;  %v8826_v40 = vld [vmem:[#allocation42_spill] sm:$0xff]  ;;  %v8828_v29 = vld [vmem:[#allocation24_spill] sm:$0xff]  ;;  %v7675_v49 = vld [vmem:[%s6217_s25 + $0xa0] sm:$0xff] }
 0x1ec   : > { %v7612_v56 = vpop.permute.xlu0 %1090  ;;  %v1579_v31 = vsel %vm1562_vm5, %v8826_v40, %v7280_v30  ;;  %v1347_v58 = vsel %vm1329_vm3, %v8823_v61, %v8825_v11  ;;  %v5529_v47 = vpack.i.bf16 %v7471_v20, %v7463_v4  ;;  %v1578_v44 = vsel %vm1562_vm5, %v7143_v17, %v8826_v40  ;;  %v8829_v17 = vld [vmem:[#allocation23_spill] sm:$0xff] }
 0x1ed   : > { %v7617_v10 = vpop.permute.xlu1 %1092  ;;  %v5524_v19 = vpack.i.bf16 %v1395_v51, %v1394_v6  ;;  %v7658_v22 = vor.u32 %v4843_v62, %v4842_v2  ;;  %v1628_v59 = vmul.f32 %v1579_v31, %v7457_v15  ;;  %v650_v5 = vsel %vm630_vm0, %v8805_v43, %v8828_v29  ;;  %v8830_v43 = vld [vmem:[#allocation6_spill] sm:$0xff]  ;;  %v8831_v31 = vld [vmem:[#allocation4_spill] sm:$0xff] }
 0x1ee   : > { %3023 = vrot.lane.b32.xlu0 %v2091_v21, %s5687_s15  ;;  %v8827_v21 = vld [vmem:[#allocation16_spill] sm:$0xff]  ;;  %v1396_v16 = vmul.f32 %v1347_v58, %v7463_v4 }
 0x1ef   : > { %5510 = vrot.lane.b32.xlu1 %v5509_v28, %s5681_s29  ;;  %v1812_v55 = vsel %vm1795_vm4, %v8827_v21, %v7307_v33  ;;  %v651_v28 = vsel %vm630_vm0, %v8828_v29, %v8829_v17  ;;  %v1811_v51 = vsel %vm1795_vm4, %v7176_v25, %v8827_v21  ;;  %v362_v25 = vrot.slane %v7658_v22, %v8831_v31  ;;  %v5633_v6 = vld [vmem:[%s6217_s25 + $0x48] sm:$0xff] }
 0x1f0   : > { %v7628_v52 = vpop.permute.xlu0 %1319  ;;  %v1861_v2 = vmul.f32 %v1812_v55, %v7457_v15  ;;  %v699_v21 = vmul.f32 %v650_v5, %v7675_v49  ;;  %v1860_v55 = vmul.f32 %v1811_v51, %v7454_v36  ;;  %v8834_v5 = vld [vmem:[#allocation58_spill] sm:$0xff] }
 0x1f1   : > { %v1348_v1 = vsel %vm1329_vm3, %v8825_v11, %v7628_v52  ;;  %v7633_v24 = vpop.permute.xlu1 %1321  ;;  %v366_v11 = vrot.slane %v7658_v22, %v8830_v43  ;;  %v8835_v51 = vunpack.i.h.bf16 %v8834_v5  ;;  %v1813_v5 = vsel %vm1795_vm4, %v7307_v33, %v7324_v60 }
 0x1f2   : > { %5515 = vrot.lane.b32.xlu0 %v5514_v57, %s5682_s30  ;;  %v1397_v45 = vmul.f32 %v1348_v1, %v7471_v20  ;;  %v7686_v1 = vld [vmem:[%s6217_s25 + $0xa8] sm:$0xff]  ;;  %v5544_v31 = vpack.i.bf16 %v1861_v2, %v1860_v55  ;;  %v1862_v33 = vmul.f32 %v1813_v5, %v7463_v4  ;;  %v2043_v55 = vsel %vm2028_vm6, %v8821_v12, %v7326_v34 }
 0x1f3   : > { %5520 = vrot.lane.b32.xlu1 %v5519_v14, %s5683_s13  ;;  %v1627_v14 = vmul.f32 %v1578_v44, %v7454_v36  ;;  %v700_v29 = vmul.f32 %v651_v28, %v7686_v1 }
 0x1f4   : > { %v7656_v37 = vpop.permute.xlu0 %5355  ;;  %v5534_v62 = vpack.i.bf16 %v1397_v45, %v1396_v16  ;;  %v1580_v45 = vsel %vm1562_vm5, %v7280_v30, %v7305_v9  ;;  %v456_v30 = vmul.f32 %v5633_v6, %v366_v11 }
 0x1f5   : > { %v7664_v61 = vpop.permute.xlu1 %5360  ;;  %v5539_v58 = vpack.i.bf16 %v1628_v59, %v1627_v14  ;;  %v8832_v59 = vld [vmem:[#allocation13_spill] sm:$0xff] }
 0x1f6   : > { %5525 = vrot.lane.b32.xlu0 %v5524_v19, %s5684_s14  ;;  %v5362_v57 = vunpack.i.l.bf16 %v7664_v61  ;;  %v5353_v19 = vunpack.i.h.bf16 %v7539_v38  ;;  %v8833_v16 = vunpack.i.h.bf16 %v8832_v59  ;;  %v455_v59 = vmul.f32 %v5634_v46, %v362_v25 }
 0x1f7   : > { %5530 = vrot.lane.b32.xlu1 %v5529_v47, %s5683_s13 }
 0x1f8   : > { %v7690_v40 = vpop.permute.xlu0 %5365  ;;  %v2309_v14 = vsel %vm2301_vm8, %v8833_v16, %v5362_v57  ;;  %v1629_v16 = vmul.f32 %v1580_v45, %v7463_v4 }
 0x1f9   : > { %v5367_v47 = vunpack.i.l.bf16 %v7690_v40  ;;  %v3006_v44 = vpop.permute.xlu1 %3005  ;;  %v5368_v5 = vunpack.i.h.bf16 %v7690_v40 }
 0x1fa   : > { %5535 = vrot.lane.b32.xlu0 %v5534_v62, %s5684_s14  ;;  %v3050_v46 = vsel %vm3045_vm14, %v7575_v54, %v3006_v44  ;;  %v2092_v54 = vmul.f32 %v2043_v55, %v7218_v0  ;;  %v1117_v0 = vsel %vm1096_vm2, %v7485_v27, %v7612_v56 }
 0x1fb   : > { %5540 = vrot.lane.b32.xlu1 %v5539_v58, %s5685_s7  ;;  %v2433_v42 = vsel %vm2425_vm9, %v8835_v51, %v5367_v47  ;;  %v8836_v58 = vunpack.i.l.bf16 %v7656_v37  ;;  %v8837_v51 = vunpack.i.l.bf16 %v7539_v38  ;;  %v8838_v38 = vpack.c.bf16 %v7270_v41, %v7264_v63 }
 0x1fc   : > { %v7715_v62 = vpop.permute.xlu0 %3007  ;;  %v4963_v28 = vpack.c.bf16 %v2433_v42, %v2309_v14  ;;  %v2044_v63 = vsel %vm2028_vm6, %v7326_v34, %v7347_v39  ;;  %v884_v41 = vsel %vm863_vm1, %v7442_v48, %v7592_v3  ;;  %v8839_v34 = vld [vmem:[#allocation26_spill] sm:$0xff] }
 0x1fd   : > { %v2187_v43 = vsel %vm2177_vm7, %v5353_v19, %v8836_v58  ;;  %v2186_v11 = vsel %vm2177_vm7, %v8837_v51, %v5353_v19  ;;  %v7728_v2 = vpop.permute.xlu1 %1323  ;;  %v3051_v42 = vsel %vm3045_vm14, %v3006_v44, %v7715_v62  ;;  %v7768_v44 = vld [vmem:[%s6217_s25 + $0xb0] sm:$0xff]  ;;  %v5363_v51 = vunpack.i.h.bf16 %v7664_v61 }
 0x1fe   : > { %5545 = vrot.lane.b32.xlu0 %v5544_v31, %s5686_s9  ;;  %3263 = vmatprep.subr.mxu0 %v3051_v42  ;;  %v4975_v6 = vpack.c.bf16 %v2187_v43, %v456_v30  ;;  %v4977_v19 = vpack.c.bf16 %v2186_v11, %v455_v59  ;;  %v5549_v31 = vpack.i.bf16 %v700_v29, %v699_v21 }
 0x1ff   : > { %2783 = vrot.lane.b32.xlu1 %v1629_v16, %s5685_s7  ;;  %4964 = vmatprep.subr.bf16.mxu1 %v4963_v28  ;;  %v652_v43 = vsel %vm630_vm0, %v8829_v17, %v8839_v34  ;;  %v2093_v21 = vmul.f32 %v2044_v63, %v7454_v36  ;;  %v933_v29 = vmul.f32 %v884_v41, %v7686_v1 }
 0x200   : > { %3264 = vmatpush1.msra.mxu0 %v3050_v46  ;;  %4966 = vmatpush1.bf16.msra.mxu1 %v8838_v38  ;;  %v7740_v25 = vpop.permute.xlu0 %1325  ;;  %v701_v36 = vmul.f32 %v652_v43, %v7768_v44  ;;  %v1166_v17 = vmul.f32 %v1117_v0, %v7686_v1  ;;  %v2045_v16 = vsel %vm2028_vm6, %v7347_v39, %v7490_v23 }
 0x201   : > { %v7745_v45 = vpop.permute.xlu1 %1552  ;;  %4976 = vmatprep.subr.bf16.mxu0 %v4975_v6  ;;  %4890 = vmatmul.mubr.msk.f32.vlgmr.msra.gmra.mrb[2].mxu0 %vm3101_vm15, %v7226_v7  ;;  %v883_v7 = vsel %vm863_vm1, %v7416_v8, %v7442_v48  ;;  %v1116_v48 = vsel %vm1096_vm2, %v7451_v53, %v7485_v27  ;;  %v2094_v42 = vmul.f32 %v2045_v16, %v7457_v15 }
 0x202   : > { %4978 = vmatpush1.bf16.msra.mxu0 %v4977_v19  ;;  %2907 = vrot.lane.b32.xlu0 %v1862_v33, %s5686_s9  ;;  %v932_v8 = vmul.f32 %v883_v7, %v7675_v49  ;;  %v1165_v59 = vmul.f32 %v1116_v48, %v7675_v49  ;;  %v2046_v46 = vsel %vm2028_vm6, %v7490_v23, %v7503_v18 }
 0x203   : > { %5550 = vrot.lane.b32.xlu1 %v5549_v31, %s5680_s28  ;;  %3453 = vmatprep.mubr.f32.mxu0 %v8771_v13  ;;  %v885_v39 = vsel %vm863_vm1, %v7592_v3, %v7599_v26  ;;  %v2434_v38 = vsel %vm2425_vm9, %v5367_v47, %v5368_v5  ;;  %v2095_v19 = vmul.f32 %v2046_v46, %v7463_v4 }
 0x204   : > { %v7762_v12 = vpop.permute.xlu0 %1554  ;;  %v5554_v28 = vpack.i.bf16 %v933_v29, %v932_v8  ;;  %v5559_v27 = vpack.i.bf16 %v1166_v17, %v1165_v59  ;;  %v934_v40 = vmul.f32 %v885_v39, %v7768_v44  ;;  %v2310_v47 = vsel %vm2301_vm8, %v5362_v57, %v5363_v51 }
 0x205   : > { %v7775_v14 = vpop.permute.xlu1 %1785  ;;  %v1118_v63 = vsel %vm1096_vm2, %v7612_v56, %v7617_v10  ;;  %v1350_v41 = vsel %vm1329_vm3, %v7633_v24, %v7728_v2  ;;  %v4981_v7 = vpack.c.bf16 %v2434_v38, %v2310_v47  ;;  %v5564_v61 = vpack.i.bf16 %v7686_v1, %v7675_v49 }
 0x206   : > { %3025 = vrot.lane.b32.xlu0 %v2092_v54, %s5687_s15  ;;  %v1349_v57 = vsel %vm1329_vm3, %v7628_v52, %v7633_v24  ;;  %v8840_v56 = vunpack.i.h.bf16 %v7352_v32  ;;  %v1167_v8 = vmul.f32 %v1118_v63, %v7768_v44  ;;  %v1399_v48 = vmul.f32 %v1350_v41, %v7686_v1 }
 0x207   : > { %3027 = vrot.lane.b32.xlu1 %v2093_v21, %s5687_s15  ;;  %v8841_v21 = vld [vmem:[#allocation44_spill] sm:$0xff]  ;;  %v1398_v17 = vmul.f32 %v1349_v57, %v7675_v49  ;;  %v1582_v32 = vsel %vm1562_vm5, %v7745_v45, %v7762_v12 }
 0x208   : > { %v7785_v30 = vpop.permute.xlu0 %1787  ;;  %v8842_v29 = vunpack.i.h.bf16 %v8841_v21 }
 0x209   : > { %v7787_v58 = vpop.permute.xlu1 %5370  ;;  %v5569_v16 = vpack.i.bf16 %v1399_v48, %v1398_v17  ;;  %v1815_v46 = vsel %vm1795_vm4, %v7775_v14, %v7785_v30 }
 0x20a   : > { %2171 = vrot.lane.b32.xlu0 %v701_v36, %s5680_s28  ;;  %v5372_v53 = vunpack.i.l.bf16 %v7787_v58  ;;  %v1864_v38 = vmul.f32 %v1815_v46, %v7675_v49 }
 0x20b   : > { %5555 = vrot.lane.b32.xlu1 %v5554_v28, %s5681_s29  ;;  %v8843_v28 = vld [vmem:[#allocation15_spill] sm:$0xff] }
 0x20c   : > { %v7798_v11 = vpop.permute.xlu0 %5375  ;;  %v2311_v23 = vsel %vm2301_vm8, %v5363_v51, %v5372_v53  ;;  %v8844_v59 = vpack.c.bf16 %v7400_v35, %v8843_v28  ;;  %v1351_v51 = vsel %vm1329_vm3, %v7728_v2, %v7740_v25 }
 0x20d   : > { %v5377_v6 = vunpack.i.l.bf16 %v7798_v11  ;;  %v7808_v33 = vpop.permute.xlu1 %5380  ;;  %v1400_v2 = vmul.f32 %v1351_v51, %v7768_v44 }
 0x20e   : > { %5560 = vrot.lane.b32.xlu0 %v5559_v27, %s5682_s30  ;;  %v5382_v15 = vunpack.i.l.bf16 %v7808_v33 }
 0x20f   : > { %3029 = vrot.lane.b32.xlu1 %v2094_v42, %s5687_s15  ;;  %v2435_v3 = vsel %vm2425_vm9, %v5368_v5, %v5377_v6  ;;  %v1581_v5 = vsel %vm1562_vm5, %v7305_v9, %v7745_v45  ;;  %v1631_v42 = vmul.f32 %v1582_v32, %v7675_v49  ;;  %v1814_v45 = vsel %vm1795_vm4, %v7324_v60, %v7775_v14 }
 0x210   : > { %v7827_v31 = vpop.permute.xlu0 %5385  ;;  %v4979_v55 = vpack.c.bf16 %v2435_v3, %v2311_v23  ;;  %v2557_v43 = vsel %vm2549_vm10, %v8840_v56, %v5382_v15  ;;  %v1630_v9 = vmul.f32 %v1581_v5, %v7471_v20  ;;  %v1863_v60 = vmul.f32 %v1814_v45, %v7471_v20 }
 0x211   : > { %v5387_v54 = vunpack.i.l.bf16 %v7827_v31  ;;  %v1557_v4 = vpop.permute.xlu1 %1556  ;;  %v5383_v14 = vunpack.i.h.bf16 %v7808_v33  ;;  %v5388_v63 = vunpack.i.h.bf16 %v7827_v31 }
 0x212   : > { %3031 = vrot.lane.b32.xlu0 %v2095_v19, %s5687_s15  ;;  %4980 = vmatprep.subr.bf16.mxu0 %v4979_v55  ;;  %v1583_v23 = vsel %vm1562_vm5, %v7762_v12, %v1557_v4  ;;  %v5574_v19 = vpack.i.bf16 %v1631_v42, %v1630_v9  ;;  %v8847_v42 = vld [vmem:[#allocation47_spill] sm:$0xff] }
 0x213   : > { %2295 = vrot.lane.b32.xlu1 %v934_v40, %s5681_s29  ;;  %4982 = vmatpush1.bf16.msra.mxu0 %v4981_v7  ;;  %v2681_v0 = vsel %vm2673_vm11, %v8842_v29, %v5387_v54  ;;  %v1632_v41 = vmul.f32 %v1583_v23, %v7686_v1  ;;  %v5579_v7 = vpack.i.bf16 %v1864_v38, %v1863_v60  ;;  %v8848_v46 = vunpack.i.h.bf16 %v8847_v42  ;;  %v8849_v23 = vld [vmem:[#allocation5_spill] sm:$0xff] }
 0x214   : > { %v7853_v36 = vpop.permute.xlu0 %1558  ;;  %v4967_v52 = vpack.c.bf16 %v2681_v0, %v2557_v43  ;;  %v2558_v21 = vsel %vm2549_vm10, %v5382_v15, %v5383_v14  ;;  %v8852_v60 = vld [vmem:[#allocation9_spill] sm:$0xff]  ;;  %v8858_v42 = vunpack.i.l.bf16 %v7656_v37 }
 0x215   : > { %v1790_v24 = vpop.permute.xlu1 %1789  ;;  %v1584_v35 = vsel %vm1562_vm5, %v1557_v4, %v7853_v36 }
 0x216   : > { %2419 = vrot.lane.b32.xlu0 %v1167_v8, %s5682_s30  ;;  %4968 = vmatprep.subr.bf16.mxu1 %v4967_v52  ;;  %v1633_v40 = vmul.f32 %v1584_v35, %v7768_v44  ;;  %v1816_v12 = vsel %vm1795_vm4, %v7785_v30, %v1790_v24  ;;  %v2682_v30 = vsel %vm2673_vm11, %v5387_v54, %v5388_v63 }
 0x217   : > { %5565 = vrot.lane.b32.xlu1 %v5564_v61, %s5683_s13  ;;  %4970 = vmatpush1.bf16.msra.mxu1 %v8844_v59  ;;  %v1865_v29 = vmul.f32 %v1816_v12, %v7686_v1 }
 0x218   : > { %v7867_v27 = vpop.permute.xlu0 %1791  ;;  %v5584_v56 = vpack.i.bf16 %v1633_v40, %v1632_v41 }
 0x219   : > { %v2019_v39 = vpop.permute.xlu1 %2018  ;;  %v1817_v47 = vsel %vm1795_vm4, %v1790_v24, %v7867_v27  ;;  %v4985_v24 = vpack.c.bf16 %v2682_v30, %v2558_v21  ;;  %v5358_v21 = vunpack.i.h.bf16 %v7656_v37  ;;  %v8859_v37 = vld [vmem:[#allocation43_spill] sm:$0xff] }
 0x21a   : > { %5570 = vrot.lane.b32.xlu0 %v5569_v16, %s5684_s14  ;;  %v1866_v61 = vmul.f32 %v1817_v47, %v7768_v44  ;;  %v2047_v0 = vsel %vm2028_vm6, %v7503_v18, %v2019_v39  ;;  %v8845_v16 = vld [vmem:[#allocation60_spill] sm:$0xff] }
 0x21b   : > { %2543 = vrot.lane.b32.xlu1 %v7768_v44, %s5683_s13  ;;  %v2096_v18 = vmul.f32 %v2047_v0, %v7471_v20  ;;  %v8846_v5 = vunpack.i.h.bf16 %v8845_v16 }
 0x21c   : > { %v2021_v3 = vpop.permute.xlu0 %2020  ;;  %v5589_v15 = vpack.i.bf16 %v1866_v61, %v1865_v29 }
 0x21d   : > { %v7892_v55 = vpop.permute.xlu1 %5390  ;;  %v2048_v17 = vsel %vm2028_vm6, %v2019_v39, %v2021_v3 }
 0x21e   : > { %2667 = vrot.lane.b32.xlu0 %v1400_v2, %s5684_s14  ;;  %v5392_v4 = vunpack.i.l.bf16 %v7892_v55  ;;  %v2097_v39 = vmul.f32 %v2048_v17, %v7675_v49  ;;  %v8850_v49 = vld [vmem:[#allocation18_spill] sm:$0xff] }
 0x21f   : > { %5575 = vrot.lane.b32.xlu1 %v5574_v19, %s5685_s7  ;;  %v8851_v47 = vpack.c.bf16 %v7558_v50, %v8850_v49 }
 0x220   : > { %v7904_v57 = vpop.permute.xlu0 %5395  ;;  %v2559_v48 = vsel %vm2549_vm10, %v5383_v14, %v5392_v4  ;;  %v8853_v14 = vld [vmem:[#allocation33_spill] sm:$0xff] }
 0x221   : > { %v5397_v43 = vunpack.i.l.bf16 %v7904_v57  ;;  %v7907_v31 = vpop.permute.xlu1 %5400 }
 0x222   : > { %5580 = vrot.lane.b32.xlu0 %v5579_v7, %s5686_s9  ;;  %v5402_v8 = vunpack.i.l.bf16 %v7907_v31  ;;  %v8854_v7 = vld [vmem:[#allocation3_spill] sm:$0xff]  ;;  %v5403_v30 = vunpack.i.h.bf16 %v7907_v31  ;;  %v8856_v31 = vld [vmem:[#allocation41_spill] sm:$0xff] }
 0x223   : > { %5585 = vrot.lane.b32.xlu1 %v5584_v56, %s5685_s7  ;;  %v2683_v33 = vsel %vm2673_vm11, %v5388_v63, %v5397_v43  ;;  %v814_v63 = vrot.slane %v8853_v14, %v8852_v60  ;;  %v370_v61 = vrot.slane %v7658_v22, %v8854_v7  ;;  %v5689_v56 = vmov 0  }
 0x224   : > { %v5406_v54 = vpop.permute.xlu0 %5405  ;;  %v4983_v52 = vpack.c.bf16 %v2683_v33, %v2559_v48  ;;  %v2805_v51 = vsel %vm2797_vm12, %v8846_v5, %v5402_v8  ;;  %5609 = vset.pattern.permute.xlu0 %v5689_v56  ;;  %v5635_v33 = vld [vmem:[%s6217_s25 + $0x58] sm:$0xff]  ;;  %v8857_v5 = vld [vmem:[#allocation25_spill] sm:$0xff]  ;;  %v8013_v56 = vld [vmem:[%s8544_s2] sm:$0xff] }
 0x225   : > { %v5407_v32 = vunpack.i.l.bf16 %v5406_v54  ;;  %v2023_v28 = vpop.permute.xlu1 %2022  ;;  %v5408_v19 = vunpack.i.h.bf16 %v5406_v54 }
 0x226   : > { %v2049_v59 = vsel %vm2028_vm6, %v2021_v3, %v2023_v28  ;;  %5590 = vrot.lane.b32.xlu0 %v5589_v15, %s5686_s9  ;;  %4984 = vmatprep.subr.bf16.mxu0 %v4983_v52  ;;  %v374_v3 = vrot.slane %v7658_v22, %v8849_v23  ;;  %v1280_v52 = vrot.slane %v8856_v31, %v8852_v60 }
 0x227   : > { %3033 = vrot.lane.b32.xlu1 %v2096_v18, %s5687_s15  ;;  %4986 = vmatpush1.bf16.msra.mxu0 %v4985_v24  ;;  %v2929_v20 = vsel %vm2921_vm13, %v8848_v46, %v5407_v32  ;;  %v2098_v45 = vmul.f32 %v2049_v59, %v7686_v1  ;;  %v2930_v54 = vsel %vm2921_vm13, %v5407_v32, %v5408_v19  ;;  %v5636_v59 = vld [vmem:[%s6217_s25 + $0x50] sm:$0xff] }
 0x228   : > { %v7937_v35 = vpop.permute.xlu0 %2024  ;;  %v4971_v9 = vpack.c.bf16 %v2929_v20, %v2805_v51  ;;  %v458_v15 = vmul.f32 %v5635_v33, %v374_v3  ;;  %v457_v16 = vmul.f32 %v5636_v59, %v370_v61  ;;  %v653_v51 = vsel %vm630_vm0, %v8839_v34, %v8857_v5 }
 0x229   : > { %v2050_v2 = vsel %vm2028_vm6, %v2023_v28, %v7937_v35  ;;  %v7942_v38 = vpop.permute.xlu1 %5410  ;;  %v2188_v46 = vsel %vm2177_vm7, %v8858_v42, %v5358_v21  ;;  %v2806_v20 = vsel %vm2797_vm12, %v5402_v8, %v5403_v30  ;;  %v1513_v34 = vrot.slane %v8859_v37, %v8852_v60  ;;  %v5639_v42 = vld [vmem:[%s6217_s25 + $0x60] sm:$0xff] }
 0x22a   : > { %3035 = vrot.lane.b32.xlu0 %v2097_v39, %s5687_s15  ;;  %4972 = vmatprep.subr.bf16.mxu1 %v4971_v9  ;;  %v5412_v40 = vunpack.i.l.bf16 %v7942_v38  ;;  %v2099_v41 = vmul.f32 %v2050_v2, %v7768_v44  ;;  %v8855_v44 = vld [vmem:[#allocation34_spill] sm:$0xff]  ;;  %v4989_v3 = vpack.c.bf16 %v2930_v54, %v2806_v20  ;;  %v4993_v14 = vpack.c.bf16 %v2188_v46, %v457_v16 }
 0x22b   : > { %3037 = vrot.lane.b32.xlu1 %v2098_v45, %s5687_s15  ;;  %4974 = vmatpush1.bf16.msra.mxu1 %v8851_v47  ;;  %v1047_v48 = vrot.slane %v8855_v44, %v8852_v60  ;;  %v7993_v45 = vld [vmem:[%s6217_s25 + $0xc0] sm:$0xff]  ;;  %v7996_v2 = vld [vmem:[%s6217_s25 + $0xb8] sm:$0xff] }
 0x22c   : > { %v7955_v12 = vpop.permute.xlu0 %5415  ;;  %v2807_v24 = vsel %vm2797_vm12, %v5403_v30, %v5412_v40  ;;  %v8861_v30 = vld [vmem:[#allocation56_spill] sm:$0xff] }
 0x22d   : > { %v5417_v50 = vunpack.i.l.bf16 %v7955_v12  ;;  %v7962_v29 = vpop.permute.xlu1 %5420  ;;  %v1979_v44 = vrot.slane %v8861_v30, %v8852_v60  ;;  %v5398_v30 = vunpack.i.h.bf16 %v7904_v57  ;;  %v5418_v57 = vunpack.i.h.bf16 %v7955_v12  ;;  %v8864_v12 = vld [vmem:[#allocation10_spill] sm:$0xff] }
 0x22e   : > { %v5422_v0 = vunpack.i.l.bf16 %v7962_v29  ;;  %3039 = vrot.lane.b32.xlu0 %v2099_v41, %s5687_s15  ;;  %v702_v41 = vmul.f32 %v653_v51, %v7996_v2 }
 0x22f   : > { %861 = vrot.lane.b32.xlu1 %v814_v63, %s5674_s18  ;;  %v2931_v18 = vsel %vm2921_vm13, %v5408_v19, %v5417_v50  ;;  %v703_v63 = vmul.f32 %v8857_v5, %v7993_v45  ;;  %v5638_v5 = vld [vmem:[%s6217_s25 + $0x68] sm:$0xff] }
 0x230   : > { %v3010_v17 = vpop.permute.xlu0 %3009  ;;  %v4987_v28 = vpack.c.bf16 %v2931_v18, %v2807_v24  ;;  %v2189_v32 = vsel %vm2177_vm7, %v5358_v21, %v5422_v0  ;;  %v5378_v21 = vunpack.i.h.bf16 %v7798_v11  ;;  %v5373_v24 = vunpack.i.h.bf16 %v7787_v58 }
 0x231   : > { %v3052_v39 = vsel %vm3045_vm14, %v7715_v62, %v3010_v17  ;;  %v3012_v9 = vpop.permute.xlu1 %3011  ;;  %v4991_v8 = vpack.c.bf16 %v2189_v32, %v458_v15  ;;  %v8860_v62 = vld [vmem:[#allocation45_spill] sm:$0xff]  ;;  %v8863_v15 = vld [vmem:[#allocation8_spill] sm:$0xff]  ;;  %v5423_v18 = vunpack.i.h.bf16 %v7962_v29 }
 0x232   : > { %1094 = vrot.lane.b32.xlu0 %v1047_v48, %s5675_s11  ;;  %v3053_v19 = vsel %vm3045_vm14, %v3010_v17, %v3012_v9  ;;  %4988 = vmatprep.subr.bf16.mxu0 %v4987_v28  ;;  %v1746_v49 = vrot.slane %v8860_v62, %v8852_v60  ;;  %v8862_v48 = vld [vmem:[#allocation7_spill] sm:$0xff]  ;;  %v378_v54 = vrot.slane %v7658_v22, %v8863_v15 }
 0x233   : > { %1327 = vrot.lane.b32.xlu1 %v1280_v52, %s5676_s16  ;;  %3334 = vmatprep.subr.mxu1 %v3053_v19  ;;  %v382_v33 = vrot.slane %v7658_v22, %v8862_v48  ;;  %v5594_v28 = vpack.i.bf16 %v703_v63, %v702_v41  ;;  %v2436_v16 = vsel %vm2425_vm9, %v5377_v6, %v5378_v21 }
 0x234   : > { %3335 = vmatpush1.msra.mxu1 %v3052_v39  ;;  %4990 = vmatpush1.bf16.msra.mxu0 %v4989_v3  ;;  %v8005_v47 = vpop.permute.xlu0 %5425  ;;  %v459_v46 = vmul.f32 %v5639_v42, %v378_v54  ;;  %v2312_v11 = vsel %vm2301_vm8, %v5372_v53, %v5373_v24  ;;  %v2190_v6 = vsel %vm2177_vm7, %v5422_v0, %v5423_v18 }
 0x235   : > { %v5431_v61 = vpop.permute.xlu1 %5430  ;;  %4992 = vmatprep.subr.bf16.mxu1 %v4991_v8  ;;  %4891 = vmatmul.mubr.msk.f32.vlgmr.msra.gmra.mrb[2].mxu1 %vm3101_vm15, %v8013_v56  ;;  %v5427_v31 = vunpack.i.l.bf16 %v8005_v47  ;;  %v460_v51 = vmul.f32 %v5638_v5, %v382_v33  ;;  %v2684_v5 = vsel %vm2673_vm11, %v5397_v43, %v5398_v30 }
 0x236   : > { %4994 = vmatpush1.bf16.msra.mxu1 %v4993_v14  ;;  %1560 = vrot.lane.b32.xlu0 %v1513_v34, %s5677_s26  ;;  %v5432_v52 = vunpack.i.l.bf16 %v5431_v61  ;;  %v4997_v34 = vpack.c.bf16 %v2436_v16, %v2312_v11  ;;  %v5009_v53 = vpack.c.bf16 %v2190_v6, %v459_v46  ;;  %v5433_v0 = vunpack.i.h.bf16 %v5431_v61 }
 0x237   : > { %1793 = vrot.lane.b32.xlu1 %v1746_v49, %s5678_s27  ;;  %3524 = vmatprep.mubr.f32.mxu1 %v8771_v13  ;;  %v2191_v3 = vsel %vm2177_vm7, %v5423_v18, %v5427_v31 }
 0x238   : > { %v5436_v17 = vpop.permute.xlu0 %5435  ;;  %v2313_v20 = vsel %vm2301_vm8, %v5373_v24, %v5432_v52  ;;  %v5007_v58 = vpack.c.bf16 %v2191_v3, %v460_v51  ;;  %v2314_v24 = vsel %vm2301_vm8, %v5432_v52, %v5433_v0 }
 0x239   : > { %v5437_v32 = vunpack.i.l.bf16 %v5436_v17  ;;  %v3014_v59 = vpop.permute.xlu1 %3013  ;;  %v5438_v49 = vunpack.i.h.bf16 %v5436_v17 }
 0x23a   : > { %2026 = vrot.lane.b32.xlu0 %v1979_v44, %s5679_s8  ;;  %v3054_v14 = vsel %vm3045_vm14, %v3012_v9, %v3014_v59  ;;  %v5393_v9 = vunpack.i.h.bf16 %v7892_v55 }
 0x23b   : > { %5595 = vrot.lane.b32.xlu1 %v5594_v28, %s5680_s28  ;;  %v2437_v39 = vsel %vm2425_vm9, %v5378_v21, %v5437_v32  ;;  %v2438_v44 = vsel %vm2425_vm9, %v5437_v32, %v5438_v49 }
 0x23c   : > { %v8048_v19 = vpop.permute.xlu0 %3015  ;;  %v4995_v37 = vpack.c.bf16 %v2437_v39, %v2313_v20  ;;  %v5013_v28 = vpack.c.bf16 %v2438_v44, %v2314_v24  ;;  %v2560_v32 = vsel %vm2549_vm10, %v5392_v4, %v5393_v9 }
 0x23d   : > { %v8050_v8 = vpop.permute.xlu1 %5440  ;;  %v3055_v62 = vsel %vm3045_vm14, %v3014_v59, %v8048_v19  ;;  %v5001_v55 = vpack.c.bf16 %v2684_v5, %v2560_v32  ;;  %v5428_v32 = vunpack.i.h.bf16 %v8005_v47 }
 0x23e   : > { %3405 = vmatprep.subr.mxu0 %v3055_v62  ;;  %4996 = vmatprep.subr.bf16.mxu1 %v4995_v37  ;;  %v5442_v29 = vunpack.i.l.bf16 %v8050_v8 }
 0x23f   : > { %3406 = vmatpush1.msra.mxu0 %v3054_v14  ;;  %4998 = vmatpush1.bf16.msra.mxu1 %v4997_v34 }
 0x240   : > { %v8056_v63 = vpop.permute.xlu0 %5445  ;;  %5008 = vmatprep.subr.bf16.mxu0 %v5007_v58  ;;  %4892 = vmatmul.mubr.msk.f32.vlgmr.msra.gmra.mrb[4].mxu0 %vm3101_vm15, %v8013_v56  ;;  %v2315_v61 = vsel %vm2301_vm8, %v5433_v0, %v5442_v29 }
 0x241   : > { %v5447_v41 = vunpack.i.l.bf16 %v8056_v63  ;;  %v5451_v21 = vpop.permute.xlu1 %5450  ;;  %5010 = vmatpush1.bf16.msra.mxu0 %v5009_v53  ;;  %3595 = vmatprep.mubr.f32.mxu0 %v8771_v13 }
 0x242   : > { %v5452_v33 = vunpack.i.l.bf16 %v5451_v21  ;;  %v5453_v51 = vunpack.i.h.bf16 %v5451_v21 }
 0x243   : > { %v2439_v54 = vsel %vm2425_vm9, %v5438_v49, %v5447_v41  ;;  %v5413_v49 = vunpack.i.h.bf16 %v7942_v38 }
 0x244   : > { %v5456_v18 = vpop.permute.xlu0 %5455  ;;  %v5011_v17 = vpack.c.bf16 %v2439_v54, %v2315_v61  ;;  %v2561_v52 = vsel %vm2549_vm10, %v5393_v9, %v5452_v33  ;;  %v2562_v43 = vsel %vm2549_vm10, %v5452_v33, %v5453_v51  ;;  %v2932_v9 = vsel %vm2921_vm13, %v5417_v50, %v5418_v57 }
 0x245   : > { %v5457_v59 = vunpack.i.l.bf16 %v5456_v18  ;;  %v8072_v16 = vpop.permute.xlu1 %5460  ;;  %v5458_v42 = vunpack.i.h.bf16 %v5456_v18  ;;  %v390_v54 = vrot.slane %v7658_v22, %v8852_v60  ;;  %v2808_v24 = vsel %vm2797_vm12, %v5412_v40, %v5413_v49 }
 0x246   : > { %5012 = vmatprep.subr.bf16.mxu0 %v5011_v17  ;;  %v5462_v46 = vunpack.i.l.bf16 %v8072_v16  ;;  %v386_v50 = vrot.slane %v7658_v22, %v8864_v12 }
 0x247   : > { %5014 = vmatpush1.bf16.msra.mxu0 %v5013_v28  ;;  %v2685_v20 = vsel %vm2673_vm11, %v5398_v30, %v5457_v59  ;;  %v2686_v6 = vsel %vm2673_vm11, %v5457_v59, %v5458_v42  ;;  %v5005_v59 = vpack.c.bf16 %v2932_v9, %v2808_v24 }
 0x248   : > { %v8083_v39 = vpop.permute.xlu0 %5465  ;;  %v4999_v3 = vpack.c.bf16 %v2685_v20, %v2561_v52  ;;  %v2563_v34 = vsel %vm2549_vm10, %v5453_v51, %v5462_v46  ;;  %v5017_v53 = vpack.c.bf16 %v2686_v6, %v2562_v43  ;;  %v5640_v52 = vld [vmem:[%s6217_s25 + $0x78] sm:$0xff] }
 0x249   : > { %v5467_v4 = vunpack.i.l.bf16 %v8083_v39  ;;  %v5471_v11 = vpop.permute.xlu1 %5470  ;;  %v462_v20 = vmul.f32 %v5640_v52, %v390_v54  ;;  %v4845_v43 = vld [vmem:[%s8543_s1 + $0x80] ss:$8 sm:$0xf0] }
 0x24a   : > { %5000 = vmatprep.subr.bf16.mxu1 %v4999_v3  ;;  %v5472_v37 = vunpack.i.l.bf16 %v5471_v11  ;;  %v5473_v18 = vunpack.i.h.bf16 %v5471_v11  ;;  %v5641_v3 = vld [vmem:[%s6217_s25 + $0x70] sm:$0xff]  ;;  %v8866_v54 = vld [vmem:[#allocation4_spill] sm:$0xff] }
 0x24b   : > { %5002 = vmatpush1.bf16.msra.mxu1 %v5001_v55  ;;  %v2687_v62 = vsel %vm2673_vm11, %v5458_v42, %v5467_v4  ;;  %v461_v55 = vmul.f32 %v5641_v3, %v386_v50  ;;  %v5642_v52 = vld [vmem:[%s6217_s25 + $0x88] sm:$0xff]  ;;  %v5643_v3 = vld [vmem:[%s6217_s25 + $0x80] sm:$0xff] }
 0x24c   : > { %v5476_v14 = vpop.permute.xlu0 %5475  ;;  %v5015_v58 = vpack.c.bf16 %v2687_v62, %v2563_v34  ;;  %v2809_v33 = vsel %vm2797_vm12, %v5413_v49, %v5472_v37  ;;  %v2810_v11 = vsel %vm2797_vm12, %v5472_v37, %v5473_v18  ;;  %v2192_v49 = vsel %vm2177_vm7, %v5427_v31, %v5428_v32 }
 0x24d   : > { %v5477_v0 = vunpack.i.l.bf16 %v5476_v14  ;;  %v8096_v21 = vpop.permute.xlu1 %5480  ;;  %v5478_v30 = vunpack.i.h.bf16 %v5476_v14  ;;  %v5448_v31 = vunpack.i.h.bf16 %v8056_v63 }
 0x24e   : > { %5016 = vmatprep.subr.bf16.mxu0 %v5015_v58  ;;  %v5482_v44 = vunpack.i.l.bf16 %v8096_v21 }
 0x24f   : > { %5018 = vmatpush1.bf16.msra.mxu0 %v5017_v53  ;;  %v2933_v61 = vsel %vm2921_vm13, %v5418_v57, %v5477_v0  ;;  %v2934_v42 = vsel %vm2921_vm13, %v5477_v0, %v5478_v30  ;;  %v4844_v57 = vld [vmem:[%s8543_s1 + $0x80] ss:$8 sm:$0xf] }
 0x250   : > { %v8111_v17 = vpop.permute.xlu0 %5485  ;;  %v5003_v28 = vpack.c.bf16 %v2933_v61, %v2809_v33  ;;  %v2811_v22 = vsel %vm2797_vm12, %v5473_v18, %v5482_v44  ;;  %v5021_v14 = vpack.c.bf16 %v2934_v42, %v2810_v11  ;;  %v8138_v0 = vor.u32 %v4845_v43, %v4844_v57 }
 0x251   : > { %v5487_v5 = vunpack.i.l.bf16 %v8111_v17  ;;  %v5491_v51 = vpop.permute.xlu1 %5490 }
 0x252   : > { %v5492_v38 = vunpack.i.l.bf16 %v5491_v51  ;;  %5004 = vmatprep.subr.bf16.mxu1 %v5003_v28  ;;  %v394_v24 = vrot.slane %v8138_v0, %v8866_v54  ;;  %v5443_v28 = vunpack.i.h.bf16 %v8050_v8 }
 0x253   : > { %5006 = vmatpush1.bf16.msra.mxu1 %v5005_v59  ;;  %v2935_v40 = vsel %vm2921_vm13, %v5478_v30, %v5487_v5  ;;  %v5025_v30 = vpack.c.bf16 %v2192_v49, %v461_v55  ;;  %v5493_v59 = vunpack.i.h.bf16 %v5491_v51 }
 0x254   : > { %v3018_v6 = vpop.permute.xlu0 %3017  ;;  %v5019_v34 = vpack.c.bf16 %v2935_v40, %v2811_v22  ;;  %v2193_v62 = vsel %vm2177_vm7, %v5428_v32, %v5492_v38  ;;  %v2440_v40 = vsel %vm2425_vm9, %v5447_v41, %v5448_v31  ;;  %v463_v55 = vmul.f32 %v5643_v3, %v394_v24 }
 0x255   : > { %v3056_v37 = vsel %vm3045_vm14, %v8048_v19, %v3018_v6  ;;  %v3020_v58 = vpop.permute.xlu1 %3019  ;;  %v5023_v9 = vpack.c.bf16 %v2193_v62, %v462_v20  ;;  %v8865_v19 = vld [vmem:[#allocation6_spill] sm:$0xff]  ;;  %v2316_v51 = vsel %vm2301_vm8, %v5442_v29, %v5443_v28  ;;  %v2194_v63 = vsel %vm2177_vm7, %v5492_v38, %v5493_v59 }
 0x256   : > { %v3057_v53 = vsel %vm3045_vm14, %v3018_v6, %v3020_v58  ;;  %5020 = vmatprep.subr.bf16.mxu0 %v5019_v34  ;;  %v398_v61 = vrot.slane %v8138_v0, %v8865_v19  ;;  %v5029_v34 = vpack.c.bf16 %v2440_v40, %v2316_v51  ;;  %v5041_v8 = vpack.c.bf16 %v2194_v63, %v463_v55 }
 0x257   : > { %3476 = vmatprep.subr.mxu1 %v3057_v53  ;;  %5022 = vmatpush1.bf16.msra.mxu0 %v5021_v14  ;;  %v5468_v19 = vunpack.i.h.bf16 %v8083_v39  ;;  %v5488_v39 = vunpack.i.h.bf16 %v8111_v17  ;;  %v402_v17 = vrot.slane %v8138_v0, %v8854_v7 }
 0x258   : > { %3477 = vmatpush1.msra.mxu1 %v3056_v37  ;;  %v8140_v33 = vpop.permute.xlu0 %5495  ;;  %v464_v20 = vmul.f32 %v5642_v52, %v398_v61 }
 0x259   : > { %v5501_v47 = vpop.permute.xlu1 %5500  ;;  %5024 = vmatprep.subr.bf16.mxu1 %v5023_v9  ;;  %4893 = vmatmul.mubr.msk.f32.vlgmr.msra.gmra.mrb[4].mxu1 %vm3101_vm15, %v8013_v56  ;;  %v5497_v50 = vunpack.i.l.bf16 %v8140_v33 }
 0x25a   : > { %5026 = vmatpush1.bf16.msra.mxu1 %v5025_v30  ;;  %3666 = vmatprep.mubr.f32.mxu1 %v8771_v13  ;;  %v5502_v18 = vunpack.i.l.bf16 %v5501_v47  ;;  %v5503_v38 = vunpack.i.h.bf16 %v5501_v47 }
 0x25b   : > { %v2195_v43 = vsel %vm2177_vm7, %v5493_v59, %v5497_v50 }
 0x25c   : > { %v5506_v32 = vpop.permute.xlu0 %5505  ;;  %v2317_v11 = vsel %vm2301_vm8, %v5443_v28, %v5502_v18  ;;  %v5039_v53 = vpack.c.bf16 %v2195_v43, %v464_v20  ;;  %v2318_v28 = vsel %vm2301_vm8, %v5502_v18, %v5503_v38  ;;  %v2688_v20 = vsel %vm2673_vm11, %v5467_v4, %v5468_v19 }
 0x25d   : > { %v5507_v42 = vunpack.i.l.bf16 %v5506_v32  ;;  %v3022_v22 = vpop.permute.xlu1 %3021  ;;  %v5508_v14 = vunpack.i.h.bf16 %v5506_v32 }
 0x25e   : > { %v3058_v37 = vsel %vm3045_vm14, %v3020_v58, %v3022_v22  ;;  %v5463_v58 = vunpack.i.h.bf16 %v8072_v16 }
 0x25f   : > { %v2441_v57 = vsel %vm2425_vm9, %v5448_v31, %v5507_v42  ;;  %v2442_v61 = vsel %vm2425_vm9, %v5507_v42, %v5508_v14 }
 0x260   : > { %v8166_v6 = vpop.permute.xlu0 %3023  ;;  %v5027_v41 = vpack.c.bf16 %v2441_v57, %v2317_v11  ;;  %v2564_v42 = vsel %vm2549_vm10, %v5462_v46, %v5463_v58 }
 0x261   : > { %v8168_v62 = vpop.permute.xlu1 %5510  ;;  %v3059_v49 = vsel %vm3045_vm14, %v3022_v22, %v8166_v6  ;;  %v5045_v22 = vpack.c.bf16 %v2442_v61, %v2318_v28  ;;  %v5033_v16 = vpack.c.bf16 %v2688_v20, %v2564_v42  ;;  %v2936_v61 = vsel %vm2921_vm13, %v5487_v5, %v5488_v39 }
 0x262   : > { %3547 = vmatprep.subr.mxu0 %v3059_v49  ;;  %5028 = vmatprep.subr.bf16.mxu1 %v5027_v41  ;;  %v5512_v29 = vunpack.i.l.bf16 %v8168_v62  ;;  %v406_v28 = vrot.slane %v8138_v0, %v8849_v23  ;;  %v5498_v42 = vunpack.i.h.bf16 %v8140_v33 }
 0x263   : > { %3548 = vmatpush1.msra.mxu0 %v3058_v37  ;;  %5030 = vmatpush1.bf16.msra.mxu1 %v5029_v34  ;;  %v5483_v37 = vunpack.i.h.bf16 %v8096_v21 }
 0x264   : > { %v8174_v9 = vpop.permute.xlu0 %5515  ;;  %5040 = vmatprep.subr.bf16.mxu0 %v5039_v53  ;;  %4894 = vmatmul.mubr.msk.f32.vlgmr.msra.gmra.mrb[6].mxu0 %vm3101_vm15, %v8013_v56  ;;  %v2319_v47 = vsel %vm2301_vm8, %v5503_v38, %v5512_v29 }
 0x265   : > { %v5517_v30 = vunpack.i.l.bf16 %v8174_v9  ;;  %v5521_v31 = vpop.permute.xlu1 %5520  ;;  %5042 = vmatpush1.bf16.msra.mxu0 %v5041_v8  ;;  %3737 = vmatprep.mubr.f32.mxu0 %v8771_v13  ;;  %v5518_v33 = vunpack.i.h.bf16 %v8174_v9 }
 0x266   : > { %v5522_v54 = vunpack.i.l.bf16 %v5521_v31  ;;  %v5523_v3 = vunpack.i.h.bf16 %v5521_v31 }
 0x267   : > { %v2443_v24 = vsel %vm2425_vm9, %v5508_v14, %v5517_v30 }
 0x268   : > { %v5526_v59 = vpop.permute.xlu0 %5525  ;;  %v5043_v32 = vpack.c.bf16 %v2443_v24, %v2319_v47  ;;  %v2565_v18 = vsel %vm2549_vm10, %v5463_v58, %v5522_v54  ;;  %v2566_v4 = vsel %vm2549_vm10, %v5522_v54, %v5523_v3 }
 0x269   : > { %v5527_v40 = vunpack.i.l.bf16 %v5526_v59  ;;  %v8190_v52 = vpop.permute.xlu1 %5530  ;;  %v5528_v55 = vunpack.i.h.bf16 %v5526_v59  ;;  %v2812_v59 = vsel %vm2797_vm12, %v5482_v44, %v5483_v37 }
 0x26a   : > { %5044 = vmatprep.subr.bf16.mxu0 %v5043_v32  ;;  %v5532_v11 = vunpack.i.l.bf16 %v8190_v52 }
 0x26b   : > { %5046 = vmatpush1.bf16.msra.mxu0 %v5045_v22  ;;  %v2689_v57 = vsel %vm2673_vm11, %v5468_v19, %v5527_v40  ;;  %v2690_v41 = vsel %vm2673_vm11, %v5527_v40, %v5528_v55  ;;  %v5037_v40 = vpack.c.bf16 %v2936_v61, %v2812_v59 }
 0x26c   : > { %v8201_v43 = vpop.permute.xlu0 %5535  ;;  %v5031_v51 = vpack.c.bf16 %v2689_v57, %v2565_v18  ;;  %v2567_v49 = vsel %vm2549_vm10, %v5523_v3, %v5532_v11  ;;  %v5049_v38 = vpack.c.bf16 %v2690_v41, %v2566_v4  ;;  %v5644_v18 = vld [vmem:[%s6217_s25 + $0x98] sm:$0xff]  ;;  %v2196_v4 = vsel %vm2177_vm7, %v5497_v50, %v5498_v42 }
 0x26d   : > { %v5537_v46 = vunpack.i.l.bf16 %v8201_v43  ;;  %v5541_v63 = vpop.permute.xlu1 %5540  ;;  %v466_v57 = vmul.f32 %v5644_v18, %v406_v28  ;;  %v414_v50 = vrot.slane %v8138_v0, %v8862_v48  ;;  %v5646_v48 = vld [vmem:[%s6217_s25 + $0xa0] sm:$0xff] }
 0x26e   : > { %5032 = vmatprep.subr.bf16.mxu1 %v5031_v51  ;;  %v5542_v34 = vunpack.i.l.bf16 %v5541_v63  ;;  %v5543_v54 = vunpack.i.h.bf16 %v5541_v63  ;;  %v5645_v51 = vld [vmem:[%s6217_s25 + $0x90] sm:$0xff] }
 0x26f   : > { %5034 = vmatpush1.bf16.msra.mxu1 %v5033_v16  ;;  %v2691_v14 = vsel %vm2673_vm11, %v5528_v55, %v5537_v46  ;;  %v465_v16 = vmul.f32 %v5645_v51, %v402_v17  ;;  %v468_v28 = vmul.f32 %v414_v50, %v7686_v1  ;;  %v5533_v51 = vunpack.i.h.bf16 %v8190_v52 }
 0x270   : > { %v5546_v53 = vpop.permute.xlu0 %5545  ;;  %v5047_v8 = vpack.c.bf16 %v2691_v14, %v2567_v49  ;;  %v2813_v47 = vsel %vm2797_vm12, %v5483_v37, %v5542_v34  ;;  %v2814_v20 = vsel %vm2797_vm12, %v5542_v34, %v5543_v54 }
 0x271   : > { %v5548_v31 = vunpack.i.h.bf16 %v5546_v53  ;;  %v5547_v58 = vunpack.i.l.bf16 %v5546_v53  ;;  %v8214_v19 = vpop.permute.xlu1 %2783  ;;  %v5057_v37 = vpack.c.bf16 %v2196_v4, %v465_v16  ;;  %v5538_v16 = vunpack.i.h.bf16 %v8201_v43 }
 0x272   : > { %5048 = vmatprep.subr.bf16.mxu0 %v5047_v8  ;;  %v2815_v23 = vsel %vm2797_vm12, %v5543_v54, %v8214_v19 }
 0x273   : > { %5050 = vmatpush1.bf16.msra.mxu0 %v5049_v38  ;;  %v2937_v24 = vsel %vm2921_vm13, %v5488_v39, %v5547_v58  ;;  %v2938_v5 = vsel %vm2921_vm13, %v5547_v58, %v5548_v31 }
 0x274   : > { %v8229_v32 = vpop.permute.xlu0 %2907  ;;  %v5035_v22 = vpack.c.bf16 %v2937_v24, %v2813_v47  ;;  %v5053_v55 = vpack.c.bf16 %v2938_v5, %v2814_v20  ;;  %v2444_v24 = vsel %vm2425_vm9, %v5517_v30, %v5518_v33 }
 0x275   : > { %v2939_v21 = vsel %vm2921_vm13, %v5548_v31, %v8229_v32  ;;  %v5551_v44 = vpop.permute.xlu1 %5550  ;;  %v5513_v31 = vunpack.i.h.bf16 %v8168_v62 }
 0x276   : > { %v5051_v3 = vpack.c.bf16 %v2939_v21, %v2815_v23  ;;  %v5552_v7 = vunpack.i.l.bf16 %v5551_v44  ;;  %5036 = vmatprep.subr.bf16.mxu1 %v5035_v22  ;;  %v5553_v58 = vunpack.i.h.bf16 %v5551_v44 }
 0x277   : > { %5038 = vmatpush1.bf16.msra.mxu1 %v5037_v40  ;;  %v2320_v22 = vsel %vm2301_vm8, %v5512_v29, %v5513_v31 }
 0x278   : > { %v3026_v63 = vpop.permute.xlu0 %3025  ;;  %5052 = vmatprep.subr.bf16.mxu0 %v5051_v3  ;;  %v2197_v39 = vsel %vm2177_vm7, %v5498_v42, %v5552_v7  ;;  %v2198_v40 = vsel %vm2177_vm7, %v5552_v7, %v5553_v58  ;;  %v5061_v1 = vpack.c.bf16 %v2444_v24, %v2320_v22 }
 0x279   : > { %v3060_v41 = vsel %vm3045_vm14, %v8166_v6, %v3026_v63  ;;  %v3028_v34 = vpop.permute.xlu1 %3027  ;;  %5054 = vmatpush1.bf16.msra.mxu0 %v5053_v55  ;;  %v5055_v14 = vpack.c.bf16 %v2197_v39, %v466_v57  ;;  %v410_v6 = vrot.slane %v8138_v0, %v8863_v15 }
 0x27a   : > { %v3061_v49 = vsel %vm3045_vm14, %v3026_v63, %v3028_v34 }
 0x27b   : > { %3618 = vmatprep.subr.mxu1 %v3061_v49  ;;  %v467_v59 = vmul.f32 %v5646_v48, %v410_v6  ;;  %v2568_v6 = vsel %vm2549_vm10, %v5532_v11, %v5533_v51 }
 0x27c   : > { %3619 = vmatpush1.msra.mxu1 %v3060_v41  ;;  %v8246_v53 = vpop.permute.xlu0 %2171 }
 0x27d   : > { %v5556_v8 = vpop.permute.xlu1 %5555  ;;  %4895 = vmatmul.mubr.msk.f32.vlgmr.msra.gmra.mrb[6].mxu1 %vm3101_vm15, %v8013_v56  ;;  %5056 = vmatprep.subr.bf16.mxu1 %v5055_v14  ;;  %v2199_v17 = vsel %vm2177_vm7, %v5553_v58, %v8246_v53  ;;  %v5073_v62 = vpack.c.bf16 %v2198_v40, %v467_v59 }
 0x27e   : > { %5058 = vmatpush1.bf16.msra.mxu1 %v5057_v37  ;;  %3808 = vmatprep.mubr.f32.mxu1 %v8771_v13  ;;  %v5557_v38 = vunpack.i.l.bf16 %v5556_v8  ;;  %v5071_v44 = vpack.c.bf16 %v2199_v17, %v468_v28  ;;  %v5558_v20 = vunpack.i.h.bf16 %v5556_v8 }
 0x280   : > { %v5561_v61 = vpop.permute.xlu0 %5560  ;;  %v2321_v15 = vsel %vm2301_vm8, %v5513_v31, %v5557_v38  ;;  %v2322_v63 = vsel %vm2301_vm8, %v5557_v38, %v5558_v20  ;;  %v2692_v38 = vsel %vm2673_vm11, %v5537_v46, %v5538_v16 }
 0x281   : > { %v5562_v54 = vunpack.i.l.bf16 %v5561_v61  ;;  %v3030_v47 = vpop.permute.xlu1 %3029  ;;  %v5563_v9 = vunpack.i.h.bf16 %v5561_v61  ;;  %v5065_v28 = vpack.c.bf16 %v2692_v38, %v2568_v6 }
 0x282   : > { %v3062_v3 = vsel %vm3045_vm14, %v3028_v34, %v3030_v47 }
 0x283   : > { %v2445_v5 = vsel %vm2425_vm9, %v5518_v33, %v5562_v54  ;;  %v2446_v29 = vsel %vm2425_vm9, %v5562_v54, %v5563_v9 }
 0x284   : > { %v8270_v42 = vpop.permute.xlu0 %3031  ;;  %v5059_v30 = vpack.c.bf16 %v2445_v5, %v2321_v15  ;;  %v5077_v4 = vpack.c.bf16 %v2446_v29, %v2322_v63 }
 0x285   : > { %v8272_v23 = vpop.permute.xlu1 %2295  ;;  %v3063_v21 = vsel %vm3045_vm14, %v3030_v47, %v8270_v42 }
 0x286   : > { %3689 = vmatprep.subr.mxu0 %v3063_v21  ;;  %5060 = vmatprep.subr.bf16.mxu1 %v5059_v30  ;;  %v2323_v55 = vsel %vm2301_vm8, %v5558_v20, %v8272_v23 }
 0x287   : > { %3690 = vmatpush1.msra.mxu0 %v3062_v3  ;;  %5062 = vmatpush1.bf16.msra.mxu1 %v5061_v1 }
 0x288   : > { %v8278_v7 = vpop.permute.xlu0 %2419  ;;  %4896 = vmatmul.mubr.msk.f32.vlgmr.msra.gmra.mrb[8].mxu0 %vm3101_vm15, %v8013_v56  ;;  %5072 = vmatprep.subr.bf16.mxu0 %v5071_v44 }
 0x289   : > { %v2447_v18 = vsel %vm2425_vm9, %v5563_v9, %v8278_v7  ;;  %v5566_v57 = vpop.permute.xlu1 %5565  ;;  %5074 = vmatpush1.bf16.msra.mxu0 %v5073_v62  ;;  %3879 = vmatprep.mubr.f32.mxu0 %v8771_v13 }
 0x28a   : > { %v5075_v39 = vpack.c.bf16 %v2447_v18, %v2323_v55  ;;  %v5567_v41 = vunpack.i.l.bf16 %v5566_v57  ;;  %v5568_v49 = vunpack.i.h.bf16 %v5566_v57 }
 0x28b   : > { %v3171_v34 = vpop.f32.mrb[0].mxu0 }
 0x28c   : > { %v5571_v14 = vpop.permute.xlu0 %5570  ;;  %5076 = vmatprep.subr.bf16.mxu0 %v5075_v39  ;;  %v3173_v37 = vpop.f32.mrb[1].mxu0  ;;  %v2569_v31 = vsel %vm2549_vm10, %v5533_v51, %v5567_v41  ;;  %v2570_v61 = vsel %vm2549_vm10, %v5567_v41, %v5568_v49 }
 0x28d   : > { %v5573_v8 = vunpack.i.h.bf16 %v5571_v14  ;;  %v5572_v33 = vunpack.i.l.bf16 %v5571_v14  ;;  %v8290_v50 = vpop.permute.xlu1 %2543  ;;  %5078 = vmatpush1.bf16.msra.mxu0 %v5077_v4 }
 0x28e   : > { %v2571_v52 = vsel %vm2549_vm10, %v5568_v49, %v8290_v50 }
 0x28f   : > { %v2693_v58 = vsel %vm2673_vm11, %v5538_v16, %v5572_v33  ;;  %v2694_v54 = vsel %vm2673_vm11, %v5572_v33, %v5573_v8 }
 0x290   : > { %v8302_v47 = vpop.permute.xlu0 %2667  ;;  %v5063_v24 = vpack.c.bf16 %v2693_v58, %v2569_v31  ;;  %v5081_v17 = vpack.c.bf16 %v2694_v54, %v2570_v61 }
 0x291   : > { %v2695_v11 = vsel %vm2673_vm11, %v5573_v8, %v8302_v47  ;;  %v5576_v43 = vpop.permute.xlu1 %5575 }
 0x292   : > { %v5079_v46 = vpack.c.bf16 %v2695_v11, %v2571_v52  ;;  %v5578_v48 = vunpack.i.h.bf16 %v5576_v43  ;;  %v5577_v59 = vunpack.i.l.bf16 %v5576_v43  ;;  %5064 = vmatprep.subr.bf16.mxu1 %v5063_v24 }
 0x293   : > { %5066 = vmatpush1.bf16.msra.mxu1 %v5065_v28 }
 0x294   : > { %v5581_v15 = vpop.permute.xlu0 %5580  ;;  %5080 = vmatprep.subr.bf16.mxu0 %v5079_v46  ;;  %v2816_v9 = vsel %vm2797_vm12, %v8214_v19, %v5577_v59  ;;  %v2817_v30 = vsel %vm2797_vm12, %v5577_v59, %v5578_v48  ;;  %v422_v59 = vrot.slane %v8138_v0, %v8852_v60 }
 0x295   : > { %v5583_v5 = vunpack.i.h.bf16 %v5581_v15  ;;  %v5582_v22 = vunpack.i.l.bf16 %v5581_v15  ;;  %v8308_v40 = vpop.permute.xlu1 %5585  ;;  %5082 = vmatpush1.bf16.msra.mxu0 %v5081_v17  ;;  %v5610_v17 = vpack.i.bf16 %v7993_v45, %v7996_v2 }
 0x296   : > { %v5588_v21 = vunpack.i.h.bf16 %v8308_v40  ;;  %v5587_v44 = vunpack.i.l.bf16 %v8308_v40 }
 0x297   : > { %v2940_v1 = vsel %vm2921_vm13, %v8229_v32, %v5582_v22  ;;  %v2941_v20 = vsel %vm2921_vm13, %v5582_v22, %v5583_v5 }
 0x298   : > { %v5069_v3 = vpack.c.bf16 %v2940_v1, %v2816_v9  ;;  %v8318_v62 = vpop.permute.xlu0 %5590  ;;  %v5067_v29 = vpack.c.bf16 %v2941_v20, %v2817_v30  ;;  %v2818_v57 = vsel %vm2797_vm12, %v5578_v48, %v5587_v44  ;;  %v2819_v51 = vsel %vm2797_vm12, %v5587_v44, %v5588_v21  ;;  %v5647_v9 = vld [vmem:[%s6217_s25 + $0xb0] sm:$0xff] }
 0x299   : > { %v5593_v55 = vunpack.i.h.bf16 %v8318_v62  ;;  %v5592_v18 = vunpack.i.l.bf16 %v8318_v62  ;;  %v3034_v19 = vpop.permute.xlu1 %3033  ;;  %v418_v48 = vrot.slane %v8138_v0, %v8864_v12  ;;  %v470_v0 = vmul.f32 %v422_v59, %v7996_v2 }
 0x29a   : > { %5068 = vmatprep.subr.bf16.mxu1 %v5067_v29  ;;  %v3064_v49 = vsel %vm3045_vm14, %v8270_v42, %v3034_v19 }
 0x29b   : > { %v2942_v32 = vsel %vm2921_vm13, %v5583_v5, %v5592_v18  ;;  %5070 = vmatpush1.bf16.msra.mxu1 %v5069_v3  ;;  %v2943_v16 = vsel %vm2921_vm13, %v5592_v18, %v5593_v55  ;;  %v469_v30 = vmul.f32 %v5647_v9, %v418_v48 }
 0x29c   : > { %v5085_v63 = vpack.c.bf16 %v2942_v32, %v2818_v57  ;;  %v3036_v39 = vpop.permute.xlu0 %3035  ;;  %v5083_v4 = vpack.c.bf16 %v2943_v16, %v2819_v51  ;;  %v4100_v16 = vld [vmem:[%s8547_s5] sm:$0xff] }
 0x29d   : > { %v3038_v41 = vpop.permute.xlu1 %3037  ;;  %v3065_v34 = vsel %vm3045_vm14, %v3034_v19, %v3036_v39 }
 0x29e   : > { %3760 = vmatprep.subr.mxu1 %v3065_v34  ;;  %5084 = vmatprep.subr.bf16.mxu0 %v5083_v4  ;;  %v3066_v33 = vsel %vm3045_vm14, %v3036_v39, %v3038_v41 }
 0x29f   : > { %3761 = vmatpush1.msra.mxu1 %v3064_v49  ;;  %5086 = vmatpush1.bf16.msra.mxu0 %v5085_v63 }
 0x2a0   : > { %v8333_v14 = vpop.permute.xlu0 %3039  ;;  %4897 = vmatmul.mubr.msk.f32.vlgmr.msra.gmra.mrb[8].mxu1 %vm3101_vm15, %v8013_v56 }
 0x2a1   : > { %v862_v37 = vpop.permute.xlu1 %861  ;;  %v3067_v8 = vsel %vm3045_vm14, %v3038_v41, %v8333_v14  ;;  %3950 = vmatprep.mubr.f32.mxu1 %v8771_v13 }
 0x2a2   : > { %v886_v42 = vsel %vm863_vm1, %v7599_v26, %v862_v37  ;;  %v936_v6 = vmul.f32 %v862_v37, %v7993_v45  ;;  %3831 = vmatprep.subr.mxu0 %v3067_v8 }
 0x2a3   : > { %v935_v38 = vmul.f32 %v886_v42, %v7996_v2  ;;  %3832 = vmatpush1.msra.mxu0 %v3066_v33 }
 0x2a4   : > { %v1095_v31 = vpop.permute.xlu0 %1094  ;;  %4898 = vmatmul.mubr.msk.f32.vlgmr.msra.gmra.mrb[10].mxu0 %vm3101_vm15, %v8013_v56  ;;  %v3095_v56 = vld [vmem:[%s8545_s3] sm:$0xff] }
 0x2a5   : > { %v5599_v58 = vpack.i.bf16 %v936_v6, %v935_v38  ;;  %v1119_v61 = vsel %vm1096_vm2, %v7617_v10, %v1095_v31  ;;  %v1169_v54 = vmul.f32 %v1095_v31, %v7993_v45  ;;  %v1328_v24 = vpop.permute.xlu1 %1327  ;;  %4174 = vmatprep.mubr.f32.mxu0 %v8771_v13 }
 0x2a6   : > { %v1168_v26 = vmul.f32 %v1119_v61, %v7996_v2  ;;  %v1352_v52 = vsel %vm1329_vm3, %v7740_v25, %v1328_v24 }
 0x2a7   : > { %5600 = vrot.lane.b32.xlu0 %v5599_v58, %s5681_s29  ;;  %v1401_v15 = vmul.f32 %v1352_v52, %v7996_v2 }
 0x2a8   : > { %v5604_v28 = vpack.i.bf16 %v1169_v54, %v1168_v26  ;;  %v1561_v11 = vpop.permute.xlu0 %1560 }
 0x2a9   : > { %v1585_v10 = vsel %vm1562_vm5, %v7853_v36, %v1561_v11  ;;  %v1635_v43 = vmul.f32 %v1561_v11, %v7993_v45  ;;  %v1794_v46 = vpop.permute.xlu1 %1793  ;;  %v1402_v36 = vmul.f32 %v1328_v24, %v7993_v45 }
 0x2aa   : > { %v1634_v25 = vmul.f32 %v1585_v10, %v7996_v2  ;;  %5605 = vrot.lane.b32.xlu1 %v5604_v28, %s5682_s30  ;;  %v1818_v12 = vsel %vm1795_vm4, %v7867_v27, %v1794_v46  ;;  %v1868_v18 = vmul.f32 %v1794_v46, %v7993_v45 }
 0x2ab   : > { %3098 = vperm.xlu0 %5609, %v3095_v56   ;;  %v5615_v3 = vpack.i.bf16 %v1402_v36, %v1401_v15  ;;  %v1867_v29 = vmul.f32 %v1818_v12, %v7996_v2 }
 0x2ac   : > { %v5620_v5 = vpack.i.bf16 %v1635_v43, %v1634_v25  ;;  %v2027_v22 = vpop.permute.xlu0 %2026 }
 0x2ad   : > { %v5596_v60 = vpop.permute.xlu1 %5595  ;;  %v2051_v1 = vsel %vm2028_vm6, %v7937_v35, %v2027_v22  ;;  %v5625_v51 = vpack.i.bf16 %v1868_v18, %v1867_v29  ;;  %v2101_v63 = vmul.f32 %v2027_v22, %v7993_v45 }
 0x2ae   : > { %v5598_v44 = vunpack.i.h.bf16 %v5596_v60  ;;  %v5597_v20 = vunpack.i.l.bf16 %v5596_v60  ;;  %5611 = vrot.lane.b32.xlu1 %v5610_v17, %s5683_s13  ;;  %v2100_v57 = vmul.f32 %v2051_v1, %v7996_v2 }
 0x2af   : > { %5621 = vrot.lane.b32.xlu0 %v5620_v5, %s5685_s7 }
 0x2b0   : > { %v2200_v27 = vsel %vm2177_vm7, %v8246_v53, %v5597_v20  ;;  %v2201_v19 = vsel %vm2177_vm7, %v5597_v20, %v5598_v44 }
 0x2b1   : > { %v5089_v32 = vpack.c.bf16 %v2200_v27, %v469_v30  ;;  %v5087_v35 = vpack.c.bf16 %v2201_v19, %v470_v0 }
 0x2b2   : > { %5616 = vrot.lane.b32.xlu1 %v5615_v3, %s5684_s14 }
 0x2b3   : > { %3041 = vrot.lane.b32.xlu0 %v2100_v57, %s5687_s15  ;;  %5088 = vmatprep.subr.bf16.mxu1 %v5087_v35 }
 0x2b4   : > { %5090 = vmatpush1.bf16.msra.mxu1 %v5089_v32 }
 0x2b6   : > { %5626 = vrot.lane.b32.xlu1 %v5625_v51, %s5686_s9  ;;  %s4910_s9 = sshll.u32 %s8872_s21, 7 }
 0x2b7   : > { %4103 = vperm.xlu0 %5609, %v4100_v16   ;;  %s8501_s17 = scalar_lea.vmem %s8548_s6, %s4910_s9 }
 0x2ba   : > { %3043 = vrot.lane.b32.xlu1 %v2101_v63, %s5687_s15 }
 0x2bc   : > { %v3242_v2 = vpop.f32.mrb[0].mxu1 }
 0x2bd   : > { %v3244_v53 = vpop.f32.mrb[1].mxu1 }
 0x2d4   : > { %v3313_v39 = vpop.f32.mrb[2].mxu0 }
 0x2d5   : > { %v3315_v4 = vpop.f32.mrb[3].mxu0 }
 0x308   : > { %v3384_v41 = vpop.f32.mrb[2].mxu1 }
 0x309   : > { %v3386_v34 = vpop.f32.mrb[3].mxu1 }
 0x313   : > { %v3455_v49 = vpop.f32.mrb[4].mxu0 }
 0x314   : > { %v8393_v37 = vpop.f32.mrb[5].mxu0 }
 0x319   : > { %v5601_v8 = vpop.permute.xlu0 %5600 }
 0x31a   : > { %v5603_v33 = vunpack.i.h.bf16 %v5601_v8  ;;  %v5602_v42 = vunpack.i.l.bf16 %v5601_v8 }
 0x31c   : > { %v5606_v6 = vpop.permute.xlu1 %5605  ;;  %v2324_v31 = vsel %vm2301_vm8, %v8272_v23, %v5602_v42  ;;  %v2325_v61 = vsel %vm2301_vm8, %v5602_v42, %v5603_v33 }
 0x31d   : > { %v5608_v38 = vunpack.i.h.bf16 %v5606_v6  ;;  %v5607_v45 = vunpack.i.l.bf16 %v5606_v6 }
 0x31f   : > { %v2448_v58 = vsel %vm2425_vm9, %v8278_v7, %v5607_v45  ;;  %v2449_v54 = vsel %vm2425_vm9, %v5607_v45, %v5608_v38 }
 0x320   : > { %v5093_v24 = vpack.c.bf16 %v2448_v58, %v2324_v31  ;;  %v5612_v26 = vpop.permute.xlu1 %5611  ;;  %v5091_v28 = vpack.c.bf16 %v2449_v54, %v2325_v61 }
 0x321   : > { %v5614_v52 = vunpack.i.h.bf16 %v5612_v26  ;;  %v5613_v11 = vunpack.i.l.bf16 %v5612_v26 }
 0x322   : > { %5092 = vmatprep.subr.bf16.mxu1 %v5091_v28 }
 0x323   : > { %5094 = vmatpush1.bf16.msra.mxu1 %v5093_v24  ;;  %v2573_v46 = vsel %vm2549_vm10, %v5613_v11, %v5614_v52  ;;  %v2572_v23 = vsel %vm2549_vm10, %v8290_v50, %v5613_v11 }
 0x324   : > { %v5617_v56 = vpop.permute.xlu1 %5616 }
 0x325   : > { %v5619_v10 = vunpack.i.h.bf16 %v5617_v56  ;;  %v5618_v43 = vunpack.i.l.bf16 %v5617_v56 }
 0x327   : > { %v2696_v7 = vsel %vm2673_vm11, %v8302_v47, %v5618_v43  ;;  %v2697_v48 = vsel %vm2673_vm11, %v5618_v43, %v5619_v10 }
 0x328   : > { %v5097_v59 = vpack.c.bf16 %v2696_v7, %v2572_v23  ;;  %v5627_v25 = vpop.permute.xlu1 %5626  ;;  %v5095_v17 = vpack.c.bf16 %v2697_v48, %v2573_v46 }
 0x329   : > { %v5628_v15 = vunpack.i.l.bf16 %v5627_v25  ;;  %v5629_v5 = vunpack.i.h.bf16 %v5627_v25 }
 0x32a   : > { %v8407_v36 = vpop.permute.xlu0 %3098  ;;  %5096 = vmatprep.subr.bf16.mxu1 %v5095_v17 }
 0x32b   : > { %v3245_v22 = vadd.f32 %v3244_v53, %v8407_v36  ;;  %v3243_v12 = vadd.f32 %v3242_v2, %v8407_v36  ;;  %v3314_v9 = vadd.f32 %v3313_v39, %v8407_v36  ;;  %5098 = vmatpush1.bf16.msra.mxu1 %v5097_v59  ;;  %v2944_v50 = vsel %vm2921_vm13, %v5593_v55, %v5628_v15 }
 0x32c   : > { %v3316_v47 = vadd.f32 %v3315_v4, %v8407_v36  ;;  %v3385_v30 = vadd.f32 %v3384_v41, %v8407_v36  ;;  %v3387_v60 = vadd.f32 %v3386_v34, %v8407_v36  ;;  %v3526_v0 = vpop.f32.mrb[4].mxu1  ;;  %v3456_v44 = vadd.f32 %v3455_v49, %v8407_v36  ;;  %v3044_v2 = vpop.permute.xlu1 %3043 }
 0x32d   : > { %v3984_v1 = vmul.f32 0.2, %v3245_v22  ;;  %vm3959_vm0 = vcmp.ge.f32.partialorder %v3243_v12, 0.0  ;;  %vm3961_vm1 = vcmp.ge.f32.partialorder %v3314_v9, 0.0  ;;  %v3528_v20 = vpop.f32.mrb[5].mxu1  ;;  %vm3960_vm2 = vcmp.ge.f32.partialorder %v3245_v22, 0.0 }
 0x32e   : > { %v3983_v3 = vmul.f32 0.2, %v3243_v12  ;;  %v3985_v29 = vmul.f32 0.2, %v3314_v9  ;;  %vm3963_vm3 = vcmp.ge.f32.partialorder %v3385_v30, 0.0  ;;  %v5622_v62 = vpop.permute.xlu0 %5621  ;;  %vm3962_vm4 = vcmp.ge.f32.partialorder %v3316_v47, 0.0 }
 0x32f   : > { %v3986_v55 = vmul.f32 0.2, %v3316_v47  ;;  %v3987_v18 = vmul.f32 0.2, %v3385_v30  ;;  %v5623_v27 = vunpack.i.l.bf16 %v5622_v62  ;;  %v5624_v32 = vunpack.i.h.bf16 %v5622_v62 }
 0x330   : > { %v8419_v19 = vsel %vm3959_vm0, %v3243_v12, %v3983_v3  ;;  %v8421_v57 = vsel %vm3961_vm1, %v3314_v9, %v3985_v29  ;;  %v3988_v35 = vmul.f32 0.2, %v3387_v60  ;;  %v4008_v53 = vsel %vm3960_vm2, %v3245_v22, %v3984_v1  ;;  %v8452_v22 = vld [vmem:[%s8546_s4] sm:$0xff] }
 0x331   : > { %v5113_v51 = vpack.c.bf16 %v8421_v57, %v8419_v19  ;;  %v4011_v16 = vsel %vm3963_vm3, %v3385_v30, %v3987_v18  ;;  %v2820_v63 = vsel %vm2797_vm12, %v5588_v21, %v5623_v27  ;;  %vm3964_vm5 = vcmp.ge.f32.partialorder %v3387_v60, 0.0  ;;  %v5648_v9 = vld [vmem:[%s8544_s2] sm:$0xff] }
 0x332   : > { %v8430_v39 = vpack.c.bf16 %v4011_v16, %v8421_v57  ;;  %v5101_v4 = vpack.c.bf16 %v2944_v50, %v2820_v63  ;;  %v3042_v41 = vpop.permute.xlu0 %3041  ;;  %v5103_v34 = vpack.c.bf16 %v4008_v53, %v8771_v13  ;;  %vm3965_vm6 = vcmp.ge.f32.partialorder %v3456_v44, 0.0 }
 0x333   : > { %v3989_v49 = vmul.f32 0.2, %v3456_v44  ;;  %v5105_v8 = vpack.c.bf16 %v8419_v19, %v8771_v13  ;;  %v3458_v40 = vadd.f32 %v8393_v37, %v8407_v36  ;;  %v2821_v21 = vsel %vm2797_vm12, %v5623_v27, %v5624_v32 }
 0x334   : > { %5104 = vmatprep.subr.bf16.mxu0 %v5103_v34  ;;  %v2945_v33 = vsel %vm2921_vm13, %v5628_v15, %v5629_v5  ;;  %v3069_v42 = vsel %vm3045_vm14, %v3042_v41, %v3044_v2  ;;  %v4010_v6 = vsel %vm3962_vm4, %v3316_v47, %v3986_v55  ;;  %v4012_v31 = vsel %vm3964_vm5, %v3387_v60, %v3988_v35 }
 0x335   : > { %5106 = vmatpush1.bf16.msra.mxu0 %v5105_v8  ;;  %v3990_v38 = vmul.f32 0.2, %v3458_v40  ;;  %v5099_v45 = vpack.c.bf16 %v2945_v33, %v2821_v21  ;;  %v3527_v58 = vadd.f32 %v3526_v0, %v8407_v36  ;;  %v5107_v61 = vpack.c.bf16 %v4012_v31, %v4010_v6 }
 0x336   : > { %v3529_v54 = vadd.f32 %v3528_v20, %v8407_v36  ;;  %vm3966_vm7 = vcmp.ge.f32.partialorder %v3458_v40, 0.0  ;;  %v5111_v37 = vpack.c.bf16 %v4010_v6, %v4008_v53  ;;  %v4013_v28 = vsel %vm3965_vm6, %v3456_v44, %v3989_v49 }
 0x337   : > { %5100 = vmatprep.subr.bf16.mxu1 %v5099_v45  ;;  %vm3967_vm8 = vcmp.ge.f32.partialorder %v3527_v58, 0.0  ;;  %v3991_v24 = vmul.f32 0.2, %v3527_v58  ;;  %v4014_v26 = vsel %vm3966_vm7, %v3458_v40, %v3990_v38  ;;  %v3597_v52 = vpop.f32.mrb[6].mxu0  ;;  %5108 = vmatprep.subr.bf16.mxu0 %v5107_v61  ;;  %v5117_v56 = vpack.c.bf16 %v4013_v28, %v4011_v16 }
 0x338   : > { %5102 = vmatpush1.bf16.msra.mxu1 %v5101_v4  ;;  %vm3968_vm9 = vcmp.ge.f32.partialorder %v3529_v54, 0.0  ;;  %v3992_v11 = vmul.f32 0.2, %v3529_v54  ;;  %v3598_v10 = vadd.f32 %v3597_v52, %v8407_v36  ;;  %v3599_v43 = vpop.f32.mrb[7].mxu0  ;;  %v5115_v7 = vpack.c.bf16 %v4014_v26, %v4012_v31 }
 0x339   : > { %3902 = vmatprep.subr.mxu1 %v3069_v42  ;;  %v4015_v46 = vsel %vm3967_vm8, %v3527_v58, %v3991_v24  ;;  %5110 = vmatpush1.bf16.msra.mxu0 %v8430_v39  ;;  %v3600_v23 = vadd.f32 %v3599_v43, %v8407_v36  ;;  %v3068_v17 = vsel %vm3045_vm14, %v8333_v14, %v3042_v41  ;;  %vm4106_vm12 = vcmask 326656  }
 0x33a   : > { %v4016_v48 = vsel %vm3968_vm9, %v3529_v54, %v3992_v11  ;;  %4118 = vmatprep.subr.mxu0 %v4014_v26  ;;  %v5125_v59 = vpack.c.bf16 %v4015_v46, %v4013_v28  ;;  %vm3969_vm10 = vcmp.ge.f32.partialorder %v3598_v10, 0.0  ;;  %v3993_v25 = vmul.f32 0.2, %v3598_v10 }
 0x33b   : > { %v3994_v15 = vmul.f32 0.2, %v3600_v23  ;;  %v5123_v5 = vpack.c.bf16 %v4016_v48, %v4014_v26  ;;  %vm3970_vm11 = vcmp.ge.f32.partialorder %v3600_v23, 0.0 }
 0x33c   : > { %3903 = vmatpush1.msra.mxu1 %v3068_v17  ;;  %v4017_v12 = vsel %vm3969_vm10, %v3598_v10, %v3993_v25 }
 0x33d   : > { %5112 = vmatprep.subr.bf16.mxu1 %v5111_v37  ;;  %4899 = vmatmul.mubr.msk.f32.vlgmr.msra.gmra.mrb[10].mxu1 %vm3101_vm15, %v5648_v9  ;;  %v4018_v50 = vsel %vm3970_vm11, %v3600_v23, %v3994_v15  ;;  %v5133_v14 = vpack.c.bf16 %v4017_v12, %v4015_v46 }
 0x33e   : > { %4119 = vmatpush1.msra.mxu0 %v4013_v28  ;;  %5114 = vmatpush1.bf16.msra.mxu1 %v5113_v51  ;;  %v5131_v47 = vpack.c.bf16 %v4018_v50, %v4016_v48  ;;  %v8493_v28 = vpop.permute.xlu0 %4103 }
 0x33f   : > { %4900 = vmatmul.mubr.msk.f32.vlgmr.msra.gmra.mrb[12].mxu0 %vm4106_vm12, %v8452_v22  ;;  %5120 = vmatprep.subr.bf16.mxu0 %v5107_v61 }
 0x340   : > { %5122 = vmatpush1.bf16.msra.mxu0 %v8430_v39  ;;  %5116 = vmatprep.subr.bf16.mxu1 %v5115_v7 }
 0x341   : > { %5124 = vmatprep.subr.bf16.mxu0 %v5123_v5  ;;  %4245 = vmatprep.mubr.f32.mxu1 %v8771_v13 }
 0x342   : > { %5118 = vmatpush1.bf16.msra.mxu1 %v5117_v56  ;;  %4316 = vmatprep.mubr.f32.mxu0 %v8771_v13 }
 0x343   : > { %4189 = vmatprep.subr.mxu1 %v4016_v48 }
 0x344   : > { %5126 = vmatpush1.bf16.msra.mxu0 %v5125_v59 }
 0x345   : > { %4260 = vmatprep.subr.mxu0 %v4018_v50 }
 0x346   : > { %4190 = vmatpush1.msra.mxu1 %v4015_v46 }
 0x347   : > { %4901 = vmatmul.mubr.msk.f32.vlgmr.msra.gmra.mrb[12].mxu1 %vm4106_vm12, %v8452_v22  ;;  %5128 = vmatprep.subr.bf16.mxu1 %v5115_v7 }
 0x348   : > { %4261 = vmatpush1.msra.mxu0 %v4017_v12  ;;  %5130 = vmatpush1.bf16.msra.mxu1 %v5117_v56 }
 0x349   : > { %4902 = vmatmul.mubr.msk.f32.vlgmr.msra.gmra.mrb[14].mxu0 %vm4106_vm12, %v8452_v22  ;;  %5136 = vmatprep.subr.bf16.mxu0 %v5123_v5 }
 0x34a   : > { %5138 = vmatpush1.bf16.msra.mxu0 %v5125_v59  ;;  %5132 = vmatprep.subr.bf16.mxu1 %v5131_v47 }
 0x34b   : > { %4387 = vmatprep.mubr.f32.mxu1 %v8771_v13  ;;  %4458 = vmatprep.mubr.f32.mxu0 %v8771_v13 }
 0x34c   : > { %5134 = vmatpush1.bf16.msra.mxu1 %v5133_v14 }
 0x350   : > { %v3668_v30 = vpop.f32.mrb[6].mxu1 }
 0x351   : > { %v3669_v60 = vadd.f32 %v3668_v30, %v8407_v36  ;;  %v3670_v0 = vpop.f32.mrb[7].mxu1 }
 0x352   : > { %v3671_v1 = vadd.f32 %v3670_v0, %v8407_v36 }
 0x353   : > { %vm3971_vm13 = vcmp.ge.f32.partialorder %v3669_v60, 0.0  ;;  %v3995_v44 = vmul.f32 0.2, %v3669_v60 }
 0x354   : > { %v3996_v20 = vmul.f32 0.2, %v3671_v1  ;;  %vm3972_vm14 = vcmp.ge.f32.partialorder %v3671_v1, 0.0 }
 0x355   : > { %v4019_v3 = vsel %vm3971_vm13, %v3669_v60, %v3995_v44 }
 0x356   : > { %v4020_v29 = vsel %vm3972_vm14, %v3671_v1, %v3996_v20  ;;  %v5141_v62 = vpack.c.bf16 %v4019_v3, %v4017_v12 }
 0x357   : > { %4331 = vmatprep.subr.mxu1 %v4020_v29  ;;  %v5139_v55 = vpack.c.bf16 %v4020_v29, %v4018_v50 }
 0x358   : > { %4332 = vmatpush1.msra.mxu1 %v4019_v3 }
 0x359   : > { %4903 = vmatmul.mubr.msk.f32.vlgmr.msra.gmra.mrb[14].mxu1 %vm4106_vm12, %v8452_v22  ;;  %5140 = vmatprep.subr.bf16.mxu0 %v5139_v55 }
 0x35a   : > { %5144 = vmatprep.subr.bf16.mxu1 %v5131_v47  ;;  %5142 = vmatpush1.bf16.msra.mxu0 %v5141_v62 }
 0x35b   : > { %5146 = vmatpush1.bf16.msra.mxu1 %v5133_v14  ;;  %v3739_v18 = vpop.f32.mrb[8].mxu0  ;;  %4529 = vmatprep.mubr.f32.mxu1 %v8771_v13 }
 0x35c   : > { %v3740_v27 = vadd.f32 %v3739_v18, %v8407_v36  ;;  %v3741_v19 = vpop.f32.mrb[9].mxu0 }
 0x35d   : > { %v3742_v57 = vadd.f32 %v3741_v19, %v8407_v36 }
 0x35e   : > { %vm3973_vm15 = vcmp.ge.f32.partialorder %v3740_v27, 0.0  ;;  %v3997_v32 = vmul.f32 0.2, %v3740_v27 }
 0x35f   : > { %v3998_v35 = vmul.f32 0.2, %v3742_v57  ;;  %vm3974_vm0 = vcmp.ge.f32.partialorder %v3742_v57, 0.0 }
 0x360   : > { %v4021_v51 = vsel %vm3973_vm15, %v3740_v27, %v3997_v32 }
 0x361   : > { %v4022_v16 = vsel %vm3974_vm0, %v3742_v57, %v3998_v35  ;;  %v5149_v63 = vpack.c.bf16 %v4021_v51, %v4019_v3 }
 0x362   : > { %4402 = vmatprep.subr.mxu0 %v4022_v16  ;;  %v5147_v2 = vpack.c.bf16 %v4022_v16, %v4020_v29 }
 0x363   : > { %4403 = vmatpush1.msra.mxu0 %v4021_v51 }
 0x364   : > { %4904 = vmatmul.mubr.msk.f32.vlgmr.msra.gmra.mrb[16].mxu0 %vm4106_vm12, %v8452_v22  ;;  %5148 = vmatprep.subr.bf16.mxu1 %v5147_v2 }
 0x365   : > { %5152 = vmatprep.subr.bf16.mxu0 %v5139_v55  ;;  %5150 = vmatpush1.bf16.msra.mxu1 %v5149_v63 }
 0x366   : > { %5154 = vmatpush1.bf16.msra.mxu0 %v5141_v62  ;;  %4600 = vmatprep.mubr.f32.mxu0 %v8771_v13 }
 0x373   : > { %v3810_v53 = vpop.f32.mrb[8].mxu1 }
 0x374   : > { %v3811_v39 = vadd.f32 %v3810_v53, %v8407_v36  ;;  %v3812_v4 = vpop.f32.mrb[9].mxu1 }
 0x375   : > { %v3813_v41 = vadd.f32 %v3812_v4, %v8407_v36 }
 0x376   : > { %vm3975_vm1 = vcmp.ge.f32.partialorder %v3811_v39, 0.0  ;;  %v3999_v34 = vmul.f32 0.2, %v3811_v39 }
 0x377   : > { %v4000_v49 = vmul.f32 0.2, %v3813_v41  ;;  %v3881_v8 = vpop.f32.mrb[10].mxu0  ;;  %vm3976_vm2 = vcmp.ge.f32.partialorder %v3813_v41, 0.0 }
 0x378   : > { %v3882_v40 = vadd.f32 %v3881_v8, %v8407_v36  ;;  %v3883_v21 = vpop.f32.mrb[11].mxu0  ;;  %v4023_v33 = vsel %vm3975_vm1, %v3811_v39, %v3999_v34 }
 0x379   : > { %v3884_v42 = vadd.f32 %v3883_v21, %v8407_v36  ;;  %v4024_v6 = vsel %vm3976_vm2, %v3813_v41, %v4000_v49  ;;  %v5157_v38 = vpack.c.bf16 %v4023_v33, %v4021_v51 }
 0x37a   : > { %vm3977_vm3 = vcmp.ge.f32.partialorder %v3882_v40, 0.0  ;;  %v4001_v45 = vmul.f32 0.2, %v3882_v40  ;;  %4473 = vmatprep.subr.mxu1 %v4024_v6  ;;  %v5155_v31 = vpack.c.bf16 %v4024_v6, %v4022_v16 }
 0x37b   : > { %v4002_v58 = vmul.f32 0.2, %v3884_v42  ;;  %4474 = vmatpush1.msra.mxu1 %v4023_v33  ;;  %vm3978_vm4 = vcmp.ge.f32.partialorder %v3884_v42, 0.0 }
 0x37c   : > { %4905 = vmatmul.mubr.msk.f32.vlgmr.msra.gmra.mrb[16].mxu1 %vm4106_vm12, %v8452_v22  ;;  %5156 = vmatprep.subr.bf16.mxu0 %v5155_v31  ;;  %v4025_v61 = vsel %vm3977_vm3, %v3882_v40, %v4001_v45 }
 0x37d   : > { %5160 = vmatprep.subr.bf16.mxu1 %v5147_v2  ;;  %5158 = vmatpush1.bf16.msra.mxu0 %v5157_v38  ;;  %v4026_v54 = vsel %vm3978_vm4, %v3884_v42, %v4002_v58  ;;  %v5165_v37 = vpack.c.bf16 %v4025_v61, %v4023_v33 }
 0x37e   : > { %5162 = vmatpush1.bf16.msra.mxu1 %v5149_v63  ;;  %4544 = vmatprep.subr.mxu0 %v4026_v54  ;;  %v5163_v36 = vpack.c.bf16 %v4026_v54, %v4024_v6 }
 0x37f   : > { %4671 = vmatprep.mubr.f32.mxu1 %v8771_v13 }
 0x380   : > { %5164 = vmatprep.subr.bf16.mxu1 %v5163_v36 }
 0x381   : > { %4545 = vmatpush1.msra.mxu0 %v4025_v61 }
 0x382   : > { %5166 = vmatpush1.bf16.msra.mxu1 %v5165_v37  ;;  %4906 = vmatmul.mubr.msk.f32.vlgmr.msra.gmra.mrb[18].mxu0 %vm4106_vm12, %v8452_v22 }
 0x385   : > { %4907 = vmatmul.mubr.msk.f32.vlgmr.msra.gmra.mrb[18].mxu1 %vm4106_vm12, %v8452_v22 }
 0x410   : > { %v3952_v24 = vpop.f32.mrb[10].mxu1 }
 0x411   : > { %v3954_v26 = vpop.f32.mrb[11].mxu1 }
 0x412   : > { %v4176_v52 = vpop.f32.mrb[12].mxu0 }
 0x413   : > { %v4177_v11 = vadd.f32 %v4176_v52, %v8493_v28  ;;  %v4178_v56 = vpop.f32.mrb[13].mxu0 }
 0x414   : > { %v4179_v13 = vadd.f32 %v4178_v56, %v8493_v28 }
 0x415   : > { %vm4678_vm5 = vcmp.ge.f32.partialorder %v4177_v11, 0.0  ;;  %v4694_v10 = vmul.f32 0.2, %v4177_v11 }
 0x416   : > { %vm4679_vm6 = vcmp.ge.f32.partialorder %v4179_v13, 0.0  ;;  %v4695_v43 = vmul.f32 0.2, %v4179_v13 }
 0x417   : > { %v4710_v46 = vsel %vm4678_vm5, %v4177_v11, %v4694_v10 }
 0x418   : > { %4726 = vst [vmem:[%s8501_s17] sm:$0xff] %v4710_v46  ;;  %v4711_v23 = vsel %vm4679_vm6, %v4179_v13, %v4695_v43 }
 0x419   : > { %4727 = vst [vmem:[%s8501_s17 + $0x8] sm:$0xff] %v4711_v23 }
 0x41a   : > { %v4247_v7 = vpop.f32.mrb[12].mxu1 }
 0x41b   : > { %v4248_v48 = vadd.f32 %v4247_v7, %v8493_v28  ;;  %v4249_v59 = vpop.f32.mrb[13].mxu1 }
 0x41c   : > { %v4250_v25 = vadd.f32 %v4249_v59, %v8493_v28  ;;  %v4318_v17 = vpop.f32.mrb[14].mxu0 }
 0x41d   : > { %vm4680_vm7 = vcmp.ge.f32.partialorder %v4248_v48, 0.0  ;;  %v4696_v15 = vmul.f32 0.2, %v4248_v48  ;;  %v4319_v5 = vadd.f32 %v4318_v17, %v8493_v28  ;;  %v4320_v22 = vpop.f32.mrb[15].mxu0 }
 0x41e   : > { %vm4681_vm8 = vcmp.ge.f32.partialorder %v4250_v25, 0.0  ;;  %v4697_v12 = vmul.f32 0.2, %v4250_v25  ;;  %v4321_v9 = vadd.f32 %v4320_v22, %v8493_v28 }
 0x41f   : > { %v4712_v50 = vsel %vm4680_vm7, %v4248_v48, %v4696_v15  ;;  %vm4682_vm9 = vcmp.ge.f32.partialorder %v4319_v5, 0.0  ;;  %v4698_v14 = vmul.f32 0.2, %v4319_v5 }
 0x420   : > { %4728 = vst [vmem:[%s8501_s17 + $0x10] sm:$0xff] %v4712_v50  ;;  %v4713_v47 = vsel %vm4681_vm8, %v4250_v25, %v4697_v12  ;;  %vm4683_vm10 = vcmp.ge.f32.partialorder %v4321_v9, 0.0  ;;  %v4699_v30 = vmul.f32 0.2, %v4321_v9 }
 0x421   : > { %4729 = vst [vmem:[%s8501_s17 + $0x18] sm:$0xff] %v4713_v47  ;;  %v4714_v60 = vsel %vm4682_vm9, %v4319_v5, %v4698_v14 }
 0x422   : > { %4730 = vst [vmem:[%s8501_s17 + $0x20] sm:$0xff] %v4714_v60  ;;  %v4715_v0 = vsel %vm4683_vm10, %v4321_v9, %v4699_v30 }
 0x423   : > { %4731 = vst [vmem:[%s8501_s17 + $0x28] sm:$0xff] %v4715_v0 }
 0x42c   : > { %v4389_v1 = vpop.f32.mrb[14].mxu1 }
 0x42d   : > { %v4390_v44 = vadd.f32 %v4389_v1, %v8493_v28  ;;  %v4391_v20 = vpop.f32.mrb[15].mxu1 }
 0x42e   : > { %v4392_v3 = vadd.f32 %v4391_v20, %v8493_v28 }
 0x42f   : > { %vm4684_vm11 = vcmp.ge.f32.partialorder %v4390_v44, 0.0  ;;  %v4700_v29 = vmul.f32 0.2, %v4390_v44 }
 0x430   : > { %vm4685_vm12 = vcmp.ge.f32.partialorder %v4392_v3, 0.0  ;;  %v4701_v62 = vmul.f32 0.2, %v4392_v3 }
 0x431   : > { %v4716_v55 = vsel %vm4684_vm11, %v4390_v44, %v4700_v29 }
 0x432   : > { %4732 = vst [vmem:[%s8501_s17 + $0x30] sm:$0xff] %v4716_v55  ;;  %v4717_v18 = vsel %vm4685_vm12, %v4392_v3, %v4701_v62 }
 0x433   : > { %4733 = vst [vmem:[%s8501_s17 + $0x38] sm:$0xff] %v4717_v18 }
 0x437   : > { %v4460_v27 = vpop.f32.mrb[16].mxu0 }
 0x438   : > { %v4461_v19 = vadd.f32 %v4460_v27, %v8493_v28  ;;  %v4462_v57 = vpop.f32.mrb[17].mxu0 }
 0x439   : > { %v4463_v32 = vadd.f32 %v4462_v57, %v8493_v28 }
 0x43a   : > { %vm4686_vm13 = vcmp.ge.f32.partialorder %v4461_v19, 0.0  ;;  %v4702_v35 = vmul.f32 0.2, %v4461_v19 }
 0x43b   : > { %vm4687_vm14 = vcmp.ge.f32.partialorder %v4463_v32, 0.0  ;;  %v4703_v51 = vmul.f32 0.2, %v4463_v32 }
 0x43c   : > { %v4718_v16 = vsel %vm4686_vm13, %v4461_v19, %v4702_v35 }
 0x43d   : > { %4734 = vst [vmem:[%s8501_s17 + $0x40] sm:$0xff] %v4718_v16  ;;  %v4719_v63 = vsel %vm4687_vm14, %v4463_v32, %v4703_v51 }
 0x43e   : > { %4735 = vst [vmem:[%s8501_s17 + $0x48] sm:$0xff] %v4719_v63 }
 0x44f   : > { %v4531_v2 = vpop.f32.mrb[16].mxu1 }
 0x450   : > { %v4532_v53 = vadd.f32 %v4531_v2, %v8493_v28  ;;  %v4533_v39 = vpop.f32.mrb[17].mxu1 }
 0x451   : > { %v4534_v4 = vadd.f32 %v4533_v39, %v8493_v28 }
 0x452   : > { %vm4688_vm15 = vcmp.ge.f32.partialorder %v4532_v53, 0.0  ;;  %v4704_v41 = vmul.f32 0.2, %v4532_v53 }
 0x453   : > { %vm4689_vm0 = vcmp.ge.f32.partialorder %v4534_v4, 0.0  ;;  %v4705_v34 = vmul.f32 0.2, %v4534_v4 }
 0x454   : > { %v4720_v49 = vsel %vm4688_vm15, %v4532_v53, %v4704_v41 }
 0x455   : > { %4736 = vst [vmem:[%s8501_s17 + $0x50] sm:$0xff] %v4720_v49  ;;  %v4721_v8 = vsel %vm4689_vm0, %v4534_v4, %v4705_v34  ;;  %v4602_v40 = vpop.f32.mrb[18].mxu0 }
 0x456   : > { %4737 = vst [vmem:[%s8501_s17 + $0x58] sm:$0xff] %v4721_v8  ;;  %v4603_v21 = vadd.f32 %v4602_v40, %v8493_v28  ;;  %v4604_v33 = vpop.f32.mrb[19].mxu0 }
 0x457   : > { %v4605_v42 = vadd.f32 %v4604_v33, %v8493_v28 }
 0x458   : > { %vm4690_vm1 = vcmp.ge.f32.partialorder %v4603_v21, 0.0  ;;  %v4706_v6 = vmul.f32 0.2, %v4603_v21  ;;  %v4673_v38 = vpop.f32.mrb[18].mxu1 }
 0x459   : > { %vm4691_vm2 = vcmp.ge.f32.partialorder %v4605_v42, 0.0  ;;  %v4707_v45 = vmul.f32 0.2, %v4605_v42  ;;  %v4674_v31 = vadd.f32 %v4673_v38, %v8493_v28  ;;  %v4675_v58 = vpop.f32.mrb[19].mxu1 }
 0x45a   : > { %v4722_v61 = vsel %vm4690_vm1, %v4603_v21, %v4706_v6  ;;  %v4676_v54 = vadd.f32 %v4675_v58, %v8493_v28 }
 0x45b   : > { %4738 = vst [vmem:[%s8501_s17 + $0x60] sm:$0xff] %v4722_v61  ;;  %v4723_v37 = vsel %vm4691_vm2, %v4605_v42, %v4707_v45  ;;  %vm4692_vm3 = vcmp.ge.f32.partialorder %v4674_v31, 0.0  ;;  %v4708_v36 = vmul.f32 0.2, %v4674_v31 }
 0x45c   : > { %4739 = vst [vmem:[%s8501_s17 + $0x68] sm:$0xff] %v4723_v37  ;;  %vm4693_vm4 = vcmp.ge.f32.partialorder %v4676_v54, 0.0  ;;  %v4709_v24 = vmul.f32 0.2, %v4676_v54 }
 0x45d   : > { %v4724_v26 = vsel %vm4692_vm3, %v4674_v31, %v4708_v36 }
 0x45e   : > { %4740 = vst [vmem:[%s8501_s17 + $0x70] sm:$0xff] %v4724_v26  ;;  %v4725_v52 = vsel %vm4693_vm4, %v4676_v54, %v4709_v24 }
 0x45f   : > { %4741 = vst [vmem:[%s8501_s17 + $0x78] sm:$0xff] %v4725_v52 }
 0x460 PF: > { %s16_s23 = sadd.s32 1, %s5671_s23   ;;  %s8867_s21 = smov %s5667_s22 }
 0x461   : > { %p13_p5 = scmp.ge.s32.totalorder %s16_s23, 4   ;;  %s8868_s22 = smov %s8870_s24 }
 0x463   :  { %15 = sbr.rel (!%p13_p5) target bundleno = 2 (0x2), region = 101 }

</bundles_post_ra>
